<compile_context>
chip_gen: v7x
topology: tpu7x:2x2x1
jax: 0.10.0
libtpu: 0.0.40
codegen_flags: <defaults>
</compile_context>

<pallas_src>
import functools
import math

import jax
import jax.numpy as jnp
import numpy as np
from jax.experimental import pallas as pl
from jax.experimental.pallas import tpu as pltpu

C = 64            # channels fixed by the module
NEG_SLOPE = 0.2   # LeakyReLU slope
BN_EPS = 1e-5


def _stage_padded(pad_ref, interior, H, W):
    """Write `interior` (H, W, C) into pad_ref (H+2, W+2, C) with a zero halo."""
    zrow = jnp.zeros((1, W + 2, C), jnp.float32)
    zcol = jnp.zeros((H, 1, C), jnp.float32)
    pad_ref[0:1, :, :] = zrow
    pad_ref[H + 1:H + 2, :, :] = zrow
    pad_ref[1:H + 1, :, :] = jnp.concatenate([zcol, interior, zcol], axis=1)


def _conv3x3_packed(pad_ref, w_ref, H, W):
    """3x3 conv over the zero-padded VMEM scratch as 3 MXU matmuls, K=3*C=192.

    pad_ref: (H+2, W+2, C) zero-padded activations (VMEM scratch).
    w_ref:   (3, 3*C, C) kw-packed weights; w_ref[kh][kw*C + ci, co].
    Returns an (H*W, C) float32 accumulator.
    """
    acc = jnp.zeros((H * W, C), jnp.float32)
    for kh in range(3):
        rows = pad_ref[kh:kh + H, :, :]                       # (H, W+2, C)
        slab = jnp.concatenate(
            [rows[:, kw:kw + W, :] for kw in range(3)], axis=2
        ).reshape(H * W, 3 * C)                               # (H*W, 192)
        acc = acc + jnp.dot(slab, w_ref[kh],
                            preferred_element_type=jnp.float32)
    return acc


def _fused_residual_kernel(x_ref, w1_ref, w2_ref, bn_ref, out_ref,
                           xpad_ref, hpad_ref, *, H, W):
    """conv1 -> bn1 -> LeakyReLU -> conv2 -> bn2 -> + identity, all in VMEM."""
    x2d = x_ref[0].astype(jnp.float32)                        # (H*W, C)
    _stage_padded(xpad_ref, x2d.reshape(H, W, C), H, W)

    # conv1 -> bn1 -> LeakyReLU(0.2)
    h = _conv3x3_packed(xpad_ref, w1_ref, H, W)
    h = h * bn_ref[0:1, :] + bn_ref[1:2, :]
    h = jnp.where(h > 0, h, NEG_SLOPE * h)
    _stage_padded(hpad_ref, h.reshape(H, W, C), H, W)

    # conv2 -> bn2 -> + identity
    y = _conv3x3_packed(hpad_ref, w2_ref, H, W)
    y = y * bn_ref[2:3, :] + bn_ref[3:4, :] + x2d
    out_ref[0] = y.astype(out_ref.dtype)


def _fold_bn(gamma, beta, running_mean, running_var, eps=BN_EPS):
    scale = gamma / jnp.sqrt(running_var + eps)
    shift = beta - running_mean * scale
    return (scale.reshape(1, C).astype(jnp.float32),
            shift.reshape(1, C).astype(jnp.float32))


def residual_block_forward(x_nchw, params):
    """Pallas implementation of _Residual_Block.forward (eval-mode BN)."""
    N, Cin, H, W = x_nchw.shape
    assert Cin == C, (Cin, C)
    x_nhwc = jnp.transpose(x_nchw, (0, 2, 3, 1)).astype(jnp.float32)
    x2d = x_nhwc.reshape(N, H * W, C)

    # Pack weights matmul-ready: (3, 3*C, C) with rows kw-major per kh.
    w1p = params["w1"].reshape(3, 3 * C, C).astype(jnp.float32)
    w2p = params["w2"].reshape(3, 3 * C, C).astype(jnp.float32)

    s1, b1 = _fold_bn(params["bn1_gamma"], params["bn1_beta"],
                      params["bn1_mean"], params["bn1_var"])
    s2, b2 = _fold_bn(params["bn2_gamma"], params["bn2_beta"],
                      params["bn2_mean"], params["bn2_var"])
    bn = jnp.concatenate([s1, b1, s2, b2], axis=0)            # (4, C)

    kernel = functools.partial(_fused_residual_kernel, H=H, W=W)
    out2d = pl.pallas_call(
        kernel,
        out_shape=jax.ShapeDtypeStruct((N, H * W, C), jnp.float32),
        grid=(N,),
        in_specs=[
            pl.BlockSpec((1, H * W, C), lambda n: (n, 0, 0)),
            pl.BlockSpec((3, 3 * C, C), lambda n: (0, 0, 0)),
            pl.BlockSpec((3, 3 * C, C), lambda n: (0, 0, 0)),
            pl.BlockSpec((4, C), lambda n: (0, 0)),
        ],
        out_specs=pl.BlockSpec((1, H * W, C), lambda n: (n, 0, 0)),
        scratch_shapes=[
            pltpu.VMEM((H + 2, W + 2, C), jnp.float32),   # padded input
            pltpu.VMEM((H + 2, W + 2, C), jnp.float32),   # padded intermediate
        ],
        compiler_params=pltpu.CompilerParams(
            dimension_semantics=("parallel",),
            vmem_limit_bytes=48 * 1024 * 1024),
    )(x2d, w1p, w2p, bn)

    out = out2d.reshape(N, H, W, C)
    return jnp.transpose(out, (0, 3, 1, 2))                   # NHWC -> NCHW


def _reference_forward(x_nchw, params):
    """Pure-JAX reference for validation."""
    x = jnp.transpose(x_nchw, (0, 2, 3, 1)).astype(jnp.float32)
    dn = ("NHWC", "HWIO", "NHWC")

    def conv(a, w):
        return jax.lax.conv_general_dilated(a, w, (1, 1), "SAME",
                                            dimension_numbers=dn)

    s1, b1 = _fold_bn(params["bn1_gamma"], params["bn1_beta"],
                      params["bn1_mean"], params["bn1_var"])
    s2, b2 = _fold_bn(params["bn2_gamma"], params["bn2_beta"],
                      params["bn2_mean"], params["bn2_var"])
    h = conv(x, params["w1"]) * s1[0] + b1[0]
    h = jnp.where(h > 0, h, NEG_SLOPE * h)
    o = conv(h, params["w2"]) * s2[0] + b2[0] + x
    return jnp.transpose(o, (0, 3, 1, 2))


def make_params(key):
    """Deterministic synthetic parameters matching the module's shapes."""
    ks = jax.random.split(key, 10)
    fan_in = C * 3 * 3
    std = 1.0 / math.sqrt(fan_in)
    # conv weights in HWIO (kh, kw, c_in, c_out)
    w1 = jax.random.uniform(ks[0], (3, 3, C, C), jnp.float32, -std, std)
    w2 = jax.random.uniform(ks[1], (3, 3, C, C), jnp.float32, -std, std)
    return {
        "w1": w1,
        "w2": w2,
        # TODO(synk): BN is implemented in eval mode (running stats); training-mode
        # batch statistics would require a cross-batch reduction pass.
        "bn1_gamma": 1.0 + 0.1 * jax.random.normal(ks[2], (C,), jnp.float32),
        "bn1_beta": 0.1 * jax.random.normal(ks[3], (C,), jnp.float32),
        "bn1_mean": 0.05 * jax.random.normal(ks[4], (C,), jnp.float32),
        "bn1_var": jnp.abs(1.0 + 0.1 * jax.random.normal(ks[5], (C,), jnp.float32)),
        "bn2_gamma": 1.0 + 0.1 * jax.random.normal(ks[6], (C,), jnp.float32),
        "bn2_beta": 0.1 * jax.random.normal(ks[7], (C,), jnp.float32),
        "bn2_mean": 0.05 * jax.random.normal(ks[8], (C,), jnp.float32),
        "bn2_var": jnp.abs(1.0 + 0.1 * jax.random.normal(ks[9], (C,), jnp.float32)),
    }


if __name__ == "__main__":
    key = jax.random.PRNGKey(0)
    kx, kp = jax.random.split(key)
    N, H, W = 2, 16, 16
    x = jax.random.normal(kx, (N, C, H, W), jnp.float32)   # PyTorch NCHW input
    params = make_params(kp)

    out = residual_block_forward(x, params)
    out = jax.block_until_ready(out)
    assert out.shape == (N, C, H, W), out.shape

    ref = jax.block_until_ready(_reference_forward(x, params))
    np.testing.assert_allclose(np.asarray(out), np.asarray(ref),
                               rtol=1e-4, atol=1e-4)
    print("KERNEL_OK")
</pallas_src>

<mosaic_0001>
module attributes {stable_mosaic.version = 11 : i64} {
  func.func @_fused_residual_kernel(%arg0: i32, %arg1: memref<1x256x64xf32, #tpu.memory_space<vmem>>, %arg2: memref<3x192x64xf32, #tpu.memory_space<vmem>>, %arg3: memref<3x192x64xf32, #tpu.memory_space<vmem>>, %arg4: memref<4x64xf32, #tpu.memory_space<vmem>>, %arg5: memref<1x256x64xf32, #tpu.memory_space<vmem>>, %arg6: memref<18x18x64xf32, #tpu.memory_space<vmem>>, %arg7: memref<18x18x64xf32, #tpu.memory_space<vmem>>) attributes {dimension_semantics = [#tpu.dimension_semantics<parallel>], iteration_bounds = array<i64: 2>, scalar_prefetch = 0 : i64, scratch_operands = 2 : i64, tpu.core_type = #tpu.core_type<tc>, window_params = [{transform_indices = @transform_0, window_bounds = array<i64: 1, 256, 64>}, {pipeline_mode = #tpu.pipeline_mode<synchronous>, transform_indices = @transform_1, window_bounds = array<i64: 3, 192, 64>}, {pipeline_mode = #tpu.pipeline_mode<synchronous>, transform_indices = @transform_2, window_bounds = array<i64: 3, 192, 64>}, {pipeline_mode = #tpu.pipeline_mode<synchronous>, transform_indices = @transform_3, window_bounds = array<i64: 4, 64>}, {transform_indices = @transform_4, window_bounds = array<i64: 1, 256, 64>}]} {
    %c0 = arith.constant 0 : index
    %c0_0 = arith.constant 0 : index
    %c0_1 = arith.constant 0 : index
    %0 = vector.load %arg1[%c0, %c0_0, %c0_1] : memref<1x256x64xf32, #tpu.memory_space<vmem>>, vector<1x256x64xf32>
    %1 = vector.shape_cast %0 : vector<1x256x64xf32> to vector<256x64xf32>
    %2 = vector.shape_cast %1 : vector<256x64xf32> to vector<16x16x64xf32>
    %cst = arith.constant 0.000000e+00 : f32
    %3 = vector.broadcast %cst : f32 to vector<1x18x64xf32>
    %cst_2 = arith.constant 0.000000e+00 : f32
    %4 = vector.broadcast %cst_2 : f32 to vector<16x1x64xf32>
    %c0_3 = arith.constant 0 : index
    %c0_4 = arith.constant 0 : index
    %c0_5 = arith.constant 0 : index
    %5 = vector.load %arg6[%c0_3, %c0_4, %c0_5] : memref<18x18x64xf32, #tpu.memory_space<vmem>>, vector<1x18x64xf32>
    tpu.vector_store %arg6[%c0_3, %c0_4, %c0_5], %3 {strides = array<i32>} : memref<18x18x64xf32, #tpu.memory_space<vmem>>, vector<1x18x64xf32>,
    %c17 = arith.constant 17 : index
    %c0_6 = arith.constant 0 : index
    %c0_7 = arith.constant 0 : index
    %6 = vector.load %arg6[%c17, %c0_6, %c0_7] : memref<18x18x64xf32, #tpu.memory_space<vmem>>, vector<1x18x64xf32>
    tpu.vector_store %arg6[%c17, %c0_6, %c0_7], %3 {strides = array<i32>} : memref<18x18x64xf32, #tpu.memory_space<vmem>>, vector<1x18x64xf32>,
    %7 = tpu.concatenate %4, %2, %4 in 1 : vector<16x1x64xf32>, vector<16x16x64xf32>, vector<16x1x64xf32> -> vector<16x18x64xf32>
    %c1 = arith.constant 1 : index
    %c0_8 = arith.constant 0 : index
    %c0_9 = arith.constant 0 : index
    %8 = vector.load %arg6[%c1, %c0_8, %c0_9] : memref<18x18x64xf32, #tpu.memory_space<vmem>>, vector<16x18x64xf32>
    tpu.vector_store %arg6[%c1, %c0_8, %c0_9], %7 {strides = array<i32>} : memref<18x18x64xf32, #tpu.memory_space<vmem>>, vector<16x18x64xf32>,
    %cst_10 = arith.constant 0.000000e+00 : f32
    %9 = vector.broadcast %cst_10 : f32 to vector<256x64xf32>
    %c0_11 = arith.constant 0 : index
    %c0_12 = arith.constant 0 : index
    %c0_13 = arith.constant 0 : index
    %10 = vector.load %arg6[%c0_11, %c0_12, %c0_13] : memref<18x18x64xf32, #tpu.memory_space<vmem>>, vector<16x18x64xf32>
    %11 = vector.extract_strided_slice %10 {offsets = [0, 0, 0], sizes = [16, 16, 64], strides = [1, 1, 1]} : vector<16x18x64xf32> to vector<16x16x64xf32>
    %12 = vector.extract_strided_slice %10 {offsets = [0, 1, 0], sizes = [16, 16, 64], strides = [1, 1, 1]} : vector<16x18x64xf32> to vector<16x16x64xf32>
    %13 = vector.extract_strided_slice %10 {offsets = [0, 2, 0], sizes = [16, 16, 64], strides = [1, 1, 1]} : vector<16x18x64xf32> to vector<16x16x64xf32>
    %14 = tpu.concatenate %11, %12, %13 in 2 : vector<16x16x64xf32>, vector<16x16x64xf32>, vector<16x16x64xf32> -> vector<16x16x192xf32>
    %15 = vector.shape_cast %14 : vector<16x16x192xf32> to vector<256x192xf32>
    %c0_14 = arith.constant 0 : index
    %c0_15 = arith.constant 0 : index
    %c0_16 = arith.constant 0 : index
    %16 = vector.load %arg2[%c0_14, %c0_15, %c0_16] : memref<3x192x64xf32, #tpu.memory_space<vmem>>, vector<1x192x64xf32>
    %17 = vector.shape_cast %16 : vector<1x192x64xf32> to vector<192x64xf32>
    %cst_17 = arith.constant dense<0.000000e+00> : vector<256x64xf32>
    %18 = tpu.matmul %15, %17, %cst_17 {dimension_numbers = #tpu.dot_dimension_numbers<[1], [0], [0], [1], [0, 0, 1, 1], [], []>} : vector<256x192xf32>, vector<192x64xf32>, vector<256x64xf32> -> vector<256x64xf32>
    %19 = arith.addf %9, %18 : vector<256x64xf32>
    %c1_18 = arith.constant 1 : index
    %c0_19 = arith.constant 0 : index
    %c0_20 = arith.constant 0 : index
    %20 = vector.load %arg6[%c1_18, %c0_19, %c0_20] : memref<18x18x64xf32, #tpu.memory_space<vmem>>, vector<16x18x64xf32>
    %21 = vector.extract_strided_slice %20 {offsets = [0, 0, 0], sizes = [16, 16, 64], strides = [1, 1, 1]} : vector<16x18x64xf32> to vector<16x16x64xf32>
    %22 = vector.extract_strided_slice %20 {offsets = [0, 1, 0], sizes = [16, 16, 64], strides = [1, 1, 1]} : vector<16x18x64xf32> to vector<16x16x64xf32>
    %23 = vector.extract_strided_slice %20 {offsets = [0, 2, 0], sizes = [16, 16, 64], strides = [1, 1, 1]} : vector<16x18x64xf32> to vector<16x16x64xf32>
    %24 = tpu.concatenate %21, %22, %23 in 2 : vector<16x16x64xf32>, vector<16x16x64xf32>, vector<16x16x64xf32> -> vector<16x16x192xf32>
    %25 = vector.shape_cast %24 : vector<16x16x192xf32> to vector<256x192xf32>
    %c1_21 = arith.constant 1 : index
    %c0_22 = arith.constant 0 : index
    %c0_23 = arith.constant 0 : index
    %26 = vector.load %arg2[%c1_21, %c0_22, %c0_23] : memref<3x192x64xf32, #tpu.memory_space<vmem>>, vector<1x192x64xf32>
    %27 = vector.shape_cast %26 : vector<1x192x64xf32> to vector<192x64xf32>
    %cst_24 = arith.constant dense<0.000000e+00> : vector<256x64xf32>
    %28 = tpu.matmul %25, %27, %cst_24 {dimension_numbers = #tpu.dot_dimension_numbers<[1], [0], [0], [1], [0, 0, 1, 1], [], []>} : vector<256x192xf32>, vector<192x64xf32>, vector<256x64xf32> -> vector<256x64xf32>
    %29 = arith.addf %19, %28 : vector<256x64xf32>
    %c2 = arith.constant 2 : index
    %c0_25 = arith.constant 0 : index
    %c0_26 = arith.constant 0 : index
    %30 = vector.load %arg6[%c2, %c0_25, %c0_26] : memref<18x18x64xf32, #tpu.memory_space<vmem>>, vector<16x18x64xf32>
    %31 = vector.extract_strided_slice %30 {offsets = [0, 0, 0], sizes = [16, 16, 64], strides = [1, 1, 1]} : vector<16x18x64xf32> to vector<16x16x64xf32>
    %32 = vector.extract_strided_slice %30 {offsets = [0, 1, 0], sizes = [16, 16, 64], strides = [1, 1, 1]} : vector<16x18x64xf32> to vector<16x16x64xf32>
    %33 = vector.extract_strided_slice %30 {offsets = [0, 2, 0], sizes = [16, 16, 64], strides = [1, 1, 1]} : vector<16x18x64xf32> to vector<16x16x64xf32>
    %34 = tpu.concatenate %31, %32, %33 in 2 : vector<16x16x64xf32>, vector<16x16x64xf32>, vector<16x16x64xf32> -> vector<16x16x192xf32>
    %35 = vector.shape_cast %34 : vector<16x16x192xf32> to vector<256x192xf32>
    %c2_27 = arith.constant 2 : index
    %c0_28 = arith.constant 0 : index
    %c0_29 = arith.constant 0 : index
    %36 = vector.load %arg2[%c2_27, %c0_28, %c0_29] : memref<3x192x64xf32, #tpu.memory_space<vmem>>, vector<1x192x64xf32>
    %37 = vector.shape_cast %36 : vector<1x192x64xf32> to vector<192x64xf32>
    %cst_30 = arith.constant dense<0.000000e+00> : vector<256x64xf32>
    %38 = tpu.matmul %35, %37, %cst_30 {dimension_numbers = #tpu.dot_dimension_numbers<[1], [0], [0], [1], [0, 0, 1, 1], [], []>} : vector<256x192xf32>, vector<192x64xf32>, vector<256x64xf32> -> vector<256x64xf32>
    %39 = arith.addf %29, %38 : vector<256x64xf32>
    %c0_31 = arith.constant 0 : index
    %c0_32 = arith.constant 0 : index
    %40 = vector.load %arg4[%c0_31, %c0_32] : memref<4x64xf32, #tpu.memory_space<vmem>>, vector<1x64xf32>
    %41 = vector.broadcast %40 : vector<1x64xf32> to vector<256x64xf32>
    %42 = arith.mulf %39, %41 : vector<256x64xf32>
    %c1_33 = arith.constant 1 : index
    %c0_34 = arith.constant 0 : index
    %43 = vector.load %arg4[%c1_33, %c0_34] : memref<4x64xf32, #tpu.memory_space<vmem>>, vector<1x64xf32>
    %44 = vector.broadcast %43 : vector<1x64xf32> to vector<256x64xf32>
    %45 = arith.addf %42, %44 : vector<256x64xf32>
    %cst_35 = arith.constant 0.000000e+00 : f32
    %46 = vector.broadcast %cst_35 : f32 to vector<256x64xf32>
    %47 = arith.cmpf ogt, %45, %46 : vector<256x64xf32>
    %cst_36 = arith.constant 2.000000e-01 : f32
    %48 = vector.broadcast %cst_36 : f32 to vector<256x64xf32>
    %49 = arith.mulf %48, %45 : vector<256x64xf32>
    %50 = arith.select %47, %45, %49 : vector<256x64xi1>, vector<256x64xf32>
    %51 = vector.shape_cast %50 : vector<256x64xf32> to vector<16x16x64xf32>
    %cst_37 = arith.constant 0.000000e+00 : f32
    %52 = vector.broadcast %cst_37 : f32 to vector<1x18x64xf32>
    %cst_38 = arith.constant 0.000000e+00 : f32
    %53 = vector.broadcast %cst_38 : f32 to vector<16x1x64xf32>
    %c0_39 = arith.constant 0 : index
    %c0_40 = arith.constant 0 : index
    %c0_41 = arith.constant 0 : index
    %54 = vector.load %arg7[%c0_39, %c0_40, %c0_41] : memref<18x18x64xf32, #tpu.memory_space<vmem>>, vector<1x18x64xf32>
    tpu.vector_store %arg7[%c0_39, %c0_40, %c0_41], %52 {strides = array<i32>} : memref<18x18x64xf32, #tpu.memory_space<vmem>>, vector<1x18x64xf32>,
    %c17_42 = arith.constant 17 : index
    %c0_43 = arith.constant 0 : index
    %c0_44 = arith.constant 0 : index
    %55 = vector.load %arg7[%c17_42, %c0_43, %c0_44] : memref<18x18x64xf32, #tpu.memory_space<vmem>>, vector<1x18x64xf32>
    tpu.vector_store %arg7[%c17_42, %c0_43, %c0_44], %52 {strides = array<i32>} : memref<18x18x64xf32, #tpu.memory_space<vmem>>, vector<1x18x64xf32>,
    %56 = tpu.concatenate %53, %51, %53 in 1 : vector<16x1x64xf32>, vector<16x16x64xf32>, vector<16x1x64xf32> -> vector<16x18x64xf32>
    %c1_45 = arith.constant 1 : index
    %c0_46 = arith.constant 0 : index
    %c0_47 = arith.constant 0 : index
    %57 = vector.load %arg7[%c1_45, %c0_46, %c0_47] : memref<18x18x64xf32, #tpu.memory_space<vmem>>, vector<16x18x64xf32>
    tpu.vector_store %arg7[%c1_45, %c0_46, %c0_47], %56 {strides = array<i32>} : memref<18x18x64xf32, #tpu.memory_space<vmem>>, vector<16x18x64xf32>,
    %cst_48 = arith.constant 0.000000e+00 : f32
    %58 = vector.broadcast %cst_48 : f32 to vector<256x64xf32>
    %c0_49 = arith.constant 0 : index
    %c0_50 = arith.constant 0 : index
    %c0_51 = arith.constant 0 : index
    %59 = vector.load %arg7[%c0_49, %c0_50, %c0_51] : memref<18x18x64xf32, #tpu.memory_space<vmem>>, vector<16x18x64xf32>
    %60 = vector.extract_strided_slice %59 {offsets = [0, 0, 0], sizes = [16, 16, 64], strides = [1, 1, 1]} : vector<16x18x64xf32> to vector<16x16x64xf32>
    %61 = vector.extract_strided_slice %59 {offsets = [0, 1, 0], sizes = [16, 16, 64], strides = [1, 1, 1]} : vector<16x18x64xf32> to vector<16x16x64xf32>
    %62 = vector.extract_strided_slice %59 {offsets = [0, 2, 0], sizes = [16, 16, 64], strides = [1, 1, 1]} : vector<16x18x64xf32> to vector<16x16x64xf32>
    %63 = tpu.concatenate %60, %61, %62 in 2 : vector<16x16x64xf32>, vector<16x16x64xf32>, vector<16x16x64xf32> -> vector<16x16x192xf32>
    %64 = vector.shape_cast %63 : vector<16x16x192xf32> to vector<256x192xf32>
    %c0_52 = arith.constant 0 : index
    %c0_53 = arith.constant 0 : index
    %c0_54 = arith.constant 0 : index
    %65 = vector.load %arg3[%c0_52, %c0_53, %c0_54] : memref<3x192x64xf32, #tpu.memory_space<vmem>>, vector<1x192x64xf32>
    %66 = vector.shape_cast %65 : vector<1x192x64xf32> to vector<192x64xf32>
    %cst_55 = arith.constant dense<0.000000e+00> : vector<256x64xf32>
    %67 = tpu.matmul %64, %66, %cst_55 {dimension_numbers = #tpu.dot_dimension_numbers<[1], [0], [0], [1], [0, 0, 1, 1], [], []>} : vector<256x192xf32>, vector<192x64xf32>, vector<256x64xf32> -> vector<256x64xf32>
    %68 = arith.addf %58, %67 : vector<256x64xf32>
    %c1_56 = arith.constant 1 : index
    %c0_57 = arith.constant 0 : index
    %c0_58 = arith.constant 0 : index
    %69 = vector.load %arg7[%c1_56, %c0_57, %c0_58] : memref<18x18x64xf32, #tpu.memory_space<vmem>>, vector<16x18x64xf32>
    %70 = vector.extract_strided_slice %69 {offsets = [0, 0, 0], sizes = [16, 16, 64], strides = [1, 1, 1]} : vector<16x18x64xf32> to vector<16x16x64xf32>
    %71 = vector.extract_strided_slice %69 {offsets = [0, 1, 0], sizes = [16, 16, 64], strides = [1, 1, 1]} : vector<16x18x64xf32> to vector<16x16x64xf32>
    %72 = vector.extract_strided_slice %69 {offsets = [0, 2, 0], sizes = [16, 16, 64], strides = [1, 1, 1]} : vector<16x18x64xf32> to vector<16x16x64xf32>
    %73 = tpu.concatenate %70, %71, %72 in 2 : vector<16x16x64xf32>, vector<16x16x64xf32>, vector<16x16x64xf32> -> vector<16x16x192xf32>
    %74 = vector.shape_cast %73 : vector<16x16x192xf32> to vector<256x192xf32>
    %c1_59 = arith.constant 1 : index
    %c0_60 = arith.constant 0 : index
    %c0_61 = arith.constant 0 : index
    %75 = vector.load %arg3[%c1_59, %c0_60, %c0_61] : memref<3x192x64xf32, #tpu.memory_space<vmem>>, vector<1x192x64xf32>
    %76 = vector.shape_cast %75 : vector<1x192x64xf32> to vector<192x64xf32>
    %cst_62 = arith.constant dense<0.000000e+00> : vector<256x64xf32>
    %77 = tpu.matmul %74, %76, %cst_62 {dimension_numbers = #tpu.dot_dimension_numbers<[1], [0], [0], [1], [0, 0, 1, 1], [], []>} : vector<256x192xf32>, vector<192x64xf32>, vector<256x64xf32> -> vector<256x64xf32>
    %78 = arith.addf %68, %77 : vector<256x64xf32>
    %c2_63 = arith.constant 2 : index
    %c0_64 = arith.constant 0 : index
    %c0_65 = arith.constant 0 : index
    %79 = vector.load %arg7[%c2_63, %c0_64, %c0_65] : memref<18x18x64xf32, #tpu.memory_space<vmem>>, vector<16x18x64xf32>
    %80 = vector.extract_strided_slice %79 {offsets = [0, 0, 0], sizes = [16, 16, 64], strides = [1, 1, 1]} : vector<16x18x64xf32> to vector<16x16x64xf32>
    %81 = vector.extract_strided_slice %79 {offsets = [0, 1, 0], sizes = [16, 16, 64], strides = [1, 1, 1]} : vector<16x18x64xf32> to vector<16x16x64xf32>
    %82 = vector.extract_strided_slice %79 {offsets = [0, 2, 0], sizes = [16, 16, 64], strides = [1, 1, 1]} : vector<16x18x64xf32> to vector<16x16x64xf32>
    %83 = tpu.concatenate %80, %81, %82 in 2 : vector<16x16x64xf32>, vector<16x16x64xf32>, vector<16x16x64xf32> -> vector<16x16x192xf32>
    %84 = vector.shape_cast %83 : vector<16x16x192xf32> to vector<256x192xf32>
    %c2_66 = arith.constant 2 : index
    %c0_67 = arith.constant 0 : index
    %c0_68 = arith.constant 0 : index
    %85 = vector.load %arg3[%c2_66, %c0_67, %c0_68] : memref<3x192x64xf32, #tpu.memory_space<vmem>>, vector<1x192x64xf32>
    %86 = vector.shape_cast %85 : vector<1x192x64xf32> to vector<192x64xf32>
    %cst_69 = arith.constant dense<0.000000e+00> : vector<256x64xf32>
    %87 = tpu.matmul %84, %86, %cst_69 {dimension_numbers = #tpu.dot_dimension_numbers<[1], [0], [0], [1], [0, 0, 1, 1], [], []>} : vector<256x192xf32>, vector<192x64xf32>, vector<256x64xf32> -> vector<256x64xf32>
    %88 = arith.addf %78, %87 : vector<256x64xf32>
    %c2_70 = arith.constant 2 : index
    %c0_71 = arith.constant 0 : index
    %89 = vector.load %arg4[%c2_70, %c0_71] : memref<4x64xf32, #tpu.memory_space<vmem>>, vector<1x64xf32>
    %90 = vector.broadcast %89 : vector<1x64xf32> to vector<256x64xf32>
    %91 = arith.mulf %88, %90 : vector<256x64xf32>
    %c3 = arith.constant 3 : index
    %c0_72 = arith.constant 0 : index
    %92 = vector.load %arg4[%c3, %c0_72] : memref<4x64xf32, #tpu.memory_space<vmem>>, vector<1x64xf32>
    %93 = vector.broadcast %92 : vector<1x64xf32> to vector<256x64xf32>
    %94 = arith.addf %91, %93 : vector<256x64xf32>
    %95 = arith.addf %94, %1 : vector<256x64xf32>
    %c0_73 = arith.constant 0 : index
    %c0_74 = arith.constant 0 : index
    %c0_75 = arith.constant 0 : index
    %96 = vector.load %arg5[%c0_73, %c0_74, %c0_75] : memref<1x256x64xf32, #tpu.memory_space<vmem>>, vector<1x256x64xf32>
    %97 = vector.shape_cast %96 : vector<1x256x64xf32> to vector<256x64xf32>
    %98 = vector.shape_cast %95 : vector<256x64xf32> to vector<1x256x64xf32>
    tpu.vector_store %arg5[%c0_73, %c0_74, %c0_75], %98 {strides = array<i32>} : memref<1x256x64xf32, #tpu.memory_space<vmem>>, vector<1x256x64xf32>,
    return
  }
  func.func @transform_0(%arg0: i32) -> (i32, i32, i32) {
    %c0_i32 = arith.constant 0 : i32
    %c0_i32_0 = arith.constant 0 : i32
    %c0_i32_1 = arith.constant 0 : i32
    return %arg0, %c0_i32, %c0_i32_0 : i32, i32, i32
  }
  func.func @transform_1(%arg0: i32) -> (i32, i32, i32) {
    %c0_i32 = arith.constant 0 : i32
    %c0_i32_0 = arith.constant 0 : i32
    %c0_i32_1 = arith.constant 0 : i32
    %c0_i32_2 = arith.constant 0 : i32
    return %c0_i32, %c0_i32_0, %c0_i32_1 : i32, i32, i32
  }
  func.func @transform_2(%arg0: i32) -> (i32, i32, i32) {
    %c0_i32 = arith.constant 0 : i32
    %c0_i32_0 = arith.constant 0 : i32
    %c0_i32_1 = arith.constant 0 : i32
    %c0_i32_2 = arith.constant 0 : i32
    return %c0_i32, %c0_i32_0, %c0_i32_1 : i32, i32, i32
  }
  func.func @transform_3(%arg0: i32) -> (i32, i32) {
    %c0_i32 = arith.constant 0 : i32
    %c0_i32_0 = arith.constant 0 : i32
    %c0_i32_1 = arith.constant 0 : i32
    return %c0_i32, %c0_i32_0 : i32, i32
  }
  func.func @transform_4(%arg0: i32) -> (i32, i32, i32) {
    %c0_i32 = arith.constant 0 : i32
    %c0_i32_0 = arith.constant 0 : i32
    %c0_i32_1 = arith.constant 0 : i32
    return %arg0, %c0_i32, %c0_i32_0 : i32, i32, i32
  }
}

</mosaic_0001>

<bundles_post_ra>
// kernel: tpu_custom_call.1
= control target key start
LH: loop header
LB: loop body
LE: loop exit
PB: predicated region body
PF: predicated region fallthrough
CT: control target
= control target key end

     0   :  { %s6243_s15 = smov 0   ;;  %s9604_s0 = inlined_call_operand.vmem [shape: f32[2,256,64], index: 0, kind: input, shape index: {}]   ;;  %s9605_s1 = inlined_call_operand.vmem [shape: f32[3,192,64], index: 1, kind: input, shape index: {}]   ;;  %s9606_s2 = inlined_call_operand.vmem [shape: f32[3,192,64], index: 2, kind: input, shape index: {}]   ;;  %s9607_s3 = inlined_call_operand.vmem [shape: f32[4,64], index: 3, kind: input, shape index: {}]   ;;  %s9608_s4 = inlined_call_operand.vmem [shape: f32[2,256,64], index: 4, kind: output, shape index: {}]  }
   0x1 LB: > { %s5282_s16 = sadd.s32 4294967295, %s6213_s15   ;;  %p5286_p0 = scmp.ge.s32.totalorder %s6213_s15, 1  ;;  %s6213_s15 = sphi %s6243_s15, %s14_s15  }
   0x2   : > { %p162_p1 = scmp.lt.s32.totalorder %s6213_s15, 3 }
   0x4   : > { %p163_p2 = pnand %p5286_p0, %p162_p1 }
   0x6   : > { %166 = sbr.rel (%p163_p2) target bundleno = 1360 (0x550), region = 36 }
   0xd   : > { %p188_p3 = scmp.lt.s32.totalorder %s5282_s16, 1  ;;  %v5291_v0 = vld [vmem:[%s9605_s1 + $0xc0] sm:$0xff]  ;;  %v5292_v1 = vld [vmem:[%s9605_s1 + $0xc8] sm:$0xff]  ;;  %v5293_v2 = vld [vmem:[%s9605_s1 + $0xd0] sm:$0xff]  ;;  %v9609_v3 = vmov 0.0|0.0   ;;  %vm230_vm0 = vcmask 523264  }
   0xe   : > { %5587 = vmatprep.subr.bf16.mxu0 %v9609_v3  ;;  %v5588_v4 = vpack.c.bf16 %v5292_v1, %v5291_v0  ;;  %v5294_v5 = vld [vmem:[%s9605_s1 + $0xd8] sm:$0xff]  ;;  %5695 = vmatprep.subr.bf16.mxu1 %v9609_v3  ;;  %v5295_v7 = vld [vmem:[%s9605_s1 + $0xe0] sm:$0xff]  ;;  %v5296_v8 = vld [vmem:[%s9605_s1 + $0xe8] sm:$0xff]  ;;  %vm271_vm1 = vcmask 1040384   ;;  %vm233_vm2 = vcmask 517120   ;;  %vm545_vm3 = vcmask 1046528  }
   0xf   : > { %s9996_s16 = smov (!%p188_p3, %s5282_s16), 1  ;;  %v5591_v6 = vpack.c.bf16 %v5294_v5, %v5293_v2  ;;  %v6285_v9 = vld [vmem:[%s9605_s1 + $0xf0] sm:$0xff]  ;;  %v6290_v10 = vld [vmem:[%s9605_s1 + $0xf8] sm:$0xff]  ;;  %v5594_v20 = vpack.c.bf16 %v5296_v8, %v5295_v7  ;;  %v6328_v44 = vld [vmem:[%s9605_s1 + $0x100] sm:$0xff]  ;;  %s6216_s23 = smov 64   ;;  %vm722_vm4 = vcmask 1045504  }
  0x10   : > { %s5585_s25 = sshll.u32 %s9996_s16, 8  ;;  %5589 = vmatpush1.bf16.msra.mxu0 %v5588_v4  ;;  %v5597_v27 = vpack.c.bf16 %v6290_v10, %v6285_v9  ;;  %v6333_v45 = vld [vmem:[%s9605_s1 + $0x108] sm:$0xff]  ;;  %v5301_v8 = vld [vmem:[%s9605_s1 + $0x110] sm:$0xff] }
  0x11   : > { %s6279_s6 = scalar_lea.vmem %s9604_s0, %s5585_s25  ;;  %5590 = vmatprep.subr.bf16.mxu0 %v9609_v3  ;;  %v5600_v7 = vpack.c.bf16 %v6333_v45, %v6328_v44  ;;  %v6465_v45 = vld [vmem:[%s9605_s1 + $0x130] sm:$0xff]  ;;  %s9441_s20 = scalar_lea.vmem %s9608_s4, %s5585_s25 }
  0x12   : > { %v198_v11 = vld [vmem:[%s6279_s6] sm:$0xff]  ;;  %v199_v12 = vld [vmem:[%s6279_s6 + $0x8] sm:$0xff]  ;;  %v200_v13 = vld [vmem:[%s6279_s6 + $0x10] sm:$0xff] }
  0x13   : > { %v272_v14 = vrot.slane %v198_v11, 7  ;;  %v273_v15 = vrot.slane %v199_v12, 7  ;;  %v201_v16 = vld [vmem:[%s6279_s6 + $0x18] sm:$0xff]  ;;  %v275_v17 = vrot.slane %v200_v13, 7  ;;  %v202_v18 = vld [vmem:[%s6279_s6 + $0x20] sm:$0xff]  ;;  %v203_v19 = vld [vmem:[%s6279_s6 + $0x28] sm:$0xff] }
  0x14   : > { %v276_v21 = vrot.slane %v201_v16, 7  ;;  %v278_v22 = vrot.slane %v202_v18, 7  ;;  %v279_v23 = vrot.slane %v203_v19, 7  ;;  %v204_v24 = vld [vmem:[%s6279_s6 + $0x30] sm:$0xff]  ;;  %v205_v25 = vld [vmem:[%s6279_s6 + $0x38] sm:$0xff]  ;;  %v206_v26 = vld [vmem:[%s6279_s6 + $0x40] sm:$0xff]  ;;  %5592 = vmatpush1.bf16.msra.mxu0 %v5591_v6 }
  0x15   : > { %v274_v28 = vsel %vm271_vm1, %v272_v14, %v273_v15  ;;  %v368_v29 = vsel %vm271_vm1, 0.0, %v272_v14  ;;  %v384_v30 = vsel %vm271_vm1, %v273_v15, 0.0  ;;  %v369_v31 = vsel %vm271_vm1, 0.0, %v275_v17  ;;  %v207_v32 = vld [vmem:[%s6279_s6 + $0x48] sm:$0xff]  ;;  %v208_v33 = vld [vmem:[%s6279_s6 + $0x50] sm:$0xff]  ;;  %v209_v34 = vld [vmem:[%s6279_s6 + $0x58] sm:$0xff]  ;;  %5593 = vmatprep.subr.bf16.mxu0 %v9609_v3 }
  0x16   : > { %401 = vst.msk [vmem:[#allocation2 + $0x18] sm:$0xff] %vm230_vm0, %v368_v29  ;;  %402 = vst.msk [vmem:[#allocation2 + $0x20] sm:$0xff] %vm230_vm0, %v274_v28  ;;  %v277_v35 = vsel %vm271_vm1, %v275_v17, %v276_v21  ;;  %v385_v36 = vsel %vm271_vm1, %v276_v21, 0.0  ;;  %v280_v37 = vsel %vm271_vm1, %v278_v22, %v279_v23  ;;  %v370_v38 = vsel %vm271_vm1, 0.0, %v278_v22  ;;  %v210_v39 = vld [vmem:[%s6279_s6 + $0x60] sm:$0xff]  ;;  %v211_v49 = vld [vmem:[%s6279_s6 + $0x68] sm:$0xff] }
  0x17   : > { %403 = vst.msk [vmem:[#allocation2 + $0x28] sm:$0x3] %vm233_vm2, %v384_v30  ;;  %406 = vst.msk [vmem:[#allocation2 + $0x40] sm:$0x3] %vm233_vm2, %v385_v36  ;;  %v386_v40 = vsel %vm271_vm1, %v279_v23, 0.0  ;;  %v281_v41 = vrot.slane %v204_v24, 7 }
  0x18   : > { %404 = vst.msk [vmem:[#allocation2 + $0x30] sm:$0xff] %vm230_vm0, %v369_v31  ;;  %405 = vst.msk [vmem:[#allocation2 + $0x38] sm:$0xff] %vm230_vm0, %v277_v35  ;;  %v282_v42 = vrot.slane %v205_v25, 7  ;;  %v284_v43 = vrot.slane %v206_v26, 7  ;;  %v285_v46 = vrot.slane %v207_v32, 7  ;;  %v287_v47 = vrot.slane %v208_v33, 7  ;;  %5595 = vmatpush1.bf16.msra.mxu0 %v5594_v20 }
  0x19   : > { %407 = vst.msk [vmem:[#allocation2 + $0x48] sm:$0xff] %vm230_vm0, %v370_v38  ;;  %408 = vst.msk [vmem:[#allocation2 + $0x50] sm:$0xff] %vm230_vm0, %v280_v37  ;;  %v288_v48 = vrot.slane %v209_v34, 7  ;;  %v290_v50 = vrot.slane %v210_v39, 7  ;;  %v212_v51 = vld [vmem:[%s6279_s6 + $0x70] sm:$0xff]  ;;  %v371_v53 = vsel %vm271_vm1, 0.0, %v281_v41  ;;  %5596 = vmatprep.subr.bf16.mxu0 %v9609_v3 }
  0x1a   : > { %409 = vst.msk [vmem:[#allocation2 + $0x58] sm:$0x3] %vm233_vm2, %v386_v40  ;;  %v283_v52 = vsel %vm271_vm1, %v281_v41, %v282_v42  ;;  %v387_v54 = vsel %vm271_vm1, %v282_v42, 0.0  ;;  %v372_v55 = vsel %vm271_vm1, 0.0, %v284_v43  ;;  %v6343_v56 = vld [vmem:[%s6279_s6 + $0x78] sm:$0xff]  ;;  %v6346_v57 = vld [vmem:[%s6279_s6 + $0x80] sm:$0xff]  ;;  %v286_v59 = vsel %vm271_vm1, %v284_v43, %v285_v46 }
  0x1b   : > { %v6349_v58 = vld [vmem:[%s6279_s6 + $0x88] sm:$0xff]  ;;  %410 = vst.msk [vmem:[#allocation2 + $0x60] sm:$0xff] %vm230_vm0, %v371_v53  ;;  %411 = vst.msk [vmem:[#allocation2 + $0x68] sm:$0xff] %vm230_vm0, %v283_v52  ;;  %v388_v60 = vsel %vm271_vm1, %v285_v46, 0.0  ;;  %v289_v61 = vsel %vm271_vm1, %v287_v47, %v288_v48  ;;  %v373_v62 = vsel %vm271_vm1, 0.0, %v287_v47  ;;  %v389_v63 = vsel %vm271_vm1, %v288_v48, 0.0 }
  0x1c   : > { %412 = vst.msk [vmem:[#allocation2 + $0x70] sm:$0x3] %vm233_vm2, %v387_v54  ;;  %415 = vst.msk [vmem:[#allocation2 + $0x88] sm:$0x3] %vm233_vm2, %v388_v60  ;;  %v291_v0 = vrot.slane %v211_v49, 7  ;;  %v374_v1 = vsel %vm271_vm1, 0.0, %v290_v50  ;;  %5598 = vmatpush1.bf16.msra.mxu0 %v5597_v27 }
  0x1d   : > { %413 = vst.msk [vmem:[#allocation2 + $0x78] sm:$0xff] %vm230_vm0, %v372_v55  ;;  %414 = vst.msk [vmem:[#allocation2 + $0x80] sm:$0xff] %vm230_vm0, %v286_v59  ;;  %v293_v2 = vrot.slane %v212_v51, 7  ;;  %v294_v4 = vrot.slane %v6343_v56, 7  ;;  %v296_v5 = vrot.slane %v6346_v57, 7  ;;  %v297_v6 = vrot.slane %v6349_v58, 7  ;;  %5599 = vmatprep.subr.bf16.mxu0 %v9609_v3 }
  0x1e   : > { %416 = vst.msk [vmem:[#allocation2 + $0x90] sm:$0xff] %vm230_vm0, %v373_v62  ;;  %417 = vst.msk [vmem:[#allocation2 + $0x98] sm:$0xff] %vm230_vm0, %v289_v61  ;;  %v5302_v11 = vld [vmem:[%s9605_s1 + $0x118] sm:$0xff]  ;;  %v6384_v13 = vld [vmem:[#allocation2 + $0x20] sm:$0xff]  ;;  %v292_v9 = vsel %vm271_vm1, %v290_v50, %v291_v0  ;;  %v390_v10 = vsel %vm271_vm1, %v291_v0, 0.0 }
  0x1f   : > { %418 = vst.msk [vmem:[#allocation2 + $0xa0] sm:$0x3] %vm233_vm2, %v389_v63  ;;  %v6382_v12 = vld [vmem:[#allocation2 + $0x18] sm:$0xff]  ;;  %v6386_v14 = vld [vmem:[#allocation2 + $0x28] sm:$0x3]  ;;  %v375_v15 = vsel %vm271_vm1, 0.0, %v293_v2  ;;  %v295_v21 = vsel %vm271_vm1, %v293_v2, %v294_v4  ;;  %v298_v27 = vsel %vm271_vm1, %v296_v5, %v297_v6  ;;  %v5603_v31 = vpack.c.bf16 %v5302_v11, %v5301_v8 }
  0x20   : > { %419 = vst.msk [vmem:[#allocation2 + $0xa8] sm:$0xff] %vm230_vm0, %v374_v1  ;;  %v955_v16 = vrot.slane %v6382_v12, 1  ;;  %v6394_v17 = vrot.slane %v6384_v13, 1  ;;  %v958_v18 = vrot.slane %v6386_v14, 1  ;;  %v6397_v19 = vld [vmem:[#allocation2 + $0x30] sm:$0xff]  ;;  %v6399_v20 = vld [vmem:[#allocation2 + $0x38] sm:$0xff]  ;;  %5601 = vmatpush1.bf16.msra.mxu0 %v5600_v7 }
  0x21   : > { %420 = vst.msk [vmem:[#allocation2 + $0xb0] sm:$0xff] %vm230_vm0, %v292_v9  ;;  %422 = vst.msk [vmem:[#allocation2 + $0xc0] sm:$0xff] %vm230_vm0, %v375_v15  ;;  %v960_v22 = vrot.slane %v6397_v19, 1  ;;  %v6407_v23 = vrot.slane %v6399_v20, 1  ;;  %v6409_v24 = vld [vmem:[#allocation2 + $0x40] sm:$0x3]  ;;  %5602 = vmatprep.subr.bf16.mxu0 %v9609_v3 }
  0x22   : > { %421 = vst.msk [vmem:[#allocation2 + $0xb8] sm:$0x3] %vm233_vm2, %v390_v10  ;;  %v6411_v25 = vld [vmem:[#allocation2 + $0x48] sm:$0xff]  ;;  %v6413_v26 = vld [vmem:[#allocation2 + $0x50] sm:$0xff]  ;;  %v6423_v28 = vsel %vm545_vm3, %v955_v16, %v6394_v17  ;;  %v963_v29 = vrot.slane %v6409_v24, 1  ;;  %v5303_v32 = vld [vmem:[%s9605_s1 + $0x120] sm:$0xff]  ;;  %v959_v38 = vsel %vm545_vm3, %v6394_v17, %v958_v18 }
  0x23   : > { %423 = vst.msk [vmem:[#allocation2 + $0xc8] sm:$0xff] %vm230_vm0, %v295_v21  ;;  %v6426_v30 = vld [vmem:[#allocation2 + $0x58] sm:$0x3]  ;;  %426 = vst.msk [vmem:[#allocation2 + $0xe0] sm:$0xff] %vm230_vm0, %v298_v27  ;;  %1035 = vrot.lane.b32.xlu0 %v6423_v28, %s6216_s23  ;;  %v6436_v33 = vsel %vm545_vm3, %v960_v22, %v6407_v23  ;;  %v6438_v34 = vld [vmem:[#allocation2 + $0x60] sm:$0xff]  ;;  %v391_v36 = vsel %vm271_vm1, %v294_v4, 0.0 }
  0x24   : > { %v6440_v35 = vld [vmem:[#allocation2 + $0x68] sm:$0xff]  ;;  %1039 = vrot.lane.b32.xlu1 %v6436_v33, %s6216_s23  ;;  %v965_v39 = vrot.slane %v6411_v25, 1  ;;  %v6453_v40 = vrot.slane %v6413_v26, 1  ;;  %424 = vst.msk [vmem:[#allocation2 + $0xd0] sm:$0x3] %vm233_vm2, %v391_v36  ;;  %v216_v41 = vld [vmem:[%s6279_s6 + $0x90] sm:$0xff]  ;;  %v964_v42 = vsel %vm545_vm3, %v6407_v23, %v963_v29  ;;  %5604 = vmatpush1.bf16.msra.mxu0 %v5603_v31 }
  0x25   : > { %v5304_v37 = vld [vmem:[%s9605_s1 + $0x128] sm:$0xff]  ;;  %v968_v43 = vrot.slane %v6426_v30, 1  ;;  %v6460_v44 = vld [vmem:[#allocation2 + $0x70] sm:$0x3]  ;;  %v6470_v46 = vld [vmem:[%s9605_s1 + $0x138] sm:$0xff]  ;;  %v970_v47 = vrot.slane %v6438_v34, 1  ;;  %5605 = vmatprep.subr.bf16.mxu0 %v9609_v3 }
  0x26   : > { %v6474_v48 = vrot.slane %v6440_v35, 1  ;;  %v6476_v49 = vld [vmem:[#allocation2 + $0x78] sm:$0xff]  ;;  %v5606_v50 = vpack.c.bf16 %v5304_v37, %v5303_v32  ;;  %v6481_v51 = vld [vmem:[%s9605_s1 + $0x140] sm:$0xff]  ;;  %v6486_v52 = vld [vmem:[%s9605_s1 + $0x148] sm:$0xff]  ;;  %v299_v55 = vrot.slane %v216_v41, 7  ;;  %v6497_v56 = vsel %vm545_vm3, %v965_v39, %v6453_v40 }
  0x27   : > { %1037 = vrot.lane.b32.xlu0 %v959_v38, %s6216_s23  ;;  %v6489_v53 = vld [vmem:[#allocation2 + $0x80] sm:$0xff]  ;;  %v6491_v54 = vld [vmem:[#allocation2 + $0x88] sm:$0x3]  ;;  %v973_v59 = vrot.slane %v6460_v44, 1  ;;  %v6500_v60 = vld [vmem:[#allocation2 + $0x90] sm:$0xff]  ;;  %v5609_v63 = vpack.c.bf16 %v6470_v46, %v6465_v45  ;;  %v969_v0 = vsel %vm545_vm3, %v6453_v40, %v968_v43  ;;  %v975_v1 = vrot.slane %v6476_v49, 1 }
  0x28   : > { %1041 = vrot.lane.b32.xlu1 %v964_v42, %s6216_s23  ;;  %v217_v61 = vld [vmem:[%s6279_s6 + $0x98] sm:$0xff]  ;;  %v218_v62 = vld [vmem:[%s6279_s6 + $0xa0] sm:$0xff]  ;;  %v376_v2 = vsel %vm271_vm1, 0.0, %v296_v5  ;;  %v219_v4 = vld [vmem:[%s6279_s6 + $0xa8] sm:$0xff]  ;;  %v5612_v11 = vpack.c.bf16 %v6486_v52, %v6481_v51  ;;  %v6519_v9 = vsel %vm545_vm3, %v970_v47, %v6474_v48  ;;  %v6522_v10 = vrot.slane %v6489_v53, 1  ;;  %5607 = vmatpush1.bf16.msra.mxu0 %v5606_v50 }
  0x29   : > { %v220_v7 = vld [vmem:[%s6279_s6 + $0xb0] sm:$0xff]  ;;  %v221_v8 = vld [vmem:[%s6279_s6 + $0xb8] sm:$0xff]  ;;  %v978_v15 = vrot.slane %v6491_v54, 1  ;;  %425 = vst.msk [vmem:[#allocation2 + $0xd8] sm:$0xff] %vm230_vm0, %v376_v2  ;;  %v392_v57 = vsel %vm271_vm1, %v297_v6, 0.0  ;;  %v222_v5 = vld [vmem:[%s6279_s6 + $0xc0] sm:$0xff]  ;;  %5608 = vmatprep.subr.bf16.mxu0 %v9609_v3  ;;  %v974_v6 = vsel %vm545_vm3, %v6474_v48, %v973_v59 }
  0x2a   : > { %v6532_v16 = vld [vmem:[#allocation2 + $0x98] sm:$0xff]  ;;  %v980_v18 = vrot.slane %v6500_v60, 1  ;;  %427 = vst.msk [vmem:[#allocation2 + $0xe8] sm:$0x3] %vm233_vm2, %v392_v57  ;;  %v300_v21 = vrot.slane %v217_v61, 7  ;;  %v377_v22 = vsel %vm271_vm1, 0.0, %v299_v55 }
  0x2b   : > { %1043 = vrot.lane.b32.xlu0 %v6497_v56, %s6216_s23  ;;  %v302_v58 = vrot.slane %v218_v62, 7  ;;  %v6541_v27 = vld [vmem:[#allocation2 + $0xa0] sm:$0x3]  ;;  %428 = vst.msk [vmem:[#allocation2 + $0xf0] sm:$0xff] %vm230_vm0, %v377_v22  ;;  %v303_v29 = vrot.slane %v219_v4, 7  ;;  %v305_v31 = vrot.slane %v220_v7, 7  ;;  %v6578_v4 = vsel %vm545_vm3, %v975_v1, %v6522_v10 }
  0x2c   : > { %1045 = vrot.lane.b32.xlu1 %v969_v0, %s6216_s23  ;;  %9776 = vst [vmem:[#allocation4_spill] sm:$0xff] %v6541_v27  ;;  %v306_v32 = vrot.slane %v221_v8, 7  ;;  %v223_v36 = vld [vmem:[%s6279_s6 + $0xc8] sm:$0xff]  ;;  %v301_v37 = vsel %vm271_vm1, %v299_v55, %v300_v21  ;;  %v393_v38 = vsel %vm271_vm1, %v300_v21, 0.0  ;;  %v308_v41 = vrot.slane %v222_v5, 7  ;;  %v224_v42 = vld [vmem:[%s6279_s6 + $0xd0] sm:$0xff]  ;;  %5610 = vmatpush1.bf16.msra.mxu0 %v5609_v63 }
  0x2d   : > { %v378_v39 = vsel %vm271_vm1, 0.0, %v302_v58  ;;  %v225_v43 = vld [vmem:[%s6279_s6 + $0xd8] sm:$0xff]  ;;  %v6551_v45 = vrot.slane %v6532_v16, 1  ;;  %429 = vst.msk [vmem:[#allocation2 + $0xf8] sm:$0xff] %vm230_vm0, %v301_v37  ;;  %v304_v46 = vsel %vm271_vm1, %v302_v58, %v303_v29  ;;  %v394_v47 = vsel %vm271_vm1, %v303_v29, 0.0  ;;  %v226_v55 = vld [vmem:[%s6279_s6 + $0xe0] sm:$0xff]  ;;  %5611 = vmatprep.subr.bf16.mxu0 %v9609_v3 }
  0x2e   : > { %430 = vst.msk [vmem:[#allocation2 + $0x100] sm:$0x3] %vm233_vm2, %v393_v38  ;;  %v307_v50 = vsel %vm271_vm1, %v305_v31, %v306_v32  ;;  %433 = vst.msk [vmem:[#allocation2 + $0x118] sm:$0x3] %vm233_vm2, %v394_v47  ;;  %v379_v59 = vsel %vm271_vm1, 0.0, %v305_v31  ;;  %v395_v61 = vsel %vm271_vm1, %v306_v32, 0.0  ;;  %v979_v21 = vsel %vm545_vm3, %v6522_v10, %v978_v15 }
  0x2f   : > { %431 = vst.msk [vmem:[#allocation2 + $0x108] sm:$0xff] %vm230_vm0, %v378_v39  ;;  %1047 = vrot.lane.b32.xlu0 %v6519_v9, %s6216_s23  ;;  %432 = vst.msk [vmem:[#allocation2 + $0x110] sm:$0xff] %vm230_vm0, %v304_v46  ;;  %v309_v62 = vrot.slane %v223_v36, 7  ;;  %v380_v0 = vsel %vm271_vm1, 0.0, %v308_v41  ;;  %v5309_v63 = vld [vmem:[%s9605_s1 + $0x150] sm:$0xff]  ;;  %v5310_v2 = vld [vmem:[%s9605_s1 + $0x158] sm:$0xff] }
  0x30   : > { %435 = vst.msk [vmem:[#allocation2 + $0x128] sm:$0xff] %vm230_vm0, %v307_v50  ;;  %1049 = vrot.lane.b32.xlu1 %v974_v6, %s6216_s23  ;;  %v983_v7 = vrot.slane %v6541_v27, 1  ;;  %434 = vst.msk [vmem:[#allocation2 + $0x120] sm:$0xff] %vm230_vm0, %v379_v59  ;;  %v311_v8 = vrot.slane %v224_v42, 7  ;;  %v312_v57 = vrot.slane %v225_v43, 7  ;;  %v227_v5 = vld [vmem:[%s6279_s6 + $0xe8] sm:$0xff]  ;;  %5613 = vmatpush1.bf16.msra.mxu0 %v5612_v11  ;;  %v5615_v15 = vpack.c.bf16 %v5310_v2, %v5309_v63 }
  0x31   : > { %436 = vst.msk [vmem:[#allocation2 + $0x130] sm:$0x3] %vm233_vm2, %v395_v61  ;;  %v6587_v22 = vld [vmem:[#allocation2 + $0xa8] sm:$0xff]  ;;  %v6589_v58 = vld [vmem:[#allocation2 + $0xb0] sm:$0xff]  ;;  %v310_v1 = vsel %vm271_vm1, %v308_v41, %v309_v62  ;;  %v396_v6 = vsel %vm271_vm1, %v309_v62, 0.0  ;;  %v314_v29 = vrot.slane %v226_v55, 7  ;;  %5614 = vmatprep.subr.bf16.mxu0 %v9609_v3  ;;  %v6622_v41 = vsel %vm545_vm3, %v980_v18, %v6551_v45 }
  0x32   : > { %437 = vst.msk [vmem:[#allocation2 + $0x138] sm:$0xff] %vm230_vm0, %v380_v0  ;;  %9777 = vst [vmem:[#allocation5_spill] sm:$0xff] %v6587_v22  ;;  %v6593_v31 = vld [vmem:[#allocation2 + $0xb8] sm:$0x3]  ;;  %v313_v32 = vsel %vm271_vm1, %v311_v8, %v312_v57  ;;  %v381_v36 = vsel %vm271_vm1, 0.0, %v311_v8  ;;  %v397_v37 = vsel %vm271_vm1, %v312_v57, 0.0  ;;  %v984_v47 = vsel %vm545_vm3, %v6551_v45, %v983_v7 }
  0x33   : > { %9778 = vst [vmem:[#allocation6_spill] sm:$0xff] %v6589_v58  ;;  %9779 = vst [vmem:[#allocation7_spill] sm:$0xff] %v6593_v31  ;;  %1051 = vrot.lane.b32.xlu0 %v6578_v4, %s6216_s23  ;;  %v5311_v51 = vld [vmem:[%s9605_s1 + $0x160] sm:$0xff]  ;;  %v5312_v52 = vld [vmem:[%s9605_s1 + $0x168] sm:$0xff]  ;;  %v315_v11 = vrot.slane %v227_v5, 7  ;;  %v382_v38 = vsel %vm271_vm1, 0.0, %v314_v29 }
  0x34   : > { %438 = vst.msk [vmem:[#allocation2 + $0x140] sm:$0xff] %vm230_vm0, %v310_v1  ;;  %440 = vst.msk [vmem:[#allocation2 + $0x150] sm:$0xff] %vm230_vm0, %v381_v36  ;;  %v1131_v39 = vrot.slane %v6382_v12, 2  ;;  %1053 = vrot.lane.b32.xlu1 %v979_v21, %s6216_s23  ;;  %v985_v42 = vrot.slane %v6587_v22, 1  ;;  %v6626_v43 = vrot.slane %v6589_v58, 1  ;;  %v6630_v46 = vrot.slane %v6384_v13, 2  ;;  %5616 = vmatpush1.bf16.msra.mxu0 %v5615_v15 }
  0x35   : > { %439 = vst.msk [vmem:[#allocation2 + $0x148] sm:$0x3] %vm233_vm2, %v396_v6  ;;  %442 = vst.msk [vmem:[#allocation2 + $0x160] sm:$0x3] %vm233_vm2, %v397_v37  ;;  %v988_v50 = vrot.slane %v6593_v31, 1  ;;  %v6635_v55 = vld [vmem:[#allocation2 + $0xc0] sm:$0xff]  ;;  %v316_v18 = vsel %vm271_vm1, %v314_v29, %v315_v11  ;;  %v5618_v0 = vpack.c.bf16 %v5312_v52, %v5311_v51  ;;  %5617 = vmatprep.subr.bf16.mxu0 %v9609_v3 }
  0x36   : > { %441 = vst.msk [vmem:[#allocation2 + $0x158] sm:$0xff] %vm230_vm0, %v313_v32  ;;  %443 = vst.msk [vmem:[#allocation2 + $0x168] sm:$0xff] %vm230_vm0, %v382_v38  ;;  %v6637_v59 = vld [vmem:[#allocation2 + $0xc8] sm:$0xff]  ;;  %v398_v61 = vsel %vm271_vm1, %v315_v11, 0.0  ;;  %v6641_v62 = vld [vmem:[#allocation2 + $0xd0] sm:$0x3]  ;;  %v6646_v63 = vsel %vm722_vm4, %v1131_v39, %v6630_v46  ;;  %v6661_v8 = vsel %vm545_vm3, %v985_v42, %v6626_v43 }
  0x37   : > { %9780 = vst [vmem:[#allocation8_spill] sm:$0xff] %v6635_v55  ;;  %9781 = vst [vmem:[#allocation9_spill] sm:$0xff] %v6637_v59  ;;  %1055 = vrot.lane.b32.xlu0 %v6622_v41, %s6216_s23  ;;  %v5313_v2 = vld [vmem:[%s9605_s1 + $0x170] sm:$0xff]  ;;  %v5314_v7 = vld [vmem:[%s9605_s1 + $0x178] sm:$0xff]  ;;  %v990_v57 = vrot.slane %v6635_v55, 1  ;;  %v6665_v5 = vrot.slane %v6637_v59, 1  ;;  %5315 = vmatprep.mubr.msk.f32.mxu0 %vm230_vm0, %v6646_v63  ;;  %v989_v21 = vsel %vm545_vm3, %v6626_v43, %v988_v50 }
  0x38   : > { %9782 = vst [vmem:[#allocation10_spill] sm:$0xff] %v6641_v62  ;;  %444 = vst.msk [vmem:[#allocation2 + $0x170] sm:$0xff] %vm230_vm0, %v316_v18  ;;  %1057 = vrot.lane.b32.xlu1 %v984_v47, %s6216_s23  ;;  %v993_v1 = vrot.slane %v6641_v62, 1  ;;  %v6672_v6 = vld [vmem:[#allocation2 + $0xd8] sm:$0xff]  ;;  %v6674_v29 = vld [vmem:[#allocation2 + $0xe0] sm:$0xff]  ;;  %5619 = vmatpush1.bf16.msra.mxu0 %v5618_v0  ;;  %v5621_v36 = vpack.c.bf16 %v5314_v7, %v5313_v2 }
  0x39   : > { %9783 = vst [vmem:[#allocation11_spill] sm:$0xff] %v6646_v63  ;;  %445 = vst.msk [vmem:[#allocation2 + $0x178] sm:$0x3] %vm233_vm2, %v398_v61  ;;  %v228_v15 = vld [vmem:[%s6279_s6 + $0xf0] sm:$0xff]  ;;  %v6677_v32 = vld [vmem:[#allocation2 + $0xe8] sm:$0x3]  ;;  %5620 = vmatprep.subr.bf16.mxu0 %v9609_v3  ;;  %v6686_v51 = vsel %vm545_vm3, %v990_v57, %v6665_v5 }
  0x3a   : > { %9784 = vst [vmem:[#allocation12_spill] sm:$0xff] %v6672_v6  ;;  %9785 = vst [vmem:[#allocation13_spill] sm:$0xff] %v6674_v29  ;;  %v229_v37 = vld [vmem:[%s6279_s6 + $0xf8] sm:$0xff]  ;;  %v995_v52 = vrot.slane %v6672_v6, 1  ;;  %v6690_v11 = vrot.slane %v6674_v29, 1  ;;  %v317_v38 = vrot.slane %v228_v15, 7  ;;  %v994_v39 = vsel %vm545_vm3, %v6665_v5, %v993_v1 }
  0x3b   : > { %9786 = vst [vmem:[#allocation14_spill] sm:$0xff] %v6677_v32  ;;  %1059 = vrot.lane.b32.xlu0 %v6661_v8, %s6216_s23  ;;  %v998_v42 = vrot.slane %v6677_v32, 1  ;;  %v6695_v47 = vld [vmem:[#allocation2 + $0xf0] sm:$0xff]  ;;  %v6697_v50 = vld [vmem:[#allocation2 + $0xf8] sm:$0xff]  ;;  %v318_v18 = vrot.slane %v229_v37, 7  ;;  %v6217_v15 = vmov 0.0  }
  0x3c   : > { %1061 = vrot.lane.b32.xlu1 %v989_v21, %s6216_s23  ;;  %9787 = vst [vmem:[#allocation15_spill] sm:$0xff] %v6695_v47  ;;  %9788 = vst [vmem:[#allocation16_spill] sm:$0xff] %v6697_v50  ;;  %v6699_v61 = vld [vmem:[#allocation2 + $0x100] sm:$0x3]  ;;  %5622 = vmatpush1.bf16.msra.mxu0 %v5621_v36  ;;  %v383_v0 = vsel %vm271_vm1, 0.0, %v317_v38  ;;  %v6711_v57 = vsel %vm545_vm3, %v995_v52, %v6690_v11  ;;  %v1000_v21 = vrot.slane %v6695_v47, 1 }
  0x3d   : > { %9789 = vst [vmem:[#allocation17_spill] sm:$0xff] %v6699_v61  ;;  %5623 = vmatprep.subr.bf16.mxu0 %v9609_v3  ;;  %v319_v2 = vsel %vm271_vm1, %v317_v38, %v318_v18  ;;  %446 = vst.msk [vmem:[#allocation2 + $0x180] sm:$0xff] %vm230_vm0, %v383_v0  ;;  %v399_v7 = vsel %vm271_vm1, %v318_v18, 0.0  ;;  %v6715_v1 = vrot.slane %v6697_v50, 1  ;;  %v999_v36 = vsel %vm545_vm3, %v6690_v11, %v998_v42  ;;  %v6734_v52 = vld [vmem:[#allocation2 + $0x108] sm:$0xff]  ;;  %v6736_v38 = vld [vmem:[#allocation2 + $0x110] sm:$0xff] }
  0x3e   : > { %447 = vst.msk [vmem:[#allocation2 + $0x188] sm:$0xff] %vm230_vm0, %v319_v2  ;;  %231 = vst.msk [vmem:[#allocation2] sm:$0xff] %vm230_vm0, %v6217_v15  ;;  %v1003_v37 = vrot.slane %v6699_v61, 1  ;;  %v1005_v0 = vrot.slane %v6734_v52, 1  ;;  %v6749_v42 = vrot.slane %v6736_v38, 1  ;;  %v6756_v3 = vld [vmem:[#allocation2 + $0x128] sm:$0xff] }
  0x3f   : > { %1063 = vrot.lane.b32.xlu0 %v6686_v51, %s6216_s23  ;;  %448 = vst.msk [vmem:[#allocation2 + $0x190] sm:$0x3] %vm233_vm2, %v399_v7  ;;  %234 = vst.msk [vmem:[#allocation2 + $0x10] sm:$0x3] %vm233_vm2, %v6217_v15  ;;  %v6745_v18 = vsel %vm545_vm3, %v1000_v21, %v6715_v1  ;;  %v6758_v63 = vld [vmem:[#allocation2 + $0x130] sm:$0x3] }
  0x40   : > { %1065 = vrot.lane.b32.xlu1 %v994_v39, %s6216_s23  ;;  %232 = vst.msk [vmem:[#allocation2 + $0x8] sm:$0xff] %vm230_vm0, %v6217_v15  ;;  %236 = vst.msk [vmem:[#allocation2 + $0x198] sm:$0xff] %vm230_vm0, %v6217_v15  ;;  %v6738_v39 = vld [vmem:[#allocation2 + $0x118] sm:$0x3]  ;;  %v1004_v2 = vsel %vm545_vm3, %v6715_v1, %v1003_v37  ;;  %v6765_v21 = vsel %vm545_vm3, %v1005_v0, %v6749_v42  ;;  %v6769_v37 = vrot.slane %v6756_v3, 1  ;;  %v6776_v61 = vld [vmem:[#allocation2 + $0x140] sm:$0xff] }
  0x41   : > { %237 = vst.msk [vmem:[#allocation2 + $0x1a0] sm:$0xff] %vm230_vm0, %v6217_v15  ;;  %2747 = vst.msk [vmem:[#allocation3] sm:$0xff] %vm230_vm0, %v6217_v15  ;;  %v1008_v7 = vrot.slane %v6738_v39, 1  ;;  %v6778_v50 = vld [vmem:[#allocation2 + $0x148] sm:$0x3]  ;;  %v6796_v47 = vld [vmem:[#allocation2 + $0x158] sm:$0xff] }
  0x42   : > { %238 = vst.msk [vmem:[#allocation2 + $0x1a8] sm:$0x3] %vm233_vm2, %v6217_v15  ;;  %2749 = vst.msk [vmem:[#allocation3 + $0x10] sm:$0x3] %vm233_vm2, %v6217_v15  ;;  %v6798_v32 = vld [vmem:[#allocation2 + $0x160] sm:$0x3] }
  0x43   : > { %2748 = vst.msk [vmem:[#allocation3 + $0x8] sm:$0xff] %vm230_vm0, %v6217_v15  ;;  %2751 = vst.msk [vmem:[#allocation3 + $0x198] sm:$0xff] %vm230_vm0, %v6217_v15  ;;  %1067 = vrot.lane.b32.xlu0 %v6711_v57, %s6216_s23  ;;  %v6816_v29 = vld [vmem:[#allocation2 + $0x170] sm:$0xff]  ;;  %v6818_v6 = vld [vmem:[#allocation2 + $0x178] sm:$0x3] }
  0x44   : > { %2752 = vst.msk [vmem:[#allocation3 + $0x1a0] sm:$0xff] %vm230_vm0, %v6217_v15  ;;  %9790 = vst [vmem:[#allocation18_spill] sm:$0xff] %v6734_v52  ;;  %1069 = vrot.lane.b32.xlu1 %v999_v36, %s6216_s23  ;;  %v6774_v52 = vld [vmem:[#allocation2 + $0x138] sm:$0xff]  ;;  %v457_v27 = vld [vmem:[#allocation2 + $0x40] sm:$0x3] }
  0x45   : > { %2753 = vst.msk [vmem:[#allocation3 + $0x1a8] sm:$0x3] %vm233_vm2, %v6217_v15  ;;  %9791 = vst [vmem:[#allocation19_spill] sm:$0xff] %v6736_v38  ;;  %v6754_v15 = vld [vmem:[#allocation2 + $0x120] sm:$0xff]  ;;  %v1013_v38 = vrot.slane %v6758_v63, 1  ;;  %v6836_v62 = vld [vmem:[#allocation2 + $0x188] sm:$0xff] }
  0x46   : > { %9792 = vst [vmem:[#allocation20_spill] sm:$0xff] %v6738_v39  ;;  %9793 = vst [vmem:[#allocation21_spill] sm:$0xff] %v6754_v15  ;;  %v1010_v36 = vrot.slane %v6754_v15, 1  ;;  %v1009_v39 = vsel %vm545_vm3, %v6749_v42, %v1008_v7  ;;  %v6789_v7 = vrot.slane %v6776_v61, 1  ;;  %v6794_v15 = vld [vmem:[#allocation2 + $0x150] sm:$0xff] }
  0x47   : > { %9794 = vst [vmem:[#allocation22_spill] sm:$0xff] %v6756_v3  ;;  %9795 = vst [vmem:[#allocation23_spill] sm:$0xff] %v6758_v63  ;;  %1071 = vrot.lane.b32.xlu0 %v6745_v18, %s6216_s23  ;;  %v1014_v63 = vsel %vm545_vm3, %v6769_v37, %v1013_v38  ;;  %v1018_v3 = vrot.slane %v6778_v50, 1  ;;  %v6809_v38 = vrot.slane %v6796_v47, 1  ;;  %v6838_v59 = vld [vmem:[#allocation2 + $0x190] sm:$0x3] }
  0x48   : > { %1073 = vrot.lane.b32.xlu1 %v1004_v2, %s6216_s23  ;;  %9796 = vst [vmem:[#allocation24_spill] sm:$0xff] %v6774_v52  ;;  %9797 = vst [vmem:[#allocation25_spill] sm:$0xff] %v6776_v61  ;;  %v6785_v0 = vsel %vm545_vm3, %v1010_v36, %v6769_v37  ;;  %v1015_v2 = vrot.slane %v6774_v52, 1  ;;  %v1020_v36 = vrot.slane %v6794_v15, 1  ;;  %v1023_v61 = vrot.slane %v6798_v32, 1  ;;  %v6814_v52 = vld [vmem:[#allocation2 + $0x168] sm:$0xff] }
  0x49   : > { %9798 = vst [vmem:[#allocation26_spill] sm:$0xff] %v6778_v50  ;;  %9799 = vst [vmem:[#allocation27_spill] sm:$0xff] %v6794_v15  ;;  %v1019_v50 = vsel %vm545_vm3, %v6789_v7, %v1018_v3  ;;  %v6829_v3 = vrot.slane %v6816_v29, 1  ;;  %v6834_v15 = vld [vmem:[#allocation2 + $0x180] sm:$0xff]  ;;  %v6854_v55 = vld [vmem:[#allocation2 + $0x8] sm:$0xff] }
  0x4a   : > { %9800 = vst [vmem:[#allocation28_spill] sm:$0xff] %v6796_v47  ;;  %9801 = vst [vmem:[#allocation29_spill] sm:$0xff] %v6798_v32  ;;  %v1024_v32 = vsel %vm545_vm3, %v6809_v38, %v1023_v61  ;;  %v1028_v47 = vrot.slane %v6818_v6, 1  ;;  %v1031_v61 = vrot.slane %v6836_v62, 1  ;;  %v6856_v31 = vld [vmem:[#allocation2 + $0x10] sm:$0x3] }
  0x4b   : > { %1075 = vrot.lane.b32.xlu0 %v6765_v21, %s6216_s23  ;;  %9802 = vst [vmem:[#allocation30_spill] sm:$0xff] %v6814_v52  ;;  %9803 = vst [vmem:[#allocation31_spill] sm:$0xff] %v6816_v29  ;;  %v1033_v29 = vrot.slane %v6838_v59, 1 }
  0x4c   : > { %1077 = vrot.lane.b32.xlu1 %v1009_v39, %s6216_s23  ;;  %v6805_v39 = vsel %vm545_vm3, %v1015_v2, %v6789_v7  ;;  %9804 = vst [vmem:[#allocation32_spill] sm:$0xff] %v6818_v6  ;;  %v1025_v2 = vrot.slane %v6814_v52, 1  ;;  %9805 = vst [vmem:[#allocation33_spill] sm:$0xff] %v6834_v15  ;;  %v1029_v6 = vsel %vm545_vm3, %v6829_v3, %v1028_v47  ;;  %v6852_v52 = vld [vmem:[#allocation2] sm:$0xff] }
  0x4d   : > { %9806 = vst [vmem:[#allocation34_spill] sm:$0xff] %v6836_v62  ;;  %9807 = vst [vmem:[#allocation35_spill] sm:$0xff] %v6838_v59  ;;  %v547_v62 = vrot.slane %v6854_v55, 1  ;;  %v1034_v47 = vsel %vm545_vm3, %v1031_v61, %v1033_v29  ;;  %v549_v59 = vrot.slane %v6856_v31, 1 }
  0x4f   : > { %1079 = vrot.lane.b32.xlu0 %v6785_v0, %s6216_s23  ;;  %v550_v22 = vsel %vm545_vm3, %v547_v62, %v549_v59 }
  0x50   : > { %1081 = vrot.lane.b32.xlu1 %v1014_v63, %s6216_s23  ;;  %v6825_v63 = vsel %vm545_vm3, %v1020_v36, %v6809_v38  ;;  %v1030_v36 = vrot.slane %v6834_v15, 1  ;;  %v454_v15 = vld [vmem:[#allocation2 + $0x28] sm:$0x3] }
  0x53   : > { %1083 = vrot.lane.b32.xlu0 %v6805_v39, %s6216_s23 }
  0x54   : > { %1085 = vrot.lane.b32.xlu1 %v1019_v50, %s6216_s23  ;;  %v6845_v50 = vsel %vm545_vm3, %v1025_v2, %v6829_v3  ;;  %v546_v2 = vrot.slane %v6852_v52, 1 }
  0x56   : > { %v548_v58 = vsel %vm545_vm3, %v546_v2, %v547_v62  ;;  %v463_v62 = vld [vmem:[#allocation2 + $0x70] sm:$0x3] }
  0x57   : > { %1087 = vrot.lane.b32.xlu0 %v6825_v63, %s6216_s23  ;;  %v475_v2 = vld [vmem:[#allocation2 + $0xd0] sm:$0x3] }
  0x58   : > { %1089 = vrot.lane.b32.xlu1 %v1024_v32, %s6216_s23  ;;  %v1032_v32 = vsel %vm545_vm3, %v1030_v36, %v1031_v61  ;;  %v559_v36 = vrot.slane %v457_v27, 1  ;;  %v460_v61 = vld [vmem:[#allocation2 + $0x58] sm:$0x3]  ;;  %v569_v27 = vrot.slane %v463_v62, 1 }
  0x59   : > { %v564_v59 = vrot.slane %v460_v61, 1  ;;  %v1134_v61 = vrot.slane %v6386_v14, 2  ;;  %v837_v14 = vld [vmem:[%s9605_s1 + $0x10] sm:$0xff] }
  0x5b   : > { %1091 = vrot.lane.b32.xlu0 %v6845_v50, %s6216_s23 }
  0x5c   : > { %1093 = vrot.lane.b32.xlu1 %v1029_v6, %s6216_s23  ;;  %v554_v6 = vrot.slane %v454_v15, 1  ;;  %v472_v15 = vld [vmem:[#allocation2 + $0xb8] sm:$0x3] }
  0x5e   : > { %v555_v29 = vsel %vm545_vm3, %v6394_v17, %v554_v6  ;;  %v565_v17 = vsel %vm545_vm3, %v6453_v40, %v564_v59  ;;  %v481_v6 = vld [vmem:[#allocation2 + $0x100] sm:$0x3] }
  0x5f   : > { %1095 = vrot.lane.b32.xlu0 %v1032_v32, %s6216_s23  ;;  %v560_v32 = vsel %vm545_vm3, %v6407_v23, %v559_v36  ;;  %v570_v23 = vsel %vm545_vm3, %v6474_v48, %v569_v27  ;;  %v487_v36 = vld [vmem:[#allocation2 + $0x130] sm:$0x3]  ;;  %v1136_v27 = vrot.slane %v6397_v19, 2 }
  0x60   : > { %1097 = vrot.lane.b32.xlu1 %v1034_v47, %s6216_s23  ;;  %v478_v47 = vld [vmem:[#allocation2 + $0xe8] sm:$0x3] }
  0x63   : > { %626 = vrot.lane.b32.xlu0 %v548_v58, %s6216_s23  ;;  %v469_v58 = vld [vmem:[#allocation2 + $0xa0] sm:$0x3] }
  0x64   : > { %628 = vrot.lane.b32.xlu1 %v550_v22, %s6216_s23  ;;  %v466_v22 = vld [vmem:[#allocation2 + $0x88] sm:$0x3]  ;;  %v579_v40 = vrot.slane %v469_v58, 1 }
  0x66   : > { %v580_v48 = vsel %vm545_vm3, %v6551_v45, %v579_v40 }
  0x67   : > { %630 = vrot.lane.b32.xlu0 %v6423_v28, %s6216_s23  ;;  %v574_v28 = vrot.slane %v466_v22, 1  ;;  %v6943_v22 = vrot.slane %v6399_v20, 2 }
  0x68   : > { %632 = vrot.lane.b32.xlu1 %v555_v29, %s6216_s23  ;;  %v484_v29 = vld [vmem:[#allocation2 + $0x118] sm:$0x3] }
  0x6b   : > { %634 = vrot.lane.b32.xlu0 %v6436_v33, %s6216_s23  ;;  %v575_v33 = vsel %vm545_vm3, %v6522_v10, %v574_v28  ;;  %v589_v10 = vrot.slane %v475_v2, 1 }
  0x6c   : > { %636 = vrot.lane.b32.xlu1 %v560_v32, %s6216_s23 }
  0x6d   : > { %v590_v45 = vsel %vm545_vm3, %v6665_v5, %v589_v10  ;;  %v604_v5 = vrot.slane %v484_v29, 1 }
  0x6f   : > { %638 = vrot.lane.b32.xlu0 %v6497_v56, %s6216_s23  ;;  %v584_v56 = vrot.slane %v472_v15, 1  ;;  %v6960_v15 = vsel %vm722_vm4, %v1136_v27, %v6943_v22  ;;  %v1850_v27 = vld [vmem:[#allocation2 + $0x48] sm:$0xff] }
  0x70   : > { %640 = vrot.lane.b32.xlu1 %v565_v17, %s6216_s23  ;;  %v1135_v17 = vsel %vm722_vm4, %v6630_v46, %v1134_v61 }
  0x73   : > { %642 = vrot.lane.b32.xlu0 %v6519_v9, %s6216_s23  ;;  %v585_v9 = vsel %vm545_vm3, %v6626_v43, %v584_v56  ;;  %v599_v43 = vrot.slane %v481_v6, 1 }
  0x74   : > { %644 = vrot.lane.b32.xlu1 %v570_v23, %s6216_s23 }
  0x77   : > { %646 = vrot.lane.b32.xlu0 %v6578_v4, %s6216_s23  ;;  %v594_v4 = vrot.slane %v478_v47, 1 }
  0x78   : > { %648 = vrot.lane.b32.xlu1 %v575_v33, %s6216_s23 }
  0x7b   : > { %650 = vrot.lane.b32.xlu0 %v6622_v41, %s6216_s23  ;;  %v595_v41 = vsel %vm545_vm3, %v6690_v11, %v594_v4  ;;  %v609_v11 = vrot.slane %v487_v36, 1  ;;  %v6985_v4 = vrot.slane %v6413_v26, 2 }
  0x7c   : > { %652 = vrot.lane.b32.xlu1 %v580_v48, %s6216_s23  ;;  %v9808_v48 = vmov 0.0|0.0  }
  0x7f   : > { %654 = vrot.lane.b32.xlu0 %v6661_v8, %s6216_s23  ;;  %v600_v8 = vsel %vm545_vm3, %v6715_v1, %v599_v43  ;;  %v835_v1 = vld [vmem:[%s9605_s1] sm:$0xff]  ;;  %v1848_v43 = vld [vmem:[#allocation2 + $0x38] sm:$0xff] }
  0x80   : > { %656 = vrot.lane.b32.xlu1 %v585_v9, %s6216_s23  ;;  %v1944_v36 = vrot.slane %v1848_v43, 1 }
  0x83   : > { %658 = vrot.lane.b32.xlu0 %v6686_v51, %s6216_s23  ;;  %v605_v51 = vsel %vm545_vm3, %v6749_v42, %v604_v5  ;;  %v610_v42 = vsel %vm545_vm3, %v6769_v37, %v609_v11  ;;  %v838_v37 = vld [vmem:[%s9605_s1 + $0x18] sm:$0xff] }
  0x84   : > { %660 = vrot.lane.b32.xlu1 %v590_v45, %s6216_s23  ;;  %v5627_v33 = vpack.c.bf16 %v838_v37, %v837_v14  ;;  %v1851_v14 = vld [vmem:[#allocation2 + $0x50] sm:$0xff] }
  0x87   : > { %662 = vrot.lane.b32.xlu0 %v6711_v57, %s6216_s23  ;;  %v490_v57 = vld [vmem:[#allocation2 + $0x148] sm:$0x3] }
  0x88   : > { %664 = vrot.lane.b32.xlu1 %v595_v41, %s6216_s23  ;;  %v614_v32 = vrot.slane %v490_v57, 1  ;;  %v1847_v41 = vld [vmem:[#allocation2 + $0x30] sm:$0xff] }
  0x89   : > { %v1943_v5 = vrot.slane %v1847_v41, 1 }
  0x8a   : > { %v615_v23 = vsel %vm545_vm3, %v6789_v7, %v614_v32  ;;  %v839_v7 = vld [vmem:[%s9605_s1 + $0x20] sm:$0xff] }
  0x8b   : > { %666 = vrot.lane.b32.xlu0 %v6745_v18, %s6216_s23  ;;  %v836_v18 = vld [vmem:[%s9605_s1 + $0x8] sm:$0xff]  ;;  %v1945_v57 = vsel %vm545_vm3, %v1943_v5, %v1944_v36  ;;  %v1154_v5 = vrot.slane %v6491_v54, 2 }
  0x8c   : > { %668 = vrot.lane.b32.xlu1 %v600_v8, %s6216_s23  ;;  %v5624_v59 = vpack.c.bf16 %v836_v18, %v835_v1  ;;  %v1849_v1 = vld [vmem:[#allocation2 + $0x40] sm:$0x3] }
  0x8d   : > { %v1946_v61 = vrot.slane %v1849_v1, 1 }
  0x8f   : > { %670 = vrot.lane.b32.xlu0 %v6765_v21, %s6216_s23  ;;  %v493_v21 = vld [vmem:[#allocation2 + $0x160] sm:$0x3] }
  0x90   : > { %672 = vrot.lane.b32.xlu1 %v605_v51, %s6216_s23  ;;  %v619_v28 = vrot.slane %v493_v21, 1  ;;  %v1146_v21 = vrot.slane %v6438_v34, 2 }
  0x92   : > { %v620_v2 = vsel %vm545_vm3, %v6809_v38, %v619_v28  ;;  %v1141_v38 = vrot.slane %v6411_v25, 2  ;;  %v1949_v28 = vrot.slane %v1851_v14, 1 }
  0x93   : > { %674 = vrot.lane.b32.xlu0 %v6785_v0, %s6216_s23 }
  0x94   : > { %676 = vrot.lane.b32.xlu1 %v610_v42, %s6216_s23  ;;  %v7004_v11 = vsel %vm722_vm4, %v1141_v38, %v6985_v4  ;;  %v1853_v38 = vld [vmem:[#allocation2 + $0x60] sm:$0xff] }
  0x95   : > { %v1036_v62 = vpop.permute.xlu0 %1035  ;;  %v1953_v41 = vrot.slane %v1853_v38, 1 }
  0x96   : > { %v1211_v0 = vsel %vm230_vm0, %v6382_v12, %v1036_v62  ;;  %v1040_v58 = vpop.permute.xlu1 %1039  ;;  %v1139_v12 = vrot.slane %v6409_v24, 2  ;;  %v496_v24 = vld [vmem:[#allocation2 + $0x178] sm:$0x3]  ;;  %v845_v62 = vld [vmem:[%s9605_s1 + $0x50] sm:$0xff] }
  0x97   : > { %1397 = vmatmul.mubr.f32.vlgmr.msra.gmra.mrb[0].mxu0 %v1211_v0  ;;  %678 = vrot.lane.b32.xlu0 %v6805_v39, %s6216_s23  ;;  %v840_v39 = vld [vmem:[%s9605_s1 + $0x28] sm:$0xff]  ;;  %v1213_v9 = vsel %vm230_vm0, %v6397_v19, %v1040_v58  ;;  %v624_v47 = vrot.slane %v496_v24, 1  ;;  %v842_v19 = vld [vmem:[%s9605_s1 + $0x38] sm:$0xff] }
  0x98   : > { %5625 = vmatpush1.bf16.msra.mxu0 %v5624_v59  ;;  %5316 = vmatprep.mubr.msk.f32.mxu0 %vm230_vm0, %v1135_v17  ;;  %v5630_v10 = vpack.c.bf16 %v840_v39, %v839_v7  ;;  %v7025_v59 = vrot.slane %v6440_v35, 2  ;;  %v1947_v17 = vsel %vm545_vm3, %v1944_v36, %v1946_v61  ;;  %v1852_v39 = vld [vmem:[#allocation2 + $0x58] sm:$0x3]  ;;  %v851_v36 = vld [vmem:[%s9605_s1 + $0x80] sm:$0xff]  ;;  %v853_v61 = vld [vmem:[%s9605_s1 + $0x90] sm:$0xff] }
  0x99   : > { %v1038_v40 = vpop.permute.xlu0 %1037  ;;  %5626 = vmatprep.subr.bf16.mxu0 %v9808_v48  ;;  %680 = vrot.lane.b32.xlu1 %v615_v23, %s6216_s23  ;;  %v625_v6 = vsel %vm545_vm3, %v6829_v3, %v624_v47  ;;  %v1144_v3 = vrot.slane %v6426_v30, 2  ;;  %v1948_v23 = vrot.slane %v1850_v27, 1  ;;  %v7061_v47 = vrot.slane %v6489_v53, 2 }
  0x9a   : > { %v1212_v56 = vsel %vm230_vm0, %v6384_v13, %v1038_v40  ;;  %v1042_v45 = vpop.permute.xlu1 %1041  ;;  %v1140_v13 = vsel %vm722_vm4, %v6943_v22, %v1139_v12  ;;  %v1149_v40 = vrot.slane %v6460_v44, 2  ;;  %v847_v12 = vld [vmem:[%s9605_s1 + $0x60] sm:$0xff] }
  0x9b   : > { %1402 = vmatmul.mubr.f32.gmra.mrb[2].mxu0 %v1212_v56  ;;  %682 = vrot.lane.b32.xlu0 %v6825_v63, %s6216_s23  ;;  %v841_v63 = vld [vmem:[%s9605_s1 + $0x30] sm:$0xff]  ;;  %v1214_v29 = vsel %vm230_vm0, %v6399_v20, %v1042_v45  ;;  %v844_v20 = vld [vmem:[%s9605_s1 + $0x48] sm:$0xff]  ;;  %v1145_v32 = vsel %vm722_vm4, %v6985_v4, %v1144_v3  ;;  %v1950_v7 = vsel %vm545_vm3, %v1948_v23, %v1949_v28 }
  0x9c   : > { %5317 = vmatprep.mubr.msk.f32.mxu0 %vm230_vm0, %v6960_v15  ;;  %5628 = vmatpush1.bf16.msra.mxu0 %v5627_v33  ;;  %v5633_v8 = vpack.c.bf16 %v842_v19, %v841_v63  ;;  %v7041_v33 = vsel %vm722_vm4, %v1146_v21, %v7025_v59  ;;  %v849_v45 = vld [vmem:[%s9605_s1 + $0x70] sm:$0xff]  ;;  %v1854_v63 = vld [vmem:[#allocation2 + $0x68] sm:$0xff]  ;;  %v1155_v1 = vsel %vm722_vm4, %v7061_v47, %v1154_v5  ;;  %v1857_v21 = vld [vmem:[#allocation2 + $0x80] sm:$0xff] }
  0x9d   : > { %5629 = vmatprep.subr.bf16.mxu0 %v9808_v48  ;;  %684 = vrot.lane.b32.xlu1 %v620_v2, %s6216_s23  ;;  %v1044_v51 = vpop.permute.xlu0 %1043  ;;  %v1951_v2 = vrot.slane %v1852_v39, 1  ;;  %v1954_v43 = vrot.slane %v1854_v63, 1  ;;  %v1855_v3 = vld [vmem:[#allocation2 + $0x70] sm:$0x3]  ;;  %v1959_v27 = vrot.slane %v1857_v21, 1 }
  0x9e   : > { %v1215_v30 = vsel %vm230_vm0, %v6411_v25, %v1044_v51  ;;  %v1046_v42 = vpop.permute.xlu1 %1045  ;;  %v846_v25 = vld [vmem:[%s9605_s1 + $0x58] sm:$0xff] }
  0x9f   : > { %1407 = vmatmul.mubr.f32.gmra.mrb[4].mxu0 %v1213_v9  ;;  %686 = vrot.lane.b32.xlu0 %v6845_v50, %s6216_s23  ;;  %v843_v50 = vld [vmem:[%s9605_s1 + $0x40] sm:$0xff]  ;;  %v1216_v37 = vsel %vm230_vm0, %v6413_v26, %v1046_v42  ;;  %v5639_v0 = vpack.c.bf16 %v846_v25, %v845_v62  ;;  %v848_v26 = vld [vmem:[%s9605_s1 + $0x68] sm:$0xff]  ;;  %v1150_v9 = vsel %vm722_vm4, %v7025_v59, %v1149_v40 }
  0xa0   : > { %5318 = vmatprep.mubr.msk.f32.mxu0 %vm230_vm0, %v1140_v13  ;;  %5631 = vmatpush1.bf16.msra.mxu0 %v5630_v10  ;;  %v5636_v18 = vpack.c.bf16 %v844_v20, %v843_v50  ;;  %v5642_v56 = vpack.c.bf16 %v848_v26, %v847_v12  ;;  %v1151_v10 = vrot.slane %v6476_v49, 2  ;;  %v1952_v13 = vsel %vm545_vm3, %v1949_v28, %v1951_v2  ;;  %v855_v28 = vld [vmem:[%s9605_s1 + $0xa0] sm:$0xff]  ;;  %v1858_v40 = vld [vmem:[#allocation2 + $0x88] sm:$0x3] }
  0xa1   : > { %5632 = vmatprep.subr.bf16.mxu0 %v9808_v48  ;;  %688 = vrot.lane.b32.xlu1 %v625_v6, %s6216_s23  ;;  %v1048_v58 = vpop.permute.xlu0 %1047  ;;  %v1955_v51 = vsel %vm545_vm3, %v1953_v41, %v1954_v43  ;;  %v1956_v20 = vrot.slane %v1855_v3, 1 }
  0xa2   : > { %v1217_v44 = vsel %vm230_vm0, %v6438_v34, %v1048_v58  ;;  %v1050_v24 = vpop.permute.xlu1 %1049  ;;  %v850_v34 = vld [vmem:[%s9605_s1 + $0x78] sm:$0xff] }
  0xa3   : > { %1412 = vmatmul.mubr.f32.gmra.mrb[6].mxu0 %v1214_v29  ;;  %2023 = vrot.lane.b32.xlu0 %v1945_v57, %s6216_s23  ;;  %v1218_v19 = vsel %vm230_vm0, %v6440_v35, %v1050_v24  ;;  %v5645_v6 = vpack.c.bf16 %v850_v34, %v849_v45  ;;  %v852_v35 = vld [vmem:[%s9605_s1 + $0x88] sm:$0xff]  ;;  %v1957_v42 = vsel %vm545_vm3, %v1954_v43, %v1956_v20  ;;  %v9811_v24 = vld [vmem:[#allocation6_spill] sm:$0xff] }
  0xa4   : > { %5319 = vmatprep.mubr.msk.f32.mxu0 %vm230_vm0, %v7004_v11  ;;  %5634 = vmatpush1.bf16.msra.mxu0 %v5633_v8  ;;  %v7077_v8 = vsel %vm722_vm4, %v1151_v10, %v7061_v47  ;;  %v5648_v50 = vpack.c.bf16 %v852_v35, %v851_v36  ;;  %v857_v10 = vld [vmem:[%s9605_s1 + $0xb0] sm:$0xff]  ;;  %v1861_v35 = vld [vmem:[#allocation2 + $0xa0] sm:$0x3] }
  0xa5   : > { %5635 = vmatprep.subr.bf16.mxu0 %v9808_v48  ;;  %2025 = vrot.lane.b32.xlu1 %v1947_v17, %s6216_s23  ;;  %v1052_v29 = vpop.permute.xlu0 %1051  ;;  %v1859_v34 = vld [vmem:[#allocation2 + $0x90] sm:$0xff] }
  0xa6   : > { %v1219_v54 = vsel %vm230_vm0, %v6476_v49, %v1052_v29  ;;  %v1054_v57 = vpop.permute.xlu1 %1053  ;;  %v854_v49 = vld [vmem:[%s9605_s1 + $0x98] sm:$0xff] }
  0xa7   : > { %1417 = vmatmul.mubr.f32.gmra.mrb[8].mxu0 %v1215_v30  ;;  %2027 = vrot.lane.b32.xlu0 %v1950_v7, %s6216_s23  ;;  %v1156_v30 = vrot.slane %v6500_v60, 2  ;;  %v1220_v62 = vsel %vm230_vm0, %v6489_v53, %v1054_v57  ;;  %v5651_v25 = vpack.c.bf16 %v854_v49, %v853_v61  ;;  %v856_v53 = vld [vmem:[%s9605_s1 + $0xa8] sm:$0xff]  ;;  %v1961_v7 = vrot.slane %v1858_v40, 1  ;;  %v9812_v29 = vld [vmem:[#allocation7_spill] sm:$0xff]  ;;  %v7170_v49 = vld [vmem:[#allocation2 + $0xb0] sm:$0xff] }
  0xa8   : > { %5320 = vmatprep.mubr.msk.f32.mxu0 %vm230_vm0, %v1145_v32  ;;  %5637 = vmatpush1.bf16.msra.mxu0 %v5636_v18  ;;  %v7097_v18 = vrot.slane %v6532_v16, 2  ;;  %v1856_v32 = vld [vmem:[#allocation2 + $0x78] sm:$0xff]  ;;  %v5654_v26 = vpack.c.bf16 %v856_v53, %v855_v28  ;;  %v1164_v5 = vrot.slane %v9812_v29, 2  ;;  %v9814_v57 = vld [vmem:[#allocation9_spill] sm:$0xff]  ;;  %v1969_v21 = vrot.slane %v7170_v49, 1  ;;  %v9816_v40 = vld [vmem:[#allocation12_spill] sm:$0xff] }
  0xa9   : > { %5638 = vmatprep.subr.bf16.mxu0 %v9808_v48  ;;  %2029 = vrot.lane.b32.xlu1 %v1952_v13, %s6216_s23  ;;  %v1958_v17 = vrot.slane %v1856_v32, 1  ;;  %v1056_v14 = vpop.permute.xlu0 %1055  ;;  %v1962_v45 = vsel %vm545_vm3, %v1959_v27, %v1961_v7  ;;  %v1860_v13 = vld [vmem:[#allocation2 + $0x98] sm:$0xff]  ;;  %v7168_v61 = vld [vmem:[#allocation2 + $0xa8] sm:$0xff] }
  0xaa   : > { %v1221_v12 = vsel %vm230_vm0, %v6500_v60, %v1056_v14  ;;  %v1058_v39 = vpop.permute.xlu1 %1057  ;;  %v858_v60 = vld [vmem:[%s9605_s1 + $0xb8] sm:$0xff]  ;;  %v1968_v32 = vrot.slane %v7168_v61, 1 }
  0xab   : > { %1422 = vmatmul.mubr.f32.gmra.mrb[10].mxu0 %v1216_v37  ;;  %2031 = vrot.lane.b32.xlu0 %v1955_v51, %s6216_s23  ;;  %v7113_v37 = vsel %vm722_vm4, %v1156_v30, %v7097_v18  ;;  %v1960_v58 = vsel %vm545_vm3, %v1958_v17, %v1959_v27  ;;  %v1222_v38 = vsel %vm230_vm0, %v6532_v16, %v1058_v39  ;;  %v1966_v51 = vrot.slane %v1861_v35, 1  ;;  %v9815_v17 = vld [vmem:[#allocation10_spill] sm:$0xff]  ;;  %v9820_v35 = vld [vmem:[#allocation16_spill] sm:$0xff] }
  0xac   : > { %5321 = vmatprep.mubr.msk.f32.mxu0 %vm230_vm0, %v7041_v33  ;;  %5640 = vmatpush1.bf16.msra.mxu0 %v5639_v0  ;;  %v9809_v0 = vld [vmem:[#allocation4_spill] sm:$0xff]  ;;  %v5657_v63 = vpack.c.bf16 %v858_v60, %v857_v10  ;;  %v1169_v27 = vrot.slane %v9815_v17, 2  ;;  %v1970_v14 = vsel %vm545_vm3, %v1968_v32, %v1969_v21  ;;  %v9821_v32 = vld [vmem:[#allocation17_spill] sm:$0xff] }
  0xad   : > { %5641 = vmatprep.subr.bf16.mxu0 %v9808_v48  ;;  %2033 = vrot.lane.b32.xlu1 %v1957_v42, %s6216_s23  ;;  %v1159_v23 = vrot.slane %v9809_v0, 2  ;;  %v1060_v41 = vpop.permute.xlu0 %1059  ;;  %v7184_v0 = vld [vmem:[#allocation2 + $0xb8] sm:$0x3]  ;;  %v7246_v17 = vld [vmem:[#allocation2 + $0xe8] sm:$0x3] }
  0xae   : > { %v1062_v3 = vpop.permute.xlu1 %1061  ;;  %v1971_v28 = vrot.slane %v7184_v0, 1 }
  0xaf   : > { %1427 = vmatmul.mubr.f32.gmra.mrb[12].mxu0 %v1217_v44  ;;  %2035 = vrot.lane.b32.xlu0 %v1960_v58, %s6216_s23  ;;  %v1160_v44 = vsel %vm722_vm4, %v7097_v18, %v1159_v23  ;;  %v1224_v42 = vsel %vm230_vm0, %v9811_v24, %v1062_v3  ;;  %v7230_v3 = vld [vmem:[#allocation2 + $0xd8] sm:$0xff] }
  0xb0   : > { %5322 = vmatprep.mubr.msk.f32.mxu0 %vm230_vm0, %v1150_v9  ;;  %5643 = vmatpush1.bf16.msra.mxu0 %v5642_v56  ;;  %v9810_v56 = vld [vmem:[#allocation5_spill] sm:$0xff]  ;;  %v7133_v9 = vrot.slane %v9811_v24, 2  ;;  %v1972_v39 = vsel %vm545_vm3, %v1969_v21, %v1971_v28  ;;  %v1179_v21 = vrot.slane %v9821_v32, 2 }
  0xb1   : > { %5644 = vmatprep.subr.bf16.mxu0 %v9808_v48  ;;  %v1161_v2 = vrot.slane %v9810_v56, 2  ;;  %2037 = vrot.lane.b32.xlu1 %v1962_v45, %s6216_s23  ;;  %v1223_v16 = vsel %vm230_vm0, %v9810_v56, %v1060_v41  ;;  %v7201_v56 = vld [vmem:[#allocation2 + $0xc8] sm:$0xff] }
  0xb2   : > { %v1066_v53 = vpop.permute.xlu1 %1065  ;;  %v1974_v10 = vrot.slane %v7201_v56, 1  ;;  %v7292_v32 = vld [vmem:[#allocation2 + $0x108] sm:$0xff] }
  0xb3   : > { %1432 = vmatmul.mubr.f32.gmra.mrb[14].mxu0 %v1218_v19  ;;  %v1963_v19 = vrot.slane %v1859_v34, 1  ;;  %v7149_v43 = vsel %vm722_vm4, %v1161_v2, %v7133_v9  ;;  %v1226_v2 = vsel %vm230_vm0, %v9814_v57, %v1066_v53  ;;  %v9818_v34 = vld [vmem:[#allocation14_spill] sm:$0xff] }
  0xb4   : > { %5323 = vmatprep.mubr.msk.f32.mxu0 %vm230_vm0, %v7077_v8  ;;  %5646 = vmatpush1.bf16.msra.mxu0 %v5645_v6  ;;  %v1964_v6 = vrot.slane %v1860_v13, 1  ;;  %v1174_v13 = vrot.slane %v9818_v34, 2  ;;  %v9822_v53 = vld [vmem:[#allocation18_spill] sm:$0xff] }
  0xb5   : > { %5647 = vmatprep.subr.bf16.mxu0 %v9808_v48 }
  0xb6   : > { %v1965_v36 = vsel %vm545_vm3, %v1963_v19, %v1964_v6  ;;  %v1967_v30 = vsel %vm545_vm3, %v1964_v6, %v1966_v51  ;;  %v1070_v41 = vpop.permute.xlu1 %1069 }
  0xb7   : > { %1437 = vmatmul.mubr.f32.gmra.mrb[16].mxu0 %v1219_v54  ;;  %2039 = vrot.lane.b32.xlu0 %v1965_v36, %s6216_s23  ;;  %v1165_v54 = vsel %vm722_vm4, %v7133_v9, %v1164_v5  ;;  %v9819_v5 = vld [vmem:[#allocation15_spill] sm:$0xff] }
  0xb8   : > { %5324 = vmatprep.mubr.msk.f32.mxu0 %vm230_vm0, %v1155_v1  ;;  %5649 = vmatpush1.bf16.msra.mxu0 %v5648_v50  ;;  %v9813_v50 = vld [vmem:[#allocation8_spill] sm:$0xff]  ;;  %v7163_v1 = vrot.slane %v9814_v57, 2  ;;  %v1176_v36 = vrot.slane %v9819_v5, 2 }
  0xb9   : > { %5650 = vmatprep.subr.bf16.mxu0 %v9808_v48  ;;  %v1166_v20 = vrot.slane %v9813_v50, 2  ;;  %2041 = vrot.lane.b32.xlu1 %v1967_v30, %s6216_s23 }
  0xba   : > { %v1170_v58 = vsel %vm722_vm4, %v7163_v1, %v1169_v27 }
  0xbb   : > { %1442 = vmatmul.mubr.f32.gmra.mrb[18].mxu0 %v1220_v62  ;;  %v1064_v62 = vpop.permute.xlu0 %1063  ;;  %2043 = vrot.lane.b32.xlu0 %v1970_v14, %s6216_s23  ;;  %v1981_v14 = vrot.slane %v7246_v17, 1 }
  0xbc   : > { %5325 = vmatprep.mubr.msk.f32.mxu0 %vm230_vm0, %v7113_v37  ;;  %5652 = vmatpush1.bf16.msra.mxu0 %v5651_v25  ;;  %v7179_v25 = vsel %vm722_vm4, %v1166_v20, %v7163_v1  ;;  %v1225_v23 = vsel %vm230_vm0, %v9813_v50, %v1064_v62  ;;  %v1978_v20 = vrot.slane %v7230_v3, 1 }
  0xbd   : > { %5653 = vmatprep.subr.bf16.mxu0 %v9808_v48  ;;  %2045 = vrot.lane.b32.xlu1 %v1972_v39, %s6216_s23  ;;  %v7261_v39 = vld [vmem:[#allocation2 + $0xf0] sm:$0xff] }
  0xbf   : > { %1447 = vmatmul.mubr.f32.gmra.mrb[20].mxu0 %v1221_v12  ;;  %v1171_v12 = vrot.slane %v9816_v40, 2  ;;  %v1068_v60 = vpop.permute.xlu0 %1067 }
  0xc0   : > { %5326 = vmatprep.mubr.msk.f32.mxu0 %vm230_vm0, %v1160_v44  ;;  %5655 = vmatpush1.bf16.msra.mxu0 %v5654_v26  ;;  %v9817_v26 = vld [vmem:[#allocation13_spill] sm:$0xff]  ;;  %v7199_v44 = vld [vmem:[#allocation2 + $0xc0] sm:$0xff]  ;;  %v1227_v19 = vsel %vm230_vm0, %v9816_v40, %v1068_v60  ;;  %v9823_v40 = vld [vmem:[#allocation19_spill] sm:$0xff] }
  0xc1   : > { %5656 = vmatprep.subr.bf16.mxu0 %v9808_v48  ;;  %v7195_v7 = vrot.slane %v9817_v26, 2  ;;  %v1973_v24 = vrot.slane %v7199_v44, 1  ;;  %v1228_v50 = vsel %vm230_vm0, %v9817_v26, %v1070_v41  ;;  %v7277_v41 = vld [vmem:[#allocation2 + $0x100] sm:$0x3] }
  0xc3   : > { %1452 = vmatmul.mubr.f32.gmra.mrb[22].mxu0 %v1222_v38  ;;  %v7210_v45 = vsel %vm722_vm4, %v1171_v12, %v7195_v7  ;;  %v1975_v38 = vsel %vm545_vm3, %v1973_v24, %v1974_v10  ;;  %v1175_v29 = vsel %vm722_vm4, %v7195_v7, %v1174_v13  ;;  %v1072_v30 = vpop.permute.xlu0 %1071  ;;  %v7257_v12 = vrot.slane %v9823_v40, 2 }
  0xc4   : > { %5327 = vmatprep.mubr.msk.f32.mxu0 %vm230_vm0, %v7149_v43  ;;  %5658 = vmatpush1.bf16.msra.mxu0 %v5657_v63  ;;  %v7215_v63 = vld [vmem:[#allocation2 + $0xd0] sm:$0x3]  ;;  %v1229_v27 = vsel %vm230_vm0, %v9819_v5, %v1072_v30  ;;  %v1986_v5 = vrot.slane %v7277_v41, 1 }
  0xc5   : > { %5659 = vmatprep.subr.bf16.mxu0 %v9808_v48  ;;  %2047 = vrot.lane.b32.xlu0 %v1975_v38, %s6216_s23  ;;  %v1976_v6 = vrot.slane %v7215_v63, 1  ;;  %v9824_v38 = vld [vmem:[#allocation20_spill] sm:$0xff] }
  0xc7   : > { %1457 = vmatmul.mubr.f32.gmra.mrb[24].mxu0 %v1223_v16  ;;  %v7226_v16 = vrot.slane %v9820_v35, 2  ;;  %v1977_v51 = vsel %vm545_vm3, %v1974_v10, %v1976_v6  ;;  %v1983_v10 = vrot.slane %v7261_v39, 1  ;;  %v1076_v34 = vpop.permute.xlu0 %1075 }
  0xc8   : > { %5328 = vmatprep.mubr.msk.f32.mxu0 %vm230_vm0, %v1165_v54  ;;  %2049 = vrot.lane.b32.xlu1 %v1977_v51, %s6216_s23  ;;  %v7232_v54 = vld [vmem:[#allocation2 + $0xe0] sm:$0xff]  ;;  %v9825_v51 = vld [vmem:[#allocation21_spill] sm:$0xff] }
  0xc9   : > { %v1979_v57 = vrot.slane %v7232_v54, 1  ;;  %v1180_v28 = vsel %vm722_vm4, %v7226_v16, %v1179_v21  ;;  %v7294_v21 = vld [vmem:[#allocation2 + $0x110] sm:$0xff] }
  0xca   : > { %9827 = vst [vmem:[#allocation4_spill] sm:$0xff] %v7294_v21 }
  0xcb   : > { %1462 = vmatmul.mubr.f32.gmra.mrb[26].mxu0 %v1224_v42  ;;  %v7241_v42 = vsel %vm722_vm4, %v1176_v36, %v7226_v16  ;;  %v1980_v62 = vsel %vm545_vm3, %v1978_v20, %v1979_v57  ;;  %v1982_v26 = vsel %vm545_vm3, %v1979_v57, %v1981_v14  ;;  %v9826_v20 = vld [vmem:[#allocation22_spill] sm:$0xff]  ;;  %v1989_v14 = vrot.slane %v7294_v21, 1 }
  0xcc   : > { %5329 = vmatprep.mubr.msk.f32.mxu0 %vm230_vm0, %v7179_v25  ;;  %2051 = vrot.lane.b32.xlu0 %v1980_v62, %s6216_s23  ;;  %v7288_v57 = vrot.slane %v9826_v20, 2 }
  0xcd   : > { %2053 = vrot.lane.b32.xlu1 %v1982_v26, %s6216_s23 }
  0xcf   : > { %1467 = vmatmul.mubr.f32.gmra.mrb[28].mxu0 %v1225_v23  ;;  %v1074_v23 = vpop.permute.xlu1 %1073 }
  0xd0   : > { %5330 = vmatprep.mubr.msk.f32.mxu0 %vm230_vm0, %v1170_v58  ;;  %v1181_v58 = vrot.slane %v9822_v53, 2  ;;  %v1230_v24 = vsel %vm230_vm0, %v9820_v35, %v1074_v23  ;;  %v1080_v23 = vpop.permute.xlu0 %1079 }
  0xd2   : > { %v7272_v13 = vsel %vm722_vm4, %v1181_v58, %v7257_v12 }
  0xd3   : > { %1472 = vmatmul.mubr.f32.gmra.mrb[30].mxu0 %v1226_v2  ;;  %v7263_v2 = vld [vmem:[#allocation2 + $0xf8] sm:$0xff]  ;;  %v1078_v36 = vpop.permute.xlu1 %1077 }
  0xd4   : > { %5331 = vmatprep.mubr.msk.f32.mxu0 %vm230_vm0, %v7210_v45  ;;  %v1984_v60 = vrot.slane %v7263_v2, 1  ;;  %v1232_v62 = vsel %vm230_vm0, %v9823_v40, %v1078_v36  ;;  %v1233_v40 = vsel %vm230_vm0, %v9825_v51, %v1080_v23  ;;  %v7323_v36 = vld [vmem:[#allocation2 + $0x120] sm:$0xff] }
  0xd5   : > { %9832 = vst [vmem:[#allocation6_spill] sm:$0xff] %v7323_v36 }
  0xd6   : > { %v1985_v6 = vsel %vm545_vm3, %v1983_v10, %v1984_v60  ;;  %v1987_v30 = vsel %vm545_vm3, %v1984_v60, %v1986_v5 }
  0xd7   : > { %1477 = vmatmul.mubr.f32.gmra.mrb[32].mxu0 %v1227_v19  ;;  %v1184_v19 = vrot.slane %v9824_v38, 2  ;;  %2055 = vrot.lane.b32.xlu0 %v1985_v6, %s6216_s23  ;;  %v1082_v60 = vpop.permute.xlu1 %1081  ;;  %v9830_v38 = vld [vmem:[#allocation24_spill] sm:$0xff]  ;;  %v9831_v6 = vld [vmem:[#allocation25_spill] sm:$0xff] }
  0xd8   : > { %5332 = vmatprep.mubr.msk.f32.mxu0 %vm230_vm0, %v1175_v29  ;;  %v1231_v29 = vsel %vm230_vm0, %v9822_v53, %v1076_v34  ;;  %2057 = vrot.lane.b32.xlu1 %v1987_v30, %s6216_s23  ;;  %v9828_v53 = vld [vmem:[#allocation23_spill] sm:$0xff] }
  0xd9   : > { %v1185_v35 = vsel %vm722_vm4, %v7257_v12, %v1184_v19  ;;  %v1189_v58 = vrot.slane %v9828_v53, 2  ;;  %v1191_v19 = vrot.slane %v9830_v38, 2 }
  0xdb   : > { %1482 = vmatmul.mubr.f32.gmra.mrb[34].mxu0 %v1228_v50  ;;  %v1186_v50 = vrot.slane %v9825_v51, 2  ;;  %v1190_v34 = vsel %vm722_vm4, %v7288_v57, %v1189_v58  ;;  %v1234_v51 = vsel %vm230_vm0, %v9826_v20, %v1082_v60  ;;  %v7339_v58 = vld [vmem:[#allocation2 + $0x130] sm:$0x3]  ;;  %v9836_v60 = vld [vmem:[#allocation27_spill] sm:$0xff] }
  0xdc   : > { %5333 = vmatprep.mubr.msk.f32.mxu0 %vm230_vm0, %v7241_v42  ;;  %9835 = vst [vmem:[#allocation8_spill] sm:$0xff] %v7339_v58 }
  0xdf   : > { %1487 = vmatmul.mubr.f32.gmra.mrb[36].mxu0 %v1229_v27  ;;  %v1988_v27 = vrot.slane %v7292_v32, 1 }
  0xe0   : > { %5334 = vmatprep.mubr.msk.f32.mxu0 %vm230_vm0, %v1180_v28  ;;  %v7303_v28 = vsel %vm722_vm4, %v1186_v50, %v7288_v57  ;;  %v1993_v50 = vrot.slane %v7323_v36, 1  ;;  %v7414_v36 = vld [vmem:[#allocation2 + $0x168] sm:$0xff] }
  0xe1   : > { %v1990_v26 = vsel %vm545_vm3, %v1988_v27, %v1989_v14 }
  0xe2   : > { %2059 = vrot.lane.b32.xlu0 %v1990_v26, %s6216_s23  ;;  %v1996_v26 = vrot.slane %v7339_v58, 1  ;;  %v7385_v58 = vld [vmem:[#allocation2 + $0x150] sm:$0xff] }
  0xe3   : > { %1492 = vmatmul.mubr.f32.gmra.mrb[38].mxu0 %v1230_v24  ;;  %v7308_v24 = vld [vmem:[#allocation2 + $0x118] sm:$0x3]  ;;  %9844 = vst [vmem:[#allocation13_spill] sm:$0xff] %v7385_v58 }
  0xe4   : > { %5335 = vmatprep.mubr.msk.f32.mxu0 %vm230_vm0, %v7272_v13  ;;  %9829 = vst [vmem:[#allocation5_spill] sm:$0xff] %v7308_v24  ;;  %v1991_v10 = vrot.slane %v7308_v24, 1  ;;  %v7416_v24 = vld [vmem:[#allocation2 + $0x170] sm:$0xff] }
  0xe5   : > { %9850 = vst [vmem:[#allocation16_spill] sm:$0xff] %v7416_v24 }
  0xe6   : > { %v1992_v5 = vsel %vm545_vm3, %v1989_v14, %v1991_v10  ;;  %v9834_v14 = vld [vmem:[#allocation26_spill] sm:$0xff] }
  0xe7   : > { %1497 = vmatmul.mubr.f32.gmra.mrb[40].mxu0 %v1231_v29  ;;  %v7319_v29 = vrot.slane %v9831_v6, 2  ;;  %2061 = vrot.lane.b32.xlu1 %v1992_v5, %s6216_s23  ;;  %v1194_v23 = vrot.slane %v9834_v14, 2  ;;  %v7356_v14 = vld [vmem:[#allocation2 + $0x140] sm:$0xff] }
  0xe8   : > { %5336 = vmatprep.mubr.msk.f32.mxu0 %vm230_vm0, %v1185_v35  ;;  %v7325_v35 = vld [vmem:[#allocation2 + $0x128] sm:$0xff]  ;;  %9839 = vst [vmem:[#allocation10_spill] sm:$0xff] %v7356_v14 }
  0xe9   : > { %9833 = vst [vmem:[#allocation7_spill] sm:$0xff] %v7325_v35  ;;  %v1994_v30 = vrot.slane %v7325_v35, 1  ;;  %v7334_v27 = vsel %vm722_vm4, %v1191_v19, %v7319_v29  ;;  %v1195_v10 = vsel %vm722_vm4, %v7319_v29, %v1194_v23  ;;  %v9837_v19 = vld [vmem:[#allocation28_spill] sm:$0xff]  ;;  %v1999_v23 = vrot.slane %v7356_v14, 1  ;;  %v7387_v35 = vld [vmem:[#allocation2 + $0x158] sm:$0xff] }
  0xea   : > { %v7350_v5 = vrot.slane %v9837_v19, 2  ;;  %9845 = vst [vmem:[#allocation14_spill] sm:$0xff] %v7387_v35 }
  0xeb   : > { %1502 = vmatmul.mubr.f32.gmra.mrb[42].mxu0 %v1232_v62  ;;  %v1084_v62 = vpop.permute.xlu0 %1083  ;;  %v1995_v53 = vsel %vm545_vm3, %v1993_v50, %v1994_v30  ;;  %v7354_v50 = vld [vmem:[#allocation2 + $0x138] sm:$0xff] }
  0xec   : > { %5337 = vmatprep.mubr.msk.f32.mxu0 %vm230_vm0, %v7303_v28  ;;  %2063 = vrot.lane.b32.xlu0 %v1995_v53, %s6216_s23  ;;  %v1235_v20 = vsel %vm230_vm0, %v9830_v38, %v1084_v62  ;;  %9838 = vst [vmem:[#allocation9_spill] sm:$0xff] %v7354_v50  ;;  %v1998_v62 = vrot.slane %v7354_v50, 1 }
  0xef   : > { %1507 = vmatmul.mubr.f32.gmra.mrb[44].mxu0 %v1233_v40  ;;  %v1086_v40 = vpop.permute.xlu1 %1085  ;;  %v1088_v53 = vpop.permute.xlu0 %1087 }
  0xf0   : > { %5338 = vmatprep.mubr.msk.f32.mxu0 %vm230_vm0, %v1190_v34  ;;  %v1196_v34 = vrot.slane %v9836_v60, 2  ;;  %v1236_v38 = vsel %vm230_vm0, %v9831_v6, %v1086_v40  ;;  %v1237_v6 = vsel %vm230_vm0, %v9836_v60, %v1088_v53  ;;  %v2003_v53 = vrot.slane %v7385_v58, 1 }
  0xf3   : > { %1512 = vmatmul.mubr.f32.gmra.mrb[46].mxu0 %v1234_v51  ;;  %v1997_v51 = vsel %vm545_vm3, %v1994_v30, %v1996_v26  ;;  %v7365_v30 = vsel %vm722_vm4, %v1196_v34, %v7350_v5  ;;  %v1090_v14 = vpop.permute.xlu1 %1089 }
  0xf4   : > { %5339 = vmatprep.mubr.msk.f32.mxu0 %vm230_vm0, %v7334_v27  ;;  %2065 = vrot.lane.b32.xlu1 %v1997_v51, %s6216_s23  ;;  %v2000_v51 = vsel %vm545_vm3, %v1998_v62, %v1999_v23  ;;  %v9843_v62 = vld [vmem:[#allocation31_spill] sm:$0xff]  ;;  %v1238_v60 = vsel %vm230_vm0, %v9837_v19, %v1090_v14 }
  0xf5   : > { %2067 = vrot.lane.b32.xlu0 %v2000_v51, %s6216_s23 }
  0xf7   : > { %1517 = vmatmul.mubr.f32.gmra.mrb[48].mxu0 %v1235_v20  ;;  %v9840_v20 = vld [vmem:[#allocation29_spill] sm:$0xff] }
  0xf8   : > { %5340 = vmatprep.mubr.msk.f32.mxu0 %vm230_vm0, %v1195_v10  ;;  %v1199_v26 = vrot.slane %v9840_v20, 2  ;;  %v7370_v10 = vld [vmem:[#allocation2 + $0x148] sm:$0x3]  ;;  %v9842_v20 = vld [vmem:[#allocation30_spill] sm:$0xff] }
  0xf9   : > { %9841 = vst [vmem:[#allocation12_spill] sm:$0xff] %v7370_v10  ;;  %v2001_v40 = vrot.slane %v7370_v10, 1  ;;  %v1201_v50 = vrot.slane %v9842_v20, 2  ;;  %v1092_v10 = vpop.permute.xlu0 %1091 }
  0xfa   : > { %v1200_v34 = vsel %vm722_vm4, %v7350_v5, %v1199_v26  ;;  %v2004_v26 = vrot.slane %v7387_v35, 1  ;;  %v1239_v19 = vsel %vm230_vm0, %v9842_v20, %v1092_v10  ;;  %v1094_v35 = vpop.permute.xlu1 %1093  ;;  %v2008_v20 = vrot.slane %v7414_v36, 1 }
  0xfb   : > { %1522 = vmatmul.mubr.f32.gmra.mrb[50].mxu0 %v1236_v38  ;;  %v7381_v38 = vrot.slane %v9843_v62, 2  ;;  %v2002_v51 = vsel %vm545_vm3, %v1999_v23, %v2001_v40  ;;  %v1240_v10 = vsel %vm230_vm0, %v9843_v62, %v1094_v35 }
  0xfc   : > { %5341 = vmatprep.mubr.msk.f32.mxu0 %vm230_vm0, %v7365_v30  ;;  %2069 = vrot.lane.b32.xlu1 %v2002_v51, %s6216_s23  ;;  %v2005_v51 = vsel %vm545_vm3, %v2003_v53, %v2004_v26  ;;  %v9849_v53 = vld [vmem:[#allocation34_spill] sm:$0xff] }
  0xfd   : > { %v7396_v23 = vsel %vm722_vm4, %v1201_v50, %v7381_v38  ;;  %2071 = vrot.lane.b32.xlu0 %v2005_v51, %s6216_s23 }
  0xff   : > { %1527 = vmatmul.mubr.f32.gmra.mrb[52].mxu0 %v1237_v6  ;;  %v9846_v6 = vld [vmem:[#allocation32_spill] sm:$0xff] }
 0x100   : > { %5342 = vmatprep.mubr.msk.f32.mxu0 %vm230_vm0, %v1200_v34  ;;  %v1204_v40 = vrot.slane %v9846_v6, 2  ;;  %v7401_v34 = vld [vmem:[#allocation2 + $0x160] sm:$0x3]  ;;  %v9848_v6 = vld [vmem:[#allocation33_spill] sm:$0xff] }
 0x101   : > { %9847 = vst [vmem:[#allocation15_spill] sm:$0xff] %v7401_v34  ;;  %v2006_v14 = vrot.slane %v7401_v34, 1  ;;  %v1206_v58 = vrot.slane %v9848_v6, 2  ;;  %v1096_v34 = vpop.permute.xlu0 %1095 }
 0x102   : > { %v1205_v50 = vsel %vm722_vm4, %v7381_v38, %v1204_v40  ;;  %v2009_v40 = vrot.slane %v7416_v24, 1  ;;  %v1241_v35 = vsel %vm230_vm0, %v9848_v6, %v1096_v34 }
 0x103   : > { %1532 = vmatmul.mubr.f32.gmra.mrb[54].mxu0 %v1238_v60  ;;  %v1207_v60 = vrot.slane %v9849_v53, 2  ;;  %v2007_v51 = vsel %vm545_vm3, %v2004_v26, %v2006_v14  ;;  %v9851_v26 = vld [vmem:[#allocation35_spill] sm:$0xff] }
 0x104   : > { %5343 = vmatprep.mubr.msk.f32.mxu0 %vm230_vm0, %v7396_v23  ;;  %2073 = vrot.lane.b32.xlu1 %v2007_v51, %s6216_s23  ;;  %v2010_v14 = vsel %vm545_vm3, %v2008_v20, %v2009_v40  ;;  %v7427_v51 = vld [vmem:[#allocation2 + $0x178] sm:$0x3]  ;;  %v7438_v20 = vld [vmem:[#allocation2 + $0x180] sm:$0xff] }
 0x105   : > { %v1208_v21 = vsel %vm722_vm4, %v1206_v58, %v1207_v60  ;;  %2075 = vrot.lane.b32.xlu0 %v2010_v14, %s6216_s23  ;;  %v2011_v62 = vrot.slane %v7427_v51, 1  ;;  %v723_v58 = vrot.slane %v6852_v52, 2  ;;  %v2013_v6 = vrot.slane %v7438_v20, 1  ;;  %v5380_v14 = vld [vmem:[%s9605_s1 + $0x188] sm:$0xff] }
 0x107   : > { %1537 = vmatmul.mubr.f32.gmra.mrb[56].mxu0 %v1239_v19  ;;  %v1209_v19 = vrot.slane %v9851_v26, 2  ;;  %v724_v26 = vrot.slane %v6854_v55, 2 }
 0x108   : > { %5344 = vmatprep.mubr.msk.f32.mxu0 %vm230_vm0, %v1205_v50  ;;  %v1098_v50 = vpop.permute.xlu1 %1097 }
 0x109   : > { %v1210_v24 = vsel %vm722_vm4, %v1207_v60, %v1209_v19  ;;  %v1242_v34 = vsel %vm230_vm0, %v9849_v53, %v1098_v50  ;;  %v627_v19 = vpop.permute.xlu0 %626  ;;  %v725_v55 = vsel %vm722_vm4, %v723_v58, %v724_v26  ;;  %v7457_v53 = vld [vmem:[#allocation2 + $0x190] sm:$0x3] }
 0x10a   : > { %v2016_v58 = vrot.slane %v7457_v53, 1 }
 0x10b   : > { %1542 = vmatmul.mubr.f32.gmra.mrb[58].mxu0 %v1240_v10  ;;  %v2012_v10 = vsel %vm545_vm3, %v2009_v40, %v2011_v62  ;;  %v5379_v40 = vld [vmem:[%s9605_s1 + $0x180] sm:$0xff]  ;;  %v803_v62 = vsel %vm230_vm0, %v6852_v52, %v627_v19  ;;  %v7472_v52 = vld [vmem:[#allocation2 + $0x198] sm:$0xff] }
 0x10c   : > { %5345 = vmatprep.mubr.msk.f32.mxu0 %vm230_vm0, %v1208_v21  ;;  %2077 = vrot.lane.b32.xlu1 %v2012_v10, %s6216_s23  ;;  %v7440_v21 = vld [vmem:[#allocation2 + $0x188] sm:$0xff]  ;;  %v5660_v50 = vpack.c.bf16 %v5380_v14, %v5379_v40  ;;  %v629_v10 = vpop.permute.xlu1 %628  ;;  %9853 = vst [vmem:[#allocation18_spill] sm:$0xff] %v7472_v52  ;;  %v7474_v19 = vld [vmem:[#allocation2 + $0x1a0] sm:$0xff]  ;;  %v2018_v14 = vrot.slane %v7472_v52, 1 }
 0x10d   : > { %9852 = vst [vmem:[#allocation17_spill] sm:$0xff] %v7440_v21  ;;  %v2014_v60 = vrot.slane %v7440_v21, 1  ;;  %9854 = vst [vmem:[#allocation19_spill] sm:$0xff] %v7474_v19 }
 0x10f   : > { %1547 = vmatmul.mubr.f32.gmra.mrb[60].mxu0 %v1241_v35  ;;  %v2015_v35 = vsel %vm545_vm3, %v2013_v6, %v2014_v60  ;;  %v2017_v6 = vsel %vm545_vm3, %v2014_v60, %v2016_v58  ;;  %v6071_v60 = vld [vmem:[#allocation2 + $0x28] sm:$0x3]  ;;  %v5383_v58 = vld [vmem:[%s9605_s1 + $0x1a0] sm:$0xff] }
 0x110   : > { %5346 = vmatprep.mubr.msk.f32.mxu0 %vm230_vm0, %v1210_v24  ;;  %v726_v24 = vrot.slane %v6856_v31, 2  ;;  %2079 = vrot.lane.b32.xlu0 %v2015_v35, %s6216_s23  ;;  %v5381_v31 = vld [vmem:[%s9605_s1 + $0x190] sm:$0xff]  ;;  %v631_v35 = vpop.permute.xlu0 %630 }
 0x111   : > { %2081 = vrot.lane.b32.xlu1 %v2017_v6, %s6216_s23 }
 0x112   : > { %v727_v21 = vsel %vm722_vm4, %v724_v26, %v726_v24  ;;  %v6070_v26 = vld [vmem:[#allocation2 + $0x8] sm:$0xff]  ;;  %v2019_v24 = vrot.slane %v7474_v19, 1  ;;  %v633_v19 = vpop.permute.xlu1 %632 }
 0x113   : > { %1552 = vmatmul.mubr.f32.gmra.mrb[62].mxu0 %v1242_v34  ;;  %v5382_v34 = vld [vmem:[%s9605_s1 + $0x198] sm:$0xff] }
 0x114   : > { %5347 = vmatprep.mubr.msk.f32.mxu0 %vm230_vm0, %v725_v55  ;;  %v804_v55 = vsel %vm230_vm0, %v6070_v26, %v629_v10  ;;  %v5663_v40 = vpack.c.bf16 %v5382_v34, %v5381_v31  ;;  %v7489_v10 = vld [vmem:[#allocation2 + $0x1a8] sm:$0x3]  ;;  %v9855_v31 = vld [vmem:[#allocation11_spill] sm:$0xff] }
 0x115   : > { %v6072_v34 = vld [vmem:[#allocation2 + $0x18] sm:$0xff] }
 0x116   : > { %v805_v6 = vsel %vm230_vm0, %v6072_v34, %v631_v35 }
 0x117   : > { %1686 = vmatmul.mubr.f32.vlgmr.msra.gmra.mrb[0].mxu0 %v803_v62  ;;  %v731_v62 = vrot.slane %v6071_v60, 2  ;;  %v2021_v60 = vrot.slane %v7489_v10, 1 }
 0x118   : > { %5661 = vmatpush1.bf16.msra.mxu0 %v5660_v50  ;;  %5348 = vmatprep.mubr.msk.f32.mxu0 %vm230_vm0, %v727_v21  ;;  %v5384_v21 = vld [vmem:[%s9605_s1 + $0x1a8] sm:$0xff]  ;;  %v2020_v50 = vsel %vm545_vm3, %v2018_v14, %v2019_v24  ;;  %v5386_v14 = vld [vmem:[%s9605_s1 + $0x1b8] sm:$0xff] }
 0x119   : > { %5662 = vmatprep.subr.bf16.mxu0 %v9808_v48  ;;  %2083 = vrot.lane.b32.xlu0 %v2020_v50, %s6216_s23  ;;  %v5666_v26 = vpack.c.bf16 %v5384_v21, %v5383_v58  ;;  %v732_v52 = vsel %vm722_vm4, %v6630_v46, %v731_v62  ;;  %v2022_v35 = vsel %vm545_vm3, %v2019_v24, %v2021_v60  ;;  %v635_v58 = vpop.permute.xlu0 %634  ;;  %v6074_v21 = vld [vmem:[#allocation2 + $0x40] sm:$0x3]  ;;  %v5388_v24 = vld [vmem:[%s9605_s1 + $0x1c8] sm:$0xff]  ;;  %v5389_v60 = vld [vmem:[%s9605_s1 + $0x1d0] sm:$0xff] }
 0x11a   : > { %2085 = vrot.lane.b32.xlu1 %v2022_v35, %s6216_s23  ;;  %v736_v50 = vrot.slane %v6074_v21, 2  ;;  %v6078_v21 = vld [vmem:[#allocation2 + $0x48] sm:$0xff] }
 0x11b   : > { %1691 = vmatmul.mubr.f32.gmra.mrb[2].mxu0 %v804_v55  ;;  %v5385_v55 = vld [vmem:[%s9605_s1 + $0x1b0] sm:$0xff] }
 0x11c   : > { %5349 = vmatprep.mubr.msk.f32.mxu0 %vm230_vm0, %v9855_v31  ;;  %5664 = vmatpush1.bf16.msra.mxu0 %v5663_v40  ;;  %v6073_v40 = vld [vmem:[#allocation2 + $0x20] sm:$0xff]  ;;  %v5669_v62 = vpack.c.bf16 %v5386_v14, %v5385_v55  ;;  %v5390_v55 = vld [vmem:[%s9605_s1 + $0x1d8] sm:$0xff] }
 0x11d   : > { %5665 = vmatprep.subr.bf16.mxu0 %v9808_v48  ;;  %v806_v46 = vsel %vm230_vm0, %v6073_v40, %v633_v19  ;;  %v5387_v31 = vld [vmem:[%s9605_s1 + $0x1c0] sm:$0xff]  ;;  %v5675_v35 = vpack.c.bf16 %v5390_v55, %v5389_v60  ;;  %v639_v40 = vpop.permute.xlu0 %638 }
 0x11e   : > { %v5672_v34 = vpack.c.bf16 %v5388_v24, %v5387_v31 }
 0x11f   : > { %1696 = vmatmul.mubr.f32.gmra.mrb[4].mxu0 %v805_v6  ;;  %v637_v6 = vpop.permute.xlu1 %636 }
 0x120   : > { %5350 = vmatprep.mubr.msk.f32.mxu0 %vm230_vm0, %v732_v52  ;;  %5667 = vmatpush1.bf16.msra.mxu0 %v5666_v26  ;;  %v6075_v52 = vld [vmem:[#allocation2 + $0x30] sm:$0xff]  ;;  %v737_v26 = vsel %vm722_vm4, %v6943_v22, %v736_v50  ;;  %v6077_v22 = vld [vmem:[#allocation2 + $0x58] sm:$0x3]  ;;  %v809_v50 = vsel %vm230_vm0, %v6078_v21, %v639_v40 }
 0x121   : > { %5668 = vmatprep.subr.bf16.mxu0 %v9808_v48  ;;  %v807_v19 = vsel %vm230_vm0, %v6075_v52, %v635_v58  ;;  %v5392_v58 = vld [vmem:[%s9605_s1 + $0x1e8] sm:$0xff]  ;;  %v643_v60 = vpop.permute.xlu0 %642  ;;  %v5398_v21 = vld [vmem:[%s9605_s1 + $0x218] sm:$0xff] }
 0x123   : > { %1701 = vmatmul.mubr.f32.gmra.mrb[6].mxu0 %v806_v46  ;;  %v741_v46 = vrot.slane %v6077_v22, 2  ;;  %v641_v24 = vpop.permute.xlu1 %640 }
 0x124   : > { %5351 = vmatprep.mubr.msk.f32.mxu0 %vm230_vm0, %v6960_v15  ;;  %5670 = vmatpush1.bf16.msra.mxu0 %v5669_v62  ;;  %v6076_v15 = vld [vmem:[#allocation2 + $0x38] sm:$0xff]  ;;  %v5391_v62 = vld [vmem:[%s9605_s1 + $0x1e0] sm:$0xff] }
 0x125   : > { %5671 = vmatprep.subr.bf16.mxu0 %v9808_v48  ;;  %v808_v14 = vsel %vm230_vm0, %v6076_v15, %v637_v6  ;;  %v5678_v31 = vpack.c.bf16 %v5392_v58, %v5391_v62  ;;  %v742_v52 = vsel %vm722_vm4, %v6985_v4, %v741_v46  ;;  %v6080_v4 = vld [vmem:[#allocation2 + $0x70] sm:$0x3]  ;;  %v5395_v15 = vld [vmem:[%s9605_s1 + $0x200] sm:$0xff] }
 0x126   : > { %v746_v55 = vrot.slane %v6080_v4, 2  ;;  %v5397_v58 = vld [vmem:[%s9605_s1 + $0x210] sm:$0xff] }
 0x127   : > { %1706 = vmatmul.mubr.f32.gmra.mrb[8].mxu0 %v807_v19  ;;  %v5393_v19 = vld [vmem:[%s9605_s1 + $0x1f0] sm:$0xff]  ;;  %v645_v46 = vpop.permute.xlu1 %644 }
 0x128   : > { %5352 = vmatprep.mubr.msk.f32.mxu0 %vm230_vm0, %v737_v26  ;;  %5673 = vmatpush1.bf16.msra.mxu0 %v5672_v34  ;;  %v5394_v34 = vld [vmem:[%s9605_s1 + $0x1f8] sm:$0xff]  ;;  %v747_v62 = vsel %vm722_vm4, %v7025_v59, %v746_v55  ;;  %v6083_v59 = vld [vmem:[#allocation2 + $0x88] sm:$0x3]  ;;  %v5401_v55 = vld [vmem:[%s9605_s1 + $0x230] sm:$0xff] }
 0x129   : > { %5674 = vmatprep.subr.bf16.mxu0 %v9808_v48  ;;  %v5681_v26 = vpack.c.bf16 %v5394_v34, %v5393_v19  ;;  %v5399_v19 = vld [vmem:[%s9605_s1 + $0x220] sm:$0xff]  ;;  %v5400_v34 = vld [vmem:[%s9605_s1 + $0x228] sm:$0xff] }
 0x12b   : > { %1711 = vmatmul.mubr.f32.gmra.mrb[10].mxu0 %v808_v14  ;;  %v5396_v14 = vld [vmem:[%s9605_s1 + $0x208] sm:$0xff] }
 0x12c   : > { %5353 = vmatprep.mubr.msk.f32.mxu0 %vm230_vm0, %v7004_v11  ;;  %5676 = vmatpush1.bf16.msra.mxu0 %v5675_v35  ;;  %v6079_v11 = vld [vmem:[#allocation2 + $0x50] sm:$0xff]  ;;  %v6081_v35 = vld [vmem:[#allocation2 + $0x60] sm:$0xff]  ;;  %v5684_v22 = vpack.c.bf16 %v5396_v14, %v5395_v15  ;;  %v5402_v15 = vld [vmem:[%s9605_s1 + $0x238] sm:$0xff] }
 0x12d   : > { %5677 = vmatprep.subr.bf16.mxu0 %v9808_v48  ;;  %v810_v6 = vsel %vm230_vm0, %v6079_v11, %v641_v24  ;;  %v811_v40 = vsel %vm230_vm0, %v6081_v35, %v643_v60  ;;  %v647_v24 = vpop.permute.xlu0 %646  ;;  %v6084_v11 = vld [vmem:[#allocation2 + $0x78] sm:$0xff]  ;;  %v649_v60 = vpop.permute.xlu1 %648  ;;  %v5693_v35 = vpack.c.bf16 %v5402_v15, %v5401_v55  ;;  %v6094_v15 = vld [vmem:[#allocation2 + $0xc8] sm:$0xff] }
 0x12f   : > { %1716 = vmatmul.mubr.f32.gmra.mrb[12].mxu0 %v809_v50 }
 0x130   : > { %5354 = vmatprep.mubr.msk.f32.mxu0 %vm230_vm0, %v742_v52  ;;  %5679 = vmatpush1.bf16.msra.mxu0 %v5678_v31  ;;  %v5687_v31 = vpack.c.bf16 %v5398_v21, %v5397_v58  ;;  %v751_v52 = vrot.slane %v6083_v59, 2 }
 0x131   : > { %5680 = vmatprep.subr.bf16.mxu0 %v9808_v48  ;;  %v653_v58 = vpop.permute.xlu1 %652 }
 0x132   : > { %v752_v4 = vsel %vm722_vm4, %v7061_v47, %v751_v52  ;;  %v6086_v47 = vld [vmem:[#allocation2 + $0xa0] sm:$0x3] }
 0x133   : > { %1721 = vmatmul.mubr.f32.gmra.mrb[14].mxu0 %v810_v6  ;;  %v813_v6 = vsel %vm230_vm0, %v6084_v11, %v647_v24  ;;  %v6089_v24 = vld [vmem:[#allocation2 + $0xb8] sm:$0x3] }
 0x134   : > { %5355 = vmatprep.mubr.msk.f32.mxu0 %vm230_vm0, %v7041_v33  ;;  %5682 = vmatpush1.bf16.msra.mxu0 %v5681_v26  ;;  %v6082_v33 = vld [vmem:[#allocation2 + $0x68] sm:$0xff]  ;;  %v5690_v26 = vpack.c.bf16 %v5400_v34, %v5399_v19  ;;  %v761_v59 = vrot.slane %v6089_v24, 2  ;;  %v6091_v34 = vld [vmem:[#allocation2 + $0xb0] sm:$0xff]  ;;  %v6100_v24 = vld [vmem:[#allocation2 + $0xf8] sm:$0xff] }
 0x135   : > { %5683 = vmatprep.subr.bf16.mxu0 %v9808_v48  ;;  %v812_v50 = vsel %vm230_vm0, %v6082_v33, %v645_v46  ;;  %v6087_v46 = vld [vmem:[#allocation2 + $0x90] sm:$0xff]  ;;  %v6088_v33 = vld [vmem:[#allocation2 + $0x98] sm:$0xff]  ;;  %v657_v19 = vpop.permute.xlu1 %656 }
 0x136   : > { %v818_v11 = vsel %vm230_vm0, %v6091_v34, %v657_v19 }
 0x137   : > { %1726 = vmatmul.mubr.f32.gmra.mrb[16].mxu0 %v811_v40  ;;  %v651_v40 = vpop.permute.xlu0 %650 }
 0x138   : > { %5356 = vmatprep.mubr.msk.f32.mxu0 %vm230_vm0, %v747_v62  ;;  %5685 = vmatpush1.bf16.msra.mxu0 %v5684_v22  ;;  %v756_v22 = vrot.slane %v6086_v47, 2  ;;  %v815_v62 = vsel %vm230_vm0, %v6087_v46, %v651_v40  ;;  %v6097_v46 = vld [vmem:[#allocation2 + $0xe0] sm:$0xff] }
 0x139   : > { %5686 = vmatprep.subr.bf16.mxu0 %v9808_v48  ;;  %v661_v55 = vpop.permute.xlu1 %660 }
 0x13a   : > { %v757_v21 = vsel %vm722_vm4, %v7097_v18, %v756_v22  ;;  %v762_v18 = vsel %vm722_vm4, %v7133_v9, %v761_v59 }
 0x13b   : > { %1731 = vmatmul.mubr.f32.gmra.mrb[18].mxu0 %v812_v50  ;;  %v816_v50 = vsel %vm230_vm0, %v6088_v33, %v653_v58 }
 0x13c   : > { %5357 = vmatprep.mubr.msk.f32.mxu0 %vm230_vm0, %v7077_v8  ;;  %5688 = vmatpush1.bf16.msra.mxu0 %v5687_v31  ;;  %v6085_v8 = vld [vmem:[#allocation2 + $0x80] sm:$0xff]  ;;  %v655_v31 = vpop.permute.xlu0 %654 }
 0x13d   : > { %5689 = vmatprep.subr.bf16.mxu0 %v9808_v48  ;;  %v814_v14 = vsel %vm230_vm0, %v6085_v8, %v649_v60  ;;  %v820_v8 = vsel %vm230_vm0, %v6094_v15, %v661_v55  ;;  %v665_v22 = vpop.permute.xlu1 %664 }
 0x13f   : > { %1736 = vmatmul.mubr.f32.gmra.mrb[20].mxu0 %v813_v6 }
 0x140   : > { %5358 = vmatprep.mubr.msk.f32.mxu0 %vm230_vm0, %v752_v4  ;;  %5691 = vmatpush1.bf16.msra.mxu0 %v5690_v26  ;;  %v659_v6 = vpop.permute.xlu0 %658  ;;  %v6092_v26 = vld [vmem:[#allocation2 + $0xd0] sm:$0x3] }
 0x141   : > { %5692 = vmatprep.subr.bf16.mxu0 %v9808_v48  ;;  %v766_v60 = vrot.slane %v6092_v26, 2 }
 0x143   : > { %1741 = vmatmul.mubr.f32.gmra.mrb[22].mxu0 %v814_v14  ;;  %v767_v9 = vsel %vm722_vm4, %v7163_v1, %v766_v60  ;;  %v6104_v60 = vld [vmem:[#allocation2 + $0x130] sm:$0x3] }
 0x144   : > { %5359 = vmatprep.mubr.msk.f32.mxu0 %vm230_vm0, %v7113_v37  ;;  %5694 = vmatpush1.bf16.msra.mxu0 %v5693_v35  ;;  %v6090_v37 = vld [vmem:[#allocation2 + $0xa8] sm:$0xff]  ;;  %v663_v14 = vpop.permute.xlu0 %662 }
 0x145   : > { %v817_v52 = vsel %vm230_vm0, %v6090_v37, %v655_v31  ;;  %v6095_v35 = vld [vmem:[#allocation2 + $0xe8] sm:$0x3]  ;;  %v669_v31 = vpop.permute.xlu1 %668 }
 0x146   : > { %v771_v40 = vrot.slane %v6095_v35, 2  ;;  %v824_v59 = vsel %vm230_vm0, %v6100_v24, %v669_v31  ;;  %v6113_v31 = vld [vmem:[#allocation2 + $0x178] sm:$0x3] }
 0x147   : > { %1746 = vmatmul.mubr.f32.gmra.mrb[24].mxu0 %v815_v62  ;;  %v822_v62 = vsel %vm230_vm0, %v6097_v46, %v665_v22  ;;  %v6110_v46 = vld [vmem:[#allocation2 + $0x160] sm:$0x3] }
 0x148   : > { %5360 = vmatprep.mubr.msk.f32.mxu0 %vm230_vm0, %v757_v21  ;;  %v772_v1 = vsel %vm722_vm4, %v7195_v7, %v771_v40  ;;  %v667_v58 = vpop.permute.xlu0 %666  ;;  %v6098_v21 = vld [vmem:[#allocation2 + $0x100] sm:$0x3] }
 0x149   : > { %v776_v33 = vrot.slane %v6098_v21, 2  ;;  %v673_v34 = vpop.permute.xlu1 %672 }
 0x14b   : > { %1751 = vmatmul.mubr.f32.gmra.mrb[26].mxu0 %v816_v50  ;;  %v777_v7 = vsel %vm722_vm4, %v7226_v16, %v776_v33  ;;  %v6112_v33 = vld [vmem:[#allocation2 + $0x158] sm:$0xff] }
 0x14c   : > { %5361 = vmatprep.mubr.msk.f32.mxu0 %vm230_vm0, %v7149_v43  ;;  %v6093_v43 = vld [vmem:[#allocation2 + $0xc0] sm:$0xff]  ;;  %v671_v37 = vpop.permute.xlu0 %670 }
 0x14d   : > { %v819_v4 = vsel %vm230_vm0, %v6093_v43, %v659_v6  ;;  %v786_v43 = vrot.slane %v6104_v60, 2  ;;  %v677_v55 = vpop.permute.xlu1 %676 }
 0x14f   : > { %1756 = vmatmul.mubr.f32.gmra.mrb[28].mxu0 %v817_v52  ;;  %v6101_v52 = vld [vmem:[#allocation2 + $0x118] sm:$0x3] }
 0x150   : > { %5362 = vmatprep.mubr.msk.f32.mxu0 %vm230_vm0, %v762_v18  ;;  %v781_v19 = vrot.slane %v6101_v52, 2  ;;  %v675_v26 = vpop.permute.xlu0 %674 }
 0x152   : > { %v782_v16 = vsel %vm722_vm4, %v7257_v12, %v781_v19  ;;  %v787_v12 = vsel %vm722_vm4, %v7288_v57, %v786_v43  ;;  %v6116_v19 = vld [vmem:[#allocation2 + $0x38] sm:$0xff]  ;;  %v6119_v43 = vld [vmem:[#allocation2 + $0x48] sm:$0xff] }
 0x153   : > { %1761 = vmatmul.mubr.f32.gmra.mrb[30].mxu0 %v818_v11  ;;  %v6103_v11 = vld [vmem:[#allocation2 + $0x110] sm:$0xff] }
 0x154   : > { %5363 = vmatprep.mubr.msk.f32.mxu0 %vm230_vm0, %v7179_v25  ;;  %v6096_v25 = vld [vmem:[#allocation2 + $0xd8] sm:$0xff]  ;;  %v826_v6 = vsel %vm230_vm0, %v6103_v11, %v673_v34  ;;  %v6118_v11 = vld [vmem:[#allocation2 + $0x40] sm:$0x3] }
 0x155   : > { %v821_v47 = vsel %vm230_vm0, %v6096_v25, %v663_v14  ;;  %v6107_v14 = vld [vmem:[#allocation2 + $0x148] sm:$0x3]  ;;  %v681_v25 = vpop.permute.xlu1 %680 }
 0x156   : > { %v791_v35 = vrot.slane %v6107_v14, 2 }
 0x157   : > { %1766 = vmatmul.mubr.f32.gmra.mrb[32].mxu0 %v819_v4 }
 0x158   : > { %5364 = vmatprep.mubr.msk.f32.mxu0 %vm230_vm0, %v767_v9  ;;  %v6106_v9 = vld [vmem:[#allocation2 + $0x128] sm:$0xff]  ;;  %v792_v57 = vsel %vm722_vm4, %v7319_v29, %v791_v35 }
 0x159   : > { %v828_v15 = vsel %vm230_vm0, %v6106_v9, %v677_v55  ;;  %v685_v21 = vpop.permute.xlu1 %684 }
 0x15b   : > { %1771 = vmatmul.mubr.f32.gmra.mrb[34].mxu0 %v820_v8  ;;  %v679_v8 = vpop.permute.xlu0 %678 }
 0x15c   : > { %5365 = vmatprep.mubr.msk.f32.mxu0 %vm230_vm0, %v7210_v45  ;;  %v6099_v45 = vld [vmem:[#allocation2 + $0xf0] sm:$0xff] }
 0x15d   : > { %v823_v50 = vsel %vm230_vm0, %v6099_v45, %v667_v58  ;;  %v832_v45 = vsel %vm230_vm0, %v6112_v33, %v685_v21 }
 0x15f   : > { %1776 = vmatmul.mubr.f32.gmra.mrb[36].mxu0 %v821_v47  ;;  %v6109_v47 = vld [vmem:[#allocation2 + $0x140] sm:$0xff] }
 0x160   : > { %5366 = vmatprep.mubr.msk.f32.mxu0 %vm230_vm0, %v772_v1  ;;  %v830_v22 = vsel %vm230_vm0, %v6109_v47, %v681_v25  ;;  %v683_v1 = vpop.permute.xlu0 %682  ;;  %v6122_v25 = vld [vmem:[#allocation2 + $0x60] sm:$0xff]  ;;  %v6123_v47 = vld [vmem:[#allocation2 + $0x68] sm:$0xff] }
 0x163   : > { %1781 = vmatmul.mubr.f32.gmra.mrb[38].mxu0 %v822_v62  ;;  %v796_v62 = vrot.slane %v6110_v46, 2 }
 0x164   : > { %5367 = vmatprep.mubr.msk.f32.mxu0 %vm230_vm0, %v7241_v42  ;;  %v6102_v42 = vld [vmem:[#allocation2 + $0x108] sm:$0xff] }
 0x165   : > { %v825_v18 = vsel %vm230_vm0, %v6102_v42, %v671_v37  ;;  %v797_v29 = vsel %vm722_vm4, %v7350_v5, %v796_v62  ;;  %v6115_v37 = vld [vmem:[#allocation2 + $0x30] sm:$0xff]  ;;  %v2120_v42 = vrot.slane %v6116_v19, 2 }
 0x166   : > { %v2119_v52 = vrot.slane %v6115_v37, 2 }
 0x167   : > { %1786 = vmatmul.mubr.f32.gmra.mrb[40].mxu0 %v823_v50  ;;  %v687_v50 = vpop.permute.xlu0 %686 }
 0x168   : > { %5368 = vmatprep.mubr.msk.f32.mxu0 %vm230_vm0, %v777_v7  ;;  %v801_v7 = vrot.slane %v6113_v31, 2  ;;  %v6126_v31 = vld [vmem:[#allocation2 + $0x80] sm:$0xff] }
 0x16a   : > { %v802_v5 = vsel %vm722_vm4, %v7381_v38, %v801_v7  ;;  %v2135_v7 = vrot.slane %v6126_v31, 2 }
 0x16b   : > { %1791 = vmatmul.mubr.f32.gmra.mrb[42].mxu0 %v824_v59  ;;  %v689_v59 = vpop.permute.xlu1 %688 }
 0x16c   : > { %5369 = vmatprep.mubr.msk.f32.mxu0 %vm230_vm0, %v7272_v13  ;;  %v6105_v13 = vld [vmem:[#allocation2 + $0x120] sm:$0xff] }
 0x16d   : > { %v827_v4 = vsel %vm230_vm0, %v6105_v13, %v675_v26  ;;  %v2124_v13 = vrot.slane %v6119_v43, 2 }
 0x16f   : > { %1796 = vmatmul.mubr.f32.gmra.mrb[44].mxu0 %v825_v18  ;;  %v6117_v18 = vld [vmem:[#allocation2 + $0x170] sm:$0xff]  ;;  %v2026_v38 = vpop.permute.xlu1 %2025 }
 0x170   : > { %5370 = vmatprep.mubr.msk.f32.mxu0 %vm230_vm0, %v782_v16  ;;  %v834_v34 = vsel %vm230_vm0, %v6117_v18, %v689_v59  ;;  %v2024_v16 = vpop.permute.xlu0 %2023  ;;  %v6128_v18 = vld [vmem:[#allocation2 + $0x90] sm:$0xff] }
 0x171   : > { %v2199_v26 = vsel %vm230_vm0, %v6115_v37, %v2024_v16  ;;  %v6129_v16 = vld [vmem:[#allocation2 + $0x98] sm:$0xff] }
 0x173   : > { %1801 = vmatmul.mubr.f32.gmra.mrb[46].mxu0 %v826_v6  ;;  %v2122_v6 = vrot.slane %v6118_v11, 2 }
 0x174   : > { %5371 = vmatprep.mubr.msk.f32.mxu0 %vm230_vm0, %v7303_v28  ;;  %v6108_v28 = vld [vmem:[#allocation2 + $0x138] sm:$0xff]  ;;  %v2028_v9 = vpop.permute.xlu0 %2027 }
 0x175   : > { %v829_v40 = vsel %vm230_vm0, %v6108_v28, %v679_v8  ;;  %v2123_v60 = vsel %vm722_vm4, %v2120_v42, %v2122_v6  ;;  %v6121_v8 = vld [vmem:[#allocation2 + $0x58] sm:$0x3]  ;;  %v2201_v35 = vsel %vm230_vm0, %v6119_v43, %v2028_v9  ;;  %v2030_v28 = vpop.permute.xlu1 %2029 }
 0x176   : > { %v2127_v14 = vrot.slane %v6121_v8, 2 }
 0x177   : > { %1806 = vmatmul.mubr.f32.gmra.mrb[48].mxu0 %v827_v4  ;;  %v6120_v4 = vld [vmem:[#allocation2 + $0x50] sm:$0xff] }
 0x178   : > { %5372 = vmatprep.mubr.msk.f32.mxu0 %vm230_vm0, %v787_v12  ;;  %v2125_v55 = vrot.slane %v6120_v4, 2  ;;  %v2200_v12 = vsel %vm230_vm0, %v6116_v19, %v2026_v38  ;;  %v2032_v46 = vpop.permute.xlu0 %2031  ;;  %v6130_v38 = vld [vmem:[#allocation2 + $0xa0] sm:$0x3] }
 0x179   : > { %v2203_v21 = vsel %vm230_vm0, %v6122_v25, %v2032_v46 }
 0x17b   : > { %1811 = vmatmul.mubr.f32.gmra.mrb[50].mxu0 %v828_v15  ;;  %v2126_v15 = vsel %vm722_vm4, %v2124_v13, %v2125_v55 }
 0x17c   : > { %5373 = vmatprep.mubr.msk.f32.mxu0 %vm230_vm0, %v7334_v27  ;;  %v6111_v27 = vld [vmem:[#allocation2 + $0x150] sm:$0xff] }
 0x17d   : > { %v831_v58 = vsel %vm230_vm0, %v6111_v27, %v683_v1  ;;  %v2202_v1 = vsel %vm230_vm0, %v6120_v4, %v2030_v28  ;;  %v6124_v27 = vld [vmem:[#allocation2 + $0x70] sm:$0x3] }
 0x17f   : > { %1816 = vmatmul.mubr.f32.gmra.mrb[52].mxu0 %v829_v40  ;;  %v2128_v40 = vsel %vm722_vm4, %v2125_v55, %v2127_v14  ;;  %v2144_v55 = vrot.slane %v7168_v61, 2  ;;  %v2147_v14 = vrot.slane %v7184_v0, 2 }
 0x180   : > { %5374 = vmatprep.mubr.msk.f32.mxu0 %vm230_vm0, %v792_v57  ;;  %v2129_v57 = vrot.slane %v6122_v25, 2  ;;  %v2150_v25 = vrot.slane %v7201_v56, 2 }
 0x183   : > { %1821 = vmatmul.mubr.f32.gmra.mrb[54].mxu0 %v830_v22  ;;  %v2130_v22 = vrot.slane %v6123_v47, 2 }
 0x184   : > { %5375 = vmatprep.mubr.msk.f32.mxu0 %vm230_vm0, %v7365_v30  ;;  %v6114_v30 = vld [vmem:[#allocation2 + $0x168] sm:$0xff] }
 0x185   : > { %v833_v24 = vsel %vm230_vm0, %v6114_v30, %v687_v50  ;;  %v2131_v62 = vsel %vm722_vm4, %v2129_v57, %v2130_v22  ;;  %v6132_v57 = vld [vmem:[#allocation2 + $0xb0] sm:$0xff] }
 0x187   : > { %1826 = vmatmul.mubr.f32.gmra.mrb[56].mxu0 %v831_v58  ;;  %v2132_v58 = vrot.slane %v6124_v27, 2  ;;  %v2154_v27 = vrot.slane %v7230_v3, 2 }
 0x188   : > { %5376 = vmatprep.mubr.msk.f32.mxu0 %vm230_vm0, %v797_v29  ;;  %v2034_v29 = vpop.permute.xlu1 %2033 }
 0x189   : > { %v2133_v33 = vsel %vm722_vm4, %v2130_v22, %v2132_v58  ;;  %v2204_v30 = vsel %vm230_vm0, %v6123_v47, %v2034_v29  ;;  %v2155_v58 = vrot.slane %v7232_v54, 2 }
 0x18b   : > { %1831 = vmatmul.mubr.f32.gmra.mrb[58].mxu0 %v832_v45  ;;  %v6125_v45 = vld [vmem:[#allocation2 + $0x78] sm:$0xff] }
 0x18c   : > { %5377 = vmatprep.mubr.msk.f32.mxu0 %vm230_vm0, %v7396_v23  ;;  %v2121_v23 = vsel %vm722_vm4, %v2119_v52, %v2120_v42  ;;  %v2134_v50 = vrot.slane %v6125_v45, 2  ;;  %v2038_v19 = vpop.permute.xlu1 %2037 }
 0x18d   : > { %v2206_v11 = vsel %vm230_vm0, %v6126_v31, %v2038_v19  ;;  %v2164_v19 = vrot.slane %v7292_v32, 2 }
 0x18e   : > { %v2136_v59 = vsel %vm722_vm4, %v2134_v50, %v2135_v7 }
 0x18f   : > { %1836 = vmatmul.mubr.f32.gmra.mrb[60].mxu0 %v833_v24  ;;  %v2036_v24 = vpop.permute.xlu0 %2035 }
 0x190   : > { %5378 = vmatprep.mubr.msk.f32.mxu0 %vm230_vm0, %v802_v5  ;;  %v6127_v5 = vld [vmem:[#allocation2 + $0x88] sm:$0x3]  ;;  %v2205_v52 = vsel %vm230_vm0, %v6125_v45, %v2036_v24  ;;  %v2042_v13 = vpop.permute.xlu1 %2041  ;;  %v2157_v45 = vrot.slane %v7246_v17, 2 }
 0x191   : > { %v2137_v37 = vrot.slane %v6127_v5, 2  ;;  %v2208_v9 = vsel %vm230_vm0, %v6129_v16, %v2042_v13  ;;  %v2162_v5 = vrot.slane %v7277_v41, 2 }
 0x192   : > { %v2158_v31 = vsel %vm722_vm4, %v2155_v58, %v2157_v45 }
 0x193   : > { %1841 = vmatmul.mubr.f32.gmra.mrb[62].mxu0 %v834_v34  ;;  %v2138_v42 = vsel %vm722_vm4, %v2135_v7, %v2137_v37  ;;  %v2139_v34 = vrot.slane %v6128_v18, 2  ;;  %v2040_v6 = vpop.permute.xlu0 %2039  ;;  %v2159_v7 = vrot.slane %v7261_v39, 2 }
 0x194   : > { %5403 = vmatprep.mubr.msk.f32.mxu0 %vm230_vm0, %v2121_v23  ;;  %v2140_v23 = vrot.slane %v6129_v16, 2  ;;  %v2207_v43 = vsel %vm230_vm0, %v6128_v18, %v2040_v6  ;;  %v9857_v16 = vld [vmem:[#allocation5_spill] sm:$0xff] }
 0x197   : > { %2385 = vmatmul.mubr.f32.vlgmr.msra.gmra.mrb[0].mxu0 %v2199_v26  ;;  %v2141_v26 = vsel %vm722_vm4, %v2139_v34, %v2140_v23 }
 0x198   : > { %5404 = vmatprep.mubr.msk.f32.mxu0 %vm230_vm0, %v2123_v60  ;;  %v2142_v60 = vrot.slane %v6130_v38, 2 }
 0x19a   : > { %v2143_v4 = vsel %vm722_vm4, %v2140_v23, %v2142_v60  ;;  %v2167_v23 = vrot.slane %v9857_v16, 2  ;;  %v9859_v60 = vld [vmem:[#allocation7_spill] sm:$0xff] }
 0x19b   : > { %2390 = vmatmul.mubr.f32.gmra.mrb[2].mxu0 %v2200_v12  ;;  %v2145_v12 = vrot.slane %v7170_v49, 2  ;;  %v2149_v49 = vrot.slane %v7199_v44, 2 }
 0x19c   : > { %5405 = vmatprep.mubr.msk.f32.mxu0 %vm230_vm0, %v2126_v15  ;;  %v2044_v15 = vpop.permute.xlu0 %2043 }
 0x19d   : > { %v2146_v8 = vsel %vm722_vm4, %v2144_v55, %v2145_v12  ;;  %v2148_v61 = vsel %vm722_vm4, %v2145_v12, %v2147_v14  ;;  %v2151_v22 = vsel %vm722_vm4, %v2149_v49, %v2150_v25  ;;  %v9860_v55 = vld [vmem:[#allocation8_spill] sm:$0xff] }
 0x19e   : > { %v2172_v12 = vrot.slane %v9860_v55, 2 }
 0x19f   : > { %2395 = vmatmul.mubr.f32.gmra.mrb[4].mxu0 %v2201_v35  ;;  %v6131_v35 = vld [vmem:[#allocation2 + $0xa8] sm:$0xff] }
 0x1a0   : > { %5406 = vmatprep.mubr.msk.f32.mxu0 %vm230_vm0, %v2128_v40  ;;  %v2209_v28 = vsel %vm230_vm0, %v6131_v35, %v2044_v15  ;;  %v2046_v40 = vpop.permute.xlu1 %2045  ;;  %v2048_v0 = vpop.permute.xlu0 %2047  ;;  %v9862_v35 = vld [vmem:[#allocation10_spill] sm:$0xff] }
 0x1a1   : > { %v2210_v47 = vsel %vm230_vm0, %v6132_v57, %v2046_v40  ;;  %v2211_v46 = vsel %vm230_vm0, %v7199_v44, %v2048_v0 }
 0x1a3   : > { %2400 = vmatmul.mubr.f32.gmra.mrb[6].mxu0 %v2202_v1  ;;  %v2152_v1 = vrot.slane %v7215_v63, 2 }
 0x1a4   : > { %5407 = vmatprep.mubr.msk.f32.mxu0 %vm230_vm0, %v2131_v62  ;;  %v2050_v62 = vpop.permute.xlu1 %2049  ;;  %v2052_v63 = vpop.permute.xlu0 %2051 }
 0x1a5   : > { %v2153_v56 = vsel %vm722_vm4, %v2150_v25, %v2152_v1  ;;  %v2213_v44 = vsel %vm230_vm0, %v7230_v3, %v2052_v63  ;;  %v9863_v25 = vld [vmem:[#allocation12_spill] sm:$0xff]  ;;  %v9864_v1 = vld [vmem:[#allocation13_spill] sm:$0xff] }
 0x1a6   : > { %v2177_v57 = vrot.slane %v9863_v25, 2 }
 0x1a7   : > { %2405 = vmatmul.mubr.f32.gmra.mrb[8].mxu0 %v2203_v21  ;;  %v6133_v21 = vld [vmem:[#allocation2 + $0xc8] sm:$0xff] }
 0x1a8   : > { %5408 = vmatprep.mubr.msk.f32.mxu0 %vm230_vm0, %v2133_v33  ;;  %v2212_v29 = vsel %vm230_vm0, %v6133_v21, %v2050_v62  ;;  %v2156_v33 = vsel %vm722_vm4, %v2154_v27, %v2155_v58  ;;  %v2054_v50 = vpop.permute.xlu1 %2053  ;;  %v2056_v17 = vpop.permute.xlu0 %2055  ;;  %v9865_v62 = vld [vmem:[#allocation14_spill] sm:$0xff] }
 0x1a9   : > { %v2214_v24 = vsel %vm230_vm0, %v7232_v54, %v2054_v50  ;;  %v2215_v3 = vsel %vm230_vm0, %v7261_v39, %v2056_v17  ;;  %v2184_v50 = vrot.slane %v7414_v36, 2 }
 0x1ab   : > { %2410 = vmatmul.mubr.f32.gmra.mrb[10].mxu0 %v2204_v30  ;;  %v2160_v30 = vrot.slane %v7263_v2, 2 }
 0x1ac   : > { %5409 = vmatprep.mubr.msk.f32.mxu0 %vm230_vm0, %v2136_v59  ;;  %v2058_v37 = vpop.permute.xlu1 %2057  ;;  %v2060_v41 = vpop.permute.xlu0 %2059 }
 0x1ad   : > { %v2161_v59 = vsel %vm722_vm4, %v2159_v7, %v2160_v30  ;;  %v2216_v54 = vsel %vm230_vm0, %v7263_v2, %v2058_v37  ;;  %v2217_v39 = vsel %vm230_vm0, %v7292_v32, %v2060_v41  ;;  %v2192_v41 = vrot.slane %v7457_v53, 2 }
 0x1af   : > { %2415 = vmatmul.mubr.f32.gmra.mrb[12].mxu0 %v2205_v52  ;;  %v2163_v52 = vsel %vm722_vm4, %v2160_v30, %v2162_v5 }
 0x1b0   : > { %5410 = vmatprep.mubr.msk.f32.mxu0 %vm230_vm0, %v2138_v42  ;;  %v9856_v42 = vld [vmem:[#allocation4_spill] sm:$0xff]  ;;  %v2064_v13 = vpop.permute.xlu0 %2063 }
 0x1b1   : > { %v2165_v18 = vrot.slane %v9856_v42, 2 }
 0x1b3   : > { %2420 = vmatmul.mubr.f32.gmra.mrb[14].mxu0 %v2206_v11  ;;  %v2166_v34 = vsel %vm722_vm4, %v2164_v19, %v2165_v18  ;;  %v2062_v11 = vpop.permute.xlu1 %2061  ;;  %v2168_v6 = vsel %vm722_vm4, %v2165_v18, %v2167_v23  ;;  %v9868_v19 = vld [vmem:[#allocation17_spill] sm:$0xff]  ;;  %v9869_v23 = vld [vmem:[#allocation18_spill] sm:$0xff] }
 0x1b4   : > { %5411 = vmatprep.mubr.msk.f32.mxu0 %vm230_vm0, %v2141_v26  ;;  %v9858_v26 = vld [vmem:[#allocation6_spill] sm:$0xff]  ;;  %v2218_v2 = vsel %vm230_vm0, %v9856_v42, %v2062_v11  ;;  %v2190_v42 = vrot.slane %v9868_v19, 2  ;;  %v9870_v11 = vld [vmem:[#allocation19_spill] sm:$0xff] }
 0x1b5   : > { %v2169_v38 = vrot.slane %v9858_v26, 2  ;;  %v2219_v32 = vsel %vm230_vm0, %v9858_v26, %v2064_v13 }
 0x1b6   : > { %v2193_v16 = vsel %vm722_vm4, %v2190_v42, %v2192_v41 }
 0x1b7   : > { %2425 = vmatmul.mubr.f32.gmra.mrb[16].mxu0 %v2207_v43  ;;  %v2170_v43 = vrot.slane %v9859_v60, 2 }
 0x1b8   : > { %5412 = vmatprep.mubr.msk.f32.mxu0 %vm230_vm0, %v2143_v4 }
 0x1b9   : > { %v2171_v4 = vsel %vm722_vm4, %v2169_v38, %v2170_v43  ;;  %v2173_v15 = vsel %vm722_vm4, %v2170_v43, %v2172_v12  ;;  %v5439_v12 = vld [vmem:[%s9606_s2 + $0xd0] sm:$0xff] }
 0x1bb   : > { %2430 = vmatmul.mubr.f32.gmra.mrb[18].mxu0 %v2208_v9  ;;  %v2066_v9 = vpop.permute.xlu1 %2065 }
 0x1bc   : > { %5413 = vmatprep.mubr.msk.f32.mxu0 %vm230_vm0, %v2146_v8  ;;  %v9861_v8 = vld [vmem:[#allocation9_spill] sm:$0xff]  ;;  %v2220_v40 = vsel %vm230_vm0, %v9859_v60, %v2066_v9  ;;  %v2197_v60 = vrot.slane %v7489_v10, 2  ;;  %v5437_v10 = vld [vmem:[%s9606_s2 + $0xc0] sm:$0xff] }
 0x1bd   : > { %v2174_v14 = vrot.slane %v9861_v8, 2 }
 0x1bf   : > { %2435 = vmatmul.mubr.f32.gmra.mrb[20].mxu0 %v2209_v28  ;;  %v2175_v28 = vrot.slane %v9862_v35, 2  ;;  %v2070_v0 = vpop.permute.xlu1 %2069 }
 0x1c0   : > { %5414 = vmatprep.mubr.msk.f32.mxu0 %vm230_vm0, %v2148_v61  ;;  %v2068_v61 = vpop.permute.xlu0 %2067  ;;  %v2222_v27 = vsel %vm230_vm0, %v9862_v35, %v2070_v0  ;;  %v5443_v35 = vld [vmem:[%s9606_s2 + $0xf0] sm:$0xff] }
 0x1c1   : > { %v2176_v49 = vsel %vm722_vm4, %v2174_v14, %v2175_v28 }
 0x1c3   : > { %2440 = vmatmul.mubr.f32.gmra.mrb[22].mxu0 %v2210_v47  ;;  %v2221_v47 = vsel %vm230_vm0, %v9861_v8, %v2068_v61  ;;  %v2074_v45 = vpop.permute.xlu1 %2073  ;;  %v5442_v8 = vld [vmem:[%s9606_s2 + $0xe8] sm:$0xff]  ;;  %v5445_v61 = vld [vmem:[%s9606_s2 + $0x100] sm:$0xff] }
 0x1c4   : > { %5415 = vmatprep.mubr.msk.f32.mxu0 %vm230_vm0, %v2151_v22  ;;  %v2178_v22 = vsel %vm722_vm4, %v2175_v28, %v2177_v57  ;;  %v2072_v58 = vpop.permute.xlu0 %2071  ;;  %v2224_v30 = vsel %vm230_vm0, %v9865_v62, %v2074_v45  ;;  %v5444_v28 = vld [vmem:[%s9606_s2 + $0xf8] sm:$0xff]  ;;  %v5447_v57 = vld [vmem:[%s9606_s2 + $0x110] sm:$0xff]  ;;  %v7881_v45 = vld [vmem:[%s9607_s3 + $0x1] ss:$0 sm:$0xff] }
 0x1c7   : > { %2445 = vmatmul.mubr.f32.gmra.mrb[24].mxu0 %v2211_v46  ;;  %v2179_v46 = vrot.slane %v9864_v1, 2 }
 0x1c8   : > { %5416 = vmatprep.mubr.msk.f32.mxu0 %vm230_vm0, %v2153_v56  ;;  %v2180_v56 = vrot.slane %v9865_v62, 2  ;;  %v5451_v62 = vld [vmem:[%s9606_s2 + $0x130] sm:$0xff] }
 0x1ca   : > { %v2181_v21 = vsel %vm722_vm4, %v2179_v46, %v2180_v56 }
 0x1cb   : > { %2450 = vmatmul.mubr.f32.gmra.mrb[26].mxu0 %v2212_v29  ;;  %v9866_v29 = vld [vmem:[#allocation15_spill] sm:$0xff] }
 0x1cc   : > { %5417 = vmatprep.mubr.msk.f32.mxu0 %vm230_vm0, %v2156_v33  ;;  %v2182_v63 = vrot.slane %v9866_v29, 2  ;;  %v2223_v33 = vsel %vm230_vm0, %v9864_v1, %v2072_v58  ;;  %v5450_v1 = vld [vmem:[%s9606_s2 + $0x128] sm:$0xff]  ;;  %v5453_v58 = vld [vmem:[%s9606_s2 + $0x140] sm:$0xff] }
 0x1cd   : > { %v7876_v29 = vld [vmem:[%s9607_s3] ss:$0 sm:$0xff] }
 0x1cf   : > { %2455 = vmatmul.mubr.f32.gmra.mrb[28].mxu0 %v2213_v44  ;;  %v2183_v44 = vsel %vm722_vm4, %v2180_v56, %v2182_v63  ;;  %v5452_v56 = vld [vmem:[%s9606_s2 + $0x138] sm:$0xff] }
 0x1d0   : > { %5418 = vmatprep.mubr.msk.f32.mxu0 %vm230_vm0, %v2158_v31  ;;  %v9867_v31 = vld [vmem:[#allocation16_spill] sm:$0xff] }
 0x1d1   : > { %v2185_v7 = vrot.slane %v9867_v31, 2 }
 0x1d3   : > { %2460 = vmatmul.mubr.f32.gmra.mrb[30].mxu0 %v2214_v24  ;;  %v2076_v24 = vpop.permute.xlu0 %2075  ;;  %v2186_v17 = vsel %vm722_vm4, %v2184_v50, %v2185_v7 }
 0x1d4   : > { %5419 = vmatprep.mubr.msk.f32.mxu0 %vm230_vm0, %v2161_v59  ;;  %v2187_v59 = vrot.slane %v7427_v51, 2  ;;  %v2225_v5 = vsel %vm230_vm0, %v7414_v36, %v2076_v24 }
 0x1d6   : > { %v2188_v37 = vsel %vm722_vm4, %v2185_v7, %v2187_v59  ;;  %v5456_v7 = vld [vmem:[%s9606_s2 + $0x158] sm:$0xff] }
 0x1d7   : > { %2465 = vmatmul.mubr.f32.gmra.mrb[32].mxu0 %v2215_v3  ;;  %v2078_v3 = vpop.permute.xlu1 %2077  ;;  %v2080_v51 = vpop.permute.xlu0 %2079 }
 0x1d8   : > { %5420 = vmatprep.mubr.msk.f32.mxu0 %vm230_vm0, %v2163_v52  ;;  %v2189_v52 = vrot.slane %v7438_v20, 2  ;;  %v2226_v18 = vsel %vm230_vm0, %v9867_v31, %v2078_v3  ;;  %v2227_v36 = vsel %vm230_vm0, %v7438_v20, %v2080_v51  ;;  %v5455_v31 = vld [vmem:[%s9606_s2 + $0x150] sm:$0xff] }
 0x1d9   : > { %v5459_v51 = vld [vmem:[%s9606_s2 + $0x170] sm:$0xff] }
 0x1db   : > { %2470 = vmatmul.mubr.f32.gmra.mrb[34].mxu0 %v2216_v54  ;;  %v2191_v54 = vsel %vm722_vm4, %v2189_v52, %v2190_v42  ;;  %v2084_v53 = vpop.permute.xlu0 %2083  ;;  %v5458_v52 = vld [vmem:[%s9606_s2 + $0x168] sm:$0xff] }
 0x1dc   : > { %5421 = vmatprep.mubr.msk.f32.mxu0 %vm230_vm0, %v2166_v34  ;;  %v2082_v34 = vpop.permute.xlu1 %2081  ;;  %v2229_v20 = vsel %vm230_vm0, %v9869_v23, %v2084_v53 }
 0x1dd   : > { %v2228_v26 = vsel %vm230_vm0, %v9868_v19, %v2082_v34 }
 0x1df   : > { %2475 = vmatmul.mubr.f32.gmra.mrb[36].mxu0 %v2217_v39  ;;  %v2194_v39 = vrot.slane %v9869_v23, 2 }
 0x1e0   : > { %5422 = vmatprep.mubr.msk.f32.mxu0 %vm230_vm0, %v2168_v6  ;;  %v2195_v6 = vrot.slane %v9870_v11, 2  ;;  %v2086_v43 = vpop.permute.xlu1 %2085 }
 0x1e1   : > { %v2230_v13 = vsel %vm230_vm0, %v9870_v11, %v2086_v43 }
 0x1e2   : > { %v2196_v38 = vsel %vm722_vm4, %v2194_v39, %v2195_v6 }
 0x1e3   : > { %2480 = vmatmul.mubr.f32.gmra.mrb[38].mxu0 %v2218_v2  ;;  %v2198_v2 = vsel %vm722_vm4, %v2195_v6, %v2197_v60 }
 0x1e4   : > { %5423 = vmatprep.mubr.msk.f32.mxu0 %vm230_vm0, %v2171_v4  ;;  %v5438_v4 = vld [vmem:[%s9606_s2 + $0xc8] sm:$0xff] }
 0x1e5   : > { %v5696_v55 = vpack.c.bf16 %v5438_v4, %v5437_v10 }
 0x1e7   : > { %2485 = vmatmul.mubr.f32.gmra.mrb[40].mxu0 %v2219_v32  ;;  %5697 = vmatpush1.bf16.msra.mxu1 %v5696_v55  ;;  %v5440_v32 = vld [vmem:[%s9606_s2 + $0xd8] sm:$0xff] }
 0x1e8   : > { %5424 = vmatprep.mubr.msk.f32.mxu0 %vm230_vm0, %v2173_v15  ;;  %5698 = vmatprep.subr.bf16.mxu1 %v9808_v48  ;;  %v5699_v9 = vpack.c.bf16 %v5440_v32, %v5439_v12  ;;  %v5441_v15 = vld [vmem:[%s9606_s2 + $0xe0] sm:$0xff] }
 0x1e9   : > { %v5702_v14 = vpack.c.bf16 %v5442_v8, %v5441_v15 }
 0x1eb   : > { %2490 = vmatmul.mubr.f32.gmra.mrb[42].mxu0 %v2220_v40  ;;  %5700 = vmatpush1.bf16.msra.mxu1 %v5699_v9  ;;  %v5705_v40 = vpack.c.bf16 %v5444_v28, %v5443_v35 }
 0x1ec   : > { %5425 = vmatprep.mubr.msk.f32.mxu0 %vm230_vm0, %v2176_v49  ;;  %5701 = vmatprep.subr.bf16.mxu1 %v9808_v48  ;;  %v5446_v49 = vld [vmem:[%s9606_s2 + $0x108] sm:$0xff] }
 0x1ed   : > { %v5708_v25 = vpack.c.bf16 %v5446_v49, %v5445_v61 }
 0x1ef   : > { %2495 = vmatmul.mubr.f32.gmra.mrb[44].mxu0 %v2221_v47  ;;  %5703 = vmatpush1.bf16.msra.mxu1 %v5702_v14  ;;  %v5448_v47 = vld [vmem:[%s9606_s2 + $0x118] sm:$0xff] }
 0x1f0   : > { %5426 = vmatprep.mubr.msk.f32.mxu0 %vm230_vm0, %v2178_v22  ;;  %5704 = vmatprep.subr.bf16.mxu1 %v9808_v48  ;;  %v5711_v0 = vpack.c.bf16 %v5448_v47, %v5447_v57  ;;  %v5449_v22 = vld [vmem:[%s9606_s2 + $0x120] sm:$0xff] }
 0x1f1   : > { %v5714_v46 = vpack.c.bf16 %v5450_v1, %v5449_v22 }
 0x1f3   : > { %2500 = vmatmul.mubr.f32.gmra.mrb[46].mxu0 %v2222_v27  ;;  %5706 = vmatpush1.bf16.msra.mxu1 %v5705_v40  ;;  %v5717_v27 = vpack.c.bf16 %v5452_v56, %v5451_v62 }
 0x1f4   : > { %5427 = vmatprep.mubr.msk.f32.mxu0 %vm230_vm0, %v2181_v21  ;;  %5707 = vmatprep.subr.bf16.mxu1 %v9808_v48  ;;  %v5454_v21 = vld [vmem:[%s9606_s2 + $0x148] sm:$0xff] }
 0x1f5   : > { %v5720_v63 = vpack.c.bf16 %v5454_v21, %v5453_v58 }
 0x1f7   : > { %2505 = vmatmul.mubr.f32.gmra.mrb[48].mxu0 %v2223_v33  ;;  %5709 = vmatpush1.bf16.msra.mxu1 %v5708_v25 }
 0x1f8   : > { %5428 = vmatprep.mubr.msk.f32.mxu0 %vm230_vm0, %v2183_v44  ;;  %5710 = vmatprep.subr.bf16.mxu1 %v9808_v48 }
 0x1fb   : > { %2510 = vmatmul.mubr.f32.gmra.mrb[50].mxu0 %v2224_v30  ;;  %5712 = vmatpush1.bf16.msra.mxu1 %v5711_v0  ;;  %v5723_v30 = vpack.c.bf16 %v5456_v7, %v5455_v31 }
 0x1fc   : > { %5429 = vmatprep.mubr.msk.f32.mxu0 %vm230_vm0, %v2186_v17  ;;  %5713 = vmatprep.subr.bf16.mxu1 %v9808_v48 }
 0x1ff   : > { %2515 = vmatmul.mubr.f32.gmra.mrb[52].mxu0 %v2225_v5  ;;  %5715 = vmatpush1.bf16.msra.mxu1 %v5714_v46 }
 0x200   : > { %5430 = vmatprep.mubr.msk.f32.mxu0 %vm230_vm0, %v2188_v37  ;;  %5716 = vmatprep.subr.bf16.mxu1 %v9808_v48  ;;  %v5457_v37 = vld [vmem:[%s9606_s2 + $0x160] sm:$0xff] }
 0x201   : > { %v5726_v19 = vpack.c.bf16 %v5458_v52, %v5457_v37 }
 0x203   : > { %2520 = vmatmul.mubr.f32.gmra.mrb[54].mxu0 %v2226_v18  ;;  %5718 = vmatpush1.bf16.msra.mxu1 %v5717_v27 }
 0x204   : > { %5431 = vmatprep.mubr.msk.f32.mxu0 %vm230_vm0, %v2191_v54  ;;  %5719 = vmatprep.subr.bf16.mxu1 %v9808_v48  ;;  %v5460_v54 = vld [vmem:[%s9606_s2 + $0x178] sm:$0xff] }
 0x205   : > { %v5729_v34 = vpack.c.bf16 %v5460_v54, %v5459_v51 }
 0x207   : > { %2525 = vmatmul.mubr.f32.gmra.mrb[56].mxu0 %v2227_v36  ;;  %5721 = vmatpush1.bf16.msra.mxu1 %v5720_v63 }
 0x208   : > { %5432 = vmatprep.mubr.msk.f32.mxu0 %vm230_vm0, %v2193_v16  ;;  %5722 = vmatprep.subr.bf16.mxu1 %v9808_v48 }
 0x20b   : > { %2530 = vmatmul.mubr.f32.gmra.mrb[58].mxu0 %v2228_v26  ;;  %5724 = vmatpush1.bf16.msra.mxu1 %v5723_v30 }
 0x20c   : > { %5433 = vmatprep.mubr.msk.f32.mxu0 %vm230_vm0, %v2196_v38  ;;  %5725 = vmatprep.subr.bf16.mxu1 %v9808_v48 }
 0x20f   : > { %2535 = vmatmul.mubr.f32.gmra.mrb[60].mxu0 %v2229_v20  ;;  %5727 = vmatpush1.bf16.msra.mxu1 %v5726_v19 }
 0x210   : > { %5434 = vmatprep.mubr.msk.f32.mxu0 %vm230_vm0, %v2198_v2  ;;  %5728 = vmatprep.subr.bf16.mxu1 %v9808_v48 }
 0x213   : > { %2540 = vmatmul.mubr.f32.gmra.mrb[62].mxu0 %v2230_v13  ;;  %5730 = vmatpush1.bf16.msra.mxu1 %v5729_v34 }
 0x214   : > { %5731 = vmatprep.subr.bf16.mxu1 %v9808_v48 }
 0x26a   : > { %v2386_v33 = vpop.f32.mrb[0].mxu0 }
 0x26b   : > { %v2582_v44 = vmul.f32 %v7876_v29, %v2386_v33  ;;  %v2388_v50 = vpop.f32.mrb[1].mxu0 }
 0x26d   : > { %v2619_v24 = vadd.f32 %v7881_v45, %v2582_v44 }
 0x26e   : > { %v2391_v17 = vpop.f32.mrb[2].mxu0 }
 0x26f   : > { %vm2651_vm5 = vcmp.gt.f32.partialorder %v2619_v24, 0.0  ;;  %v2683_v59 = vmul.f32 0.2, %v2619_v24  ;;  %v2583_v5 = vmul.f32 %v7876_v29, %v2391_v17  ;;  %v2393_v3 = vpop.f32.mrb[3].mxu0 }
 0x271   : > { %v2715_v42 = vsel %vm2651_vm5, %v2619_v24, %v2683_v59  ;;  %v2620_v18 = vadd.f32 %v7881_v45, %v2583_v5 }
 0x272   : > { %v2786_v41 = vrot.slane %v2715_v42, 7  ;;  %v2396_v36 = vpop.f32.mrb[4].mxu0 }
 0x273   : > { %vm2652_vm6 = vcmp.gt.f32.partialorder %v2620_v18, 0.0  ;;  %v2684_v16 = vmul.f32 0.2, %v2620_v18  ;;  %v2584_v23 = vmul.f32 %v7876_v29, %v2396_v36  ;;  %v2398_v39 = vpop.f32.mrb[5].mxu0 }
 0x274   : > { %v2882_v11 = vsel %vm271_vm1, 0.0, %v2786_v41 }
 0x275   : > { %2915 = vst.msk [vmem:[#allocation3 + $0x18] sm:$0xff] %vm230_vm0, %v2882_v11  ;;  %v2716_v6 = vsel %vm2652_vm6, %v2620_v18, %v2684_v16  ;;  %v2621_v26 = vadd.f32 %v7881_v45, %v2584_v23 }
 0x276   : > { %v2787_v53 = vrot.slane %v2716_v6, 7  ;;  %v2401_v38 = vpop.f32.mrb[6].mxu0 }
 0x277   : > { %vm2653_vm7 = vcmp.gt.f32.partialorder %v2621_v26, 0.0  ;;  %v2685_v60 = vmul.f32 0.2, %v2621_v26  ;;  %v2585_v20 = vmul.f32 %v7876_v29, %v2401_v38  ;;  %v2403_v43 = vpop.f32.mrb[7].mxu0 }
 0x278   : > { %v2788_v2 = vsel %vm271_vm1, %v2786_v41, %v2787_v53  ;;  %v2898_v13 = vsel %vm271_vm1, %v2787_v53, 0.0 }
 0x279   : > { %2916 = vst.msk [vmem:[#allocation3 + $0x20] sm:$0xff] %vm230_vm0, %v2788_v2  ;;  %v2717_v10 = vsel %vm2653_vm7, %v2621_v26, %v2685_v60  ;;  %v2622_v4 = vadd.f32 %v7881_v45, %v2585_v20 }
 0x27a   : > { %2917 = vst.msk [vmem:[#allocation3 + $0x28] sm:$0x3] %vm233_vm2, %v2898_v13  ;;  %v2789_v55 = vrot.slane %v2717_v10, 7  ;;  %v2406_v12 = vpop.f32.mrb[8].mxu0 }
 0x27b   : > { %vm2654_vm8 = vcmp.gt.f32.partialorder %v2622_v4, 0.0  ;;  %v2686_v32 = vmul.f32 0.2, %v2622_v4  ;;  %v2586_v9 = vmul.f32 %v7876_v29, %v2406_v12  ;;  %v2408_v15 = vpop.f32.mrb[9].mxu0 }
 0x27c   : > { %v2883_v8 = vsel %vm271_vm1, 0.0, %v2789_v55  ;;  %v7923_v28 = vld [vmem:[#allocation3 + $0x18] sm:$0xff] }
 0x27d   : > { %2918 = vst.msk [vmem:[#allocation3 + $0x30] sm:$0xff] %vm230_vm0, %v2883_v8  ;;  %v2718_v14 = vsel %vm2654_vm8, %v2622_v4, %v2686_v32  ;;  %v2623_v35 = vadd.f32 %v7881_v45, %v2586_v9  ;;  %v3643_v1 = vrot.slane %v7923_v28, 2  ;;  %v3467_v44 = vrot.slane %v7923_v28, 1 }
 0x27e   : > { %v2790_v40 = vrot.slane %v2718_v14, 7  ;;  %v2411_v61 = vpop.f32.mrb[10].mxu0 }
 0x27f   : > { %vm2655_vm9 = vcmp.gt.f32.partialorder %v2623_v35, 0.0  ;;  %v2687_v49 = vmul.f32 0.2, %v2623_v35  ;;  %v2587_v25 = vmul.f32 %v7876_v29, %v2411_v61  ;;  %v2413_v57 = vpop.f32.mrb[11].mxu0 }
 0x280   : > { %v2791_v47 = vsel %vm271_vm1, %v2789_v55, %v2790_v40  ;;  %v2899_v0 = vsel %vm271_vm1, %v2790_v40, 0.0  ;;  %v7928_v22 = vld [vmem:[#allocation3 + $0x20] sm:$0xff] }
 0x281   : > { %v3373_v46 = vld [vmem:[#allocation3 + $0x28] sm:$0x3]  ;;  %2919 = vst.msk [vmem:[#allocation3 + $0x38] sm:$0xff] %vm230_vm0, %v2791_v47  ;;  %v2719_v62 = vsel %vm2655_vm9, %v2623_v35, %v2687_v49  ;;  %v2624_v56 = vadd.f32 %v7881_v45, %v2587_v25  ;;  %v3644_v27 = vrot.slane %v7928_v22, 2  ;;  %v3468_v58 = vrot.slane %v7928_v22, 1 }
 0x282   : > { %2920 = vst.msk [vmem:[#allocation3 + $0x40] sm:$0x3] %vm233_vm2, %v2899_v0  ;;  %v2792_v21 = vrot.slane %v2719_v62, 7  ;;  %v2416_v63 = vpop.f32.mrb[12].mxu0  ;;  %v3470_v33 = vrot.slane %v3373_v46, 1  ;;  %v3646_v50 = vrot.slane %v3373_v46, 2 }
 0x283   : > { %vm2656_vm10 = vcmp.gt.f32.partialorder %v2624_v56, 0.0  ;;  %v2688_v31 = vmul.f32 0.2, %v2624_v56  ;;  %v2588_v7 = vmul.f32 %v7876_v29, %v2416_v63  ;;  %v2418_v30 = vpop.f32.mrb[13].mxu0  ;;  %v3645_v24 = vsel %vm722_vm4, %v3643_v1, %v3644_v27 }
 0x284   : > { %v2884_v17 = vsel %vm271_vm1, 0.0, %v2792_v21  ;;  %5461 = vmatprep.mubr.msk.f32.mxu1 %vm230_vm0, %v3645_v24  ;;  %v3471_v59 = vsel %vm545_vm3, %v3468_v58, %v3470_v33  ;;  %v3469_v5 = vsel %vm545_vm3, %v3467_v44, %v3468_v58  ;;  %v7944_v3 = vsel %vm722_vm4, %v3644_v27, %v3646_v50  ;;  %v7951_v41 = vld [vmem:[#allocation3 + $0x30] sm:$0xff] }
 0x285   : > { %2921 = vst.msk [vmem:[#allocation3 + $0x48] sm:$0xff] %vm230_vm0, %v2884_v17  ;;  %v2720_v37 = vsel %vm2656_vm10, %v2624_v56, %v2688_v31  ;;  %v2625_v52 = vadd.f32 %v7881_v45, %v2588_v7  ;;  %3549 = vrot.lane.b32.xlu1 %v3471_v59, %s6216_s23  ;;  %3547 = vrot.lane.b32.xlu0 %v3469_v5, %s6216_s23  ;;  %v3472_v60 = vrot.slane %v7951_v41, 1 }
 0x286   : > { %v2793_v19 = vrot.slane %v2720_v37, 7  ;;  %v2421_v42 = vpop.f32.mrb[14].mxu0 }
 0x287   : > { %vm2657_vm11 = vcmp.gt.f32.partialorder %v2625_v52, 0.0  ;;  %v2689_v18 = vmul.f32 0.2, %v2625_v52  ;;  %v2589_v51 = vmul.f32 %v7876_v29, %v2421_v42  ;;  %v2423_v54 = vpop.f32.mrb[15].mxu0 }
 0x288   : > { %v2794_v36 = vsel %vm271_vm1, %v2792_v21, %v2793_v19  ;;  %v2900_v34 = vsel %vm271_vm1, %v2793_v19, 0.0  ;;  %v7955_v16 = vld [vmem:[#allocation3 + $0x38] sm:$0xff] }
 0x289   : > { %v7957_v23 = vld [vmem:[#allocation3 + $0x40] sm:$0x3]  ;;  %2922 = vst.msk [vmem:[#allocation3 + $0x50] sm:$0xff] %vm230_vm0, %v2794_v36  ;;  %v2721_v39 = vsel %vm2657_vm11, %v2625_v52, %v2689_v18  ;;  %v2626_v11 = vadd.f32 %v7881_v45, %v2589_v51  ;;  %v3473_v6 = vrot.slane %v7955_v16, 1 }
 0x28a   : > { %2923 = vst.msk [vmem:[#allocation3 + $0x58] sm:$0x3] %vm233_vm2, %v2900_v34  ;;  %v3475_v26 = vrot.slane %v7957_v23, 1  ;;  %v2795_v53 = vrot.slane %v2721_v39, 7  ;;  %v2426_v38 = vpop.f32.mrb[16].mxu0 }
 0x28b   : > { %vm2658_vm12 = vcmp.gt.f32.partialorder %v2626_v11, 0.0  ;;  %v2690_v20 = vmul.f32 0.2, %v2626_v11  ;;  %v2590_v43 = vmul.f32 %v7876_v29, %v2426_v38  ;;  %v2428_v2 = vpop.f32.mrb[17].mxu0  ;;  %v3474_v4 = vsel %vm545_vm3, %v3472_v60, %v3473_v6 }
 0x28c   : > { %v3476_v13 = vsel %vm545_vm3, %v3473_v6, %v3475_v26  ;;  %v2885_v10 = vsel %vm271_vm1, 0.0, %v2795_v53  ;;  %3551 = vrot.lane.b32.xlu0 %v3474_v4, %s6216_s23  ;;  %v7974_v35 = vld [vmem:[#allocation3 + $0x48] sm:$0xff] }
 0x28d   : > { %3553 = vrot.lane.b32.xlu1 %v3476_v13, %s6216_s23  ;;  %2924 = vst.msk [vmem:[#allocation3 + $0x60] sm:$0xff] %vm230_vm0, %v2885_v10  ;;  %v2722_v55 = vsel %vm2658_vm12, %v2626_v11, %v2690_v20  ;;  %v2627_v12 = vadd.f32 %v7881_v45, %v2590_v43  ;;  %v3477_v56 = vrot.slane %v7974_v35, 1 }
 0x28e   : > { %v2796_v32 = vrot.slane %v2722_v55, 7  ;;  %v2431_v9 = vpop.f32.mrb[18].mxu0 }
 0x28f   : > { %vm2659_vm13 = vcmp.gt.f32.partialorder %v2627_v12, 0.0  ;;  %v2691_v15 = vmul.f32 0.2, %v2627_v12  ;;  %v2591_v8 = vmul.f32 %v7876_v29, %v2431_v9  ;;  %v2433_v14 = vpop.f32.mrb[19].mxu0 }
 0x290   : > { %v2797_v40 = vsel %vm271_vm1, %v2795_v53, %v2796_v32  ;;  %v2901_v61 = vsel %vm271_vm1, %v2796_v32, 0.0  ;;  %v7978_v49 = vld [vmem:[#allocation3 + $0x50] sm:$0xff] }
 0x291   : > { %v7980_v25 = vld [vmem:[#allocation3 + $0x58] sm:$0x3]  ;;  %2925 = vst.msk [vmem:[#allocation3 + $0x68] sm:$0xff] %vm230_vm0, %v2797_v40  ;;  %v2723_v57 = vsel %vm2659_vm13, %v2627_v12, %v2691_v15  ;;  %v2628_v47 = vadd.f32 %v7881_v45, %v2591_v8  ;;  %v7986_v0 = vrot.slane %v7978_v49, 1 }
 0x292   : > { %2926 = vst.msk [vmem:[#allocation3 + $0x70] sm:$0x3] %vm233_vm2, %v2901_v61  ;;  %v3480_v1 = vrot.slane %v7980_v25, 1  ;;  %v2798_v46 = vrot.slane %v2723_v57, 7  ;;  %v2436_v62 = vpop.f32.mrb[20].mxu0 }
 0x293   : > { %vm2660_vm14 = vcmp.gt.f32.partialorder %v2628_v47, 0.0  ;;  %v2692_v27 = vmul.f32 0.2, %v2628_v47  ;;  %v2592_v58 = vmul.f32 %v7876_v29, %v2436_v62  ;;  %v2438_v21 = vpop.f32.mrb[21].mxu0  ;;  %v7997_v44 = vsel %vm545_vm3, %v3477_v56, %v7986_v0 }
 0x294   : > { %v3481_v63 = vsel %vm545_vm3, %v7986_v0, %v3480_v1  ;;  %v2886_v33 = vsel %vm271_vm1, 0.0, %v2798_v46  ;;  %3555 = vrot.lane.b32.xlu0 %v7997_v44, %s6216_s23  ;;  %v8004_v5 = vld [vmem:[#allocation3 + $0x60] sm:$0xff] }
 0x295   : > { %3557 = vrot.lane.b32.xlu1 %v3481_v63, %s6216_s23  ;;  %2927 = vst.msk [vmem:[#allocation3 + $0x78] sm:$0xff] %vm230_vm0, %v2886_v33  ;;  %v2724_v50 = vsel %vm2660_vm14, %v2628_v47, %v2692_v27  ;;  %v2629_v31 = vadd.f32 %v7881_v45, %v2592_v58  ;;  %v3482_v11 = vrot.slane %v8004_v5, 1 }
 0x296   : > { %v2799_v7 = vrot.slane %v2724_v50, 7  ;;  %v2441_v30 = vpop.f32.mrb[22].mxu0 }
 0x297   : > { %vm2661_vm15 = vcmp.gt.f32.partialorder %v2629_v31, 0.0  ;;  %v2693_v24 = vmul.f32 0.2, %v2629_v31  ;;  %v2593_v17 = vmul.f32 %v7876_v29, %v2441_v30  ;;  %v2443_v59 = vpop.f32.mrb[23].mxu0 }
 0x298   : > { %v2800_v37 = vsel %vm271_vm1, %v2798_v46, %v2799_v7  ;;  %v2902_v52 = vsel %vm271_vm1, %v2799_v7, 0.0  ;;  %v8008_v19 = vld [vmem:[#allocation3 + $0x68] sm:$0xff] }
 0x299   : > { %v8010_v42 = vld [vmem:[#allocation3 + $0x70] sm:$0x3]  ;;  %2928 = vst.msk [vmem:[#allocation3 + $0x80] sm:$0xff] %vm230_vm0, %v2800_v37  ;;  %v2725_v18 = vsel %vm2661_vm15, %v2629_v31, %v2693_v24  ;;  %v2630_v51 = vadd.f32 %v7881_v45, %v2593_v17  ;;  %v8016_v54 = vrot.slane %v8008_v19, 1 }
 0x29a   : > { %2929 = vst.msk [vmem:[#allocation3 + $0x88] sm:$0x3] %vm233_vm2, %v2902_v52  ;;  %v3485_v36 = vrot.slane %v8010_v42, 1  ;;  %v2801_v34 = vrot.slane %v2725_v18, 7  ;;  %v2446_v39 = vpop.f32.mrb[24].mxu0 }
 0x29b   : > { %vm2662_vm5 = vcmp.gt.f32.partialorder %v2630_v51, 0.0  ;;  %v2694_v6 = vmul.f32 0.2, %v2630_v51  ;;  %v2594_v26 = vmul.f32 %v7876_v29, %v2446_v39  ;;  %v2448_v53 = vpop.f32.mrb[25].mxu0  ;;  %v8027_v20 = vsel %vm545_vm3, %v3482_v11, %v8016_v54 }
 0x29c   : > { %v3486_v38 = vsel %vm545_vm3, %v8016_v54, %v3485_v36  ;;  %v2887_v60 = vsel %vm271_vm1, 0.0, %v2801_v34  ;;  %3559 = vrot.lane.b32.xlu0 %v8027_v20, %s6216_s23  ;;  %v8034_v32 = vld [vmem:[#allocation3 + $0x78] sm:$0xff] }
 0x29d   : > { %3561 = vrot.lane.b32.xlu1 %v3486_v38, %s6216_s23  ;;  %2930 = vst.msk [vmem:[#allocation3 + $0x90] sm:$0xff] %vm230_vm0, %v2887_v60  ;;  %v2726_v43 = vsel %vm2662_vm5, %v2630_v51, %v2694_v6  ;;  %v2631_v2 = vadd.f32 %v7881_v45, %v2594_v26  ;;  %v3487_v62 = vrot.slane %v8034_v32, 1 }
 0x29e   : > { %v2802_v13 = vrot.slane %v2726_v43, 7  ;;  %v2451_v10 = vpop.f32.mrb[26].mxu0 }
 0x29f   : > { %vm2663_vm6 = vcmp.gt.f32.partialorder %v2631_v2, 0.0  ;;  %v2695_v4 = vmul.f32 0.2, %v2631_v2  ;;  %v2595_v55 = vmul.f32 %v7876_v29, %v2451_v10  ;;  %v2453_v12 = vpop.f32.mrb[27].mxu0 }
 0x2a0   : > { %v2803_v9 = vsel %vm271_vm1, %v2801_v34, %v2802_v13  ;;  %v2903_v15 = vsel %vm271_vm1, %v2802_v13, 0.0  ;;  %v8038_v8 = vld [vmem:[#allocation3 + $0x80] sm:$0xff] }
 0x2a1   : > { %v8040_v14 = vld [vmem:[#allocation3 + $0x88] sm:$0x3]  ;;  %2931 = vst.msk [vmem:[#allocation3 + $0x98] sm:$0xff] %vm230_vm0, %v2803_v9  ;;  %v2727_v40 = vsel %vm2663_vm6, %v2631_v2, %v2695_v4  ;;  %v2632_v61 = vadd.f32 %v7881_v45, %v2595_v55  ;;  %v8046_v57 = vrot.slane %v8038_v8, 1 }
 0x2a2   : > { %2932 = vst.msk [vmem:[#allocation3 + $0xa0] sm:$0x3] %vm233_vm2, %v2903_v15  ;;  %v3490_v47 = vrot.slane %v8040_v14, 1  ;;  %v2804_v1 = vrot.slane %v2727_v40, 7  ;;  %v2456_v46 = vpop.f32.mrb[28].mxu0 }
 0x2a3   : > { %vm2664_vm7 = vcmp.gt.f32.partialorder %v2632_v61, 0.0  ;;  %v2696_v56 = vmul.f32 0.2, %v2632_v61  ;;  %v2596_v27 = vmul.f32 %v7876_v29, %v2456_v46  ;;  %v2458_v58 = vpop.f32.mrb[29].mxu0  ;;  %v8057_v33 = vsel %vm545_vm3, %v3487_v62, %v8046_v57 }
 0x2a4   : > { %v3491_v21 = vsel %vm545_vm3, %v8046_v57, %v3490_v47  ;;  %v2888_v63 = vsel %vm271_vm1, 0.0, %v2804_v1  ;;  %3563 = vrot.lane.b32.xlu0 %v8057_v33, %s6216_s23  ;;  %v8064_v37 = vld [vmem:[#allocation3 + $0x90] sm:$0xff] }
 0x2a5   : > { %3565 = vrot.lane.b32.xlu1 %v3491_v21, %s6216_s23  ;;  %2933 = vst.msk [vmem:[#allocation3 + $0xa8] sm:$0xff] %vm230_vm0, %v2888_v63  ;;  %v2728_v50 = vsel %vm2664_vm7, %v2632_v61, %v2696_v56  ;;  %v2633_v31 = vadd.f32 %v7881_v45, %v2596_v27  ;;  %v3492_v38 = vrot.slane %v8064_v37, 1 }
 0x2a6   : > { %v2805_v7 = vrot.slane %v2728_v50, 7  ;;  %v2461_v30 = vpop.f32.mrb[30].mxu0 }
 0x2a7   : > { %vm2665_vm8 = vcmp.gt.f32.partialorder %v2633_v31, 0.0  ;;  %v2697_v24 = vmul.f32 0.2, %v2633_v31  ;;  %v2597_v17 = vmul.f32 %v7876_v29, %v2461_v30  ;;  %v2463_v59 = vpop.f32.mrb[31].mxu0 }
 0x2a8   : > { %v2806_v52 = vsel %vm271_vm1, %v2804_v1, %v2805_v7  ;;  %v2904_v18 = vsel %vm271_vm1, %v2805_v7, 0.0  ;;  %v8068_v51 = vld [vmem:[#allocation3 + $0x98] sm:$0xff] }
 0x2a9   : > { %v8070_v36 = vld [vmem:[#allocation3 + $0xa0] sm:$0x3]  ;;  %2934 = vst.msk [vmem:[#allocation3 + $0xb0] sm:$0xff] %vm230_vm0, %v2806_v52  ;;  %v2729_v34 = vsel %vm2665_vm8, %v2633_v31, %v2697_v24  ;;  %v2634_v39 = vadd.f32 %v7881_v45, %v2597_v17  ;;  %v8076_v11 = vrot.slane %v8068_v51, 1 }
 0x2aa   : > { %2935 = vst.msk [vmem:[#allocation3 + $0xb8] sm:$0x3] %vm233_vm2, %v2904_v18  ;;  %v3495_v6 = vrot.slane %v8070_v36, 1  ;;  %v2807_v26 = vrot.slane %v2729_v34, 7  ;;  %v2466_v53 = vpop.f32.mrb[32].mxu0 }
 0x2ab   : > { %vm2666_vm9 = vcmp.gt.f32.partialorder %v2634_v39, 0.0  ;;  %v2698_v60 = vmul.f32 0.2, %v2634_v39  ;;  %v2598_v43 = vmul.f32 %v7876_v29, %v2466_v53  ;;  %v2468_v2 = vpop.f32.mrb[33].mxu0  ;;  %v8087_v4 = vsel %vm545_vm3, %v3492_v38, %v8076_v11 }
 0x2ac   : > { %v3496_v13 = vsel %vm545_vm3, %v8076_v11, %v3495_v6  ;;  %v2889_v10 = vsel %vm271_vm1, 0.0, %v2807_v26  ;;  %3567 = vrot.lane.b32.xlu0 %v8087_v4, %s6216_s23  ;;  %v8094_v1 = vld [vmem:[#allocation3 + $0xa8] sm:$0xff] }
 0x2ad   : > { %3569 = vrot.lane.b32.xlu1 %v3496_v13, %s6216_s23  ;;  %2936 = vst.msk [vmem:[#allocation3 + $0xc0] sm:$0xff] %vm230_vm0, %v2889_v10  ;;  %v2730_v55 = vsel %vm2666_vm9, %v2634_v39, %v2698_v60  ;;  %v2635_v12 = vadd.f32 %v7881_v45, %v2598_v43  ;;  %v3497_v30 = vrot.slane %v8094_v1, 1 }
 0x2ae   : > { %v2808_v9 = vrot.slane %v2730_v55, 7  ;;  %v2471_v15 = vpop.f32.mrb[34].mxu0 }
 0x2af   : > { %vm2667_vm10 = vcmp.gt.f32.partialorder %v2635_v12, 0.0  ;;  %v2699_v40 = vmul.f32 0.2, %v2635_v12  ;;  %v2599_v61 = vmul.f32 %v7876_v29, %v2471_v15  ;;  %v2473_v47 = vpop.f32.mrb[35].mxu0 }
 0x2b0   : > { %v2809_v46 = vsel %vm271_vm1, %v2807_v26, %v2808_v9  ;;  %v2905_v62 = vsel %vm271_vm1, %v2808_v9, 0.0  ;;  %v8098_v56 = vld [vmem:[#allocation3 + $0xb0] sm:$0xff] }
 0x2b1   : > { %v8100_v27 = vld [vmem:[#allocation3 + $0xb8] sm:$0x3]  ;;  %2937 = vst.msk [vmem:[#allocation3 + $0xc8] sm:$0xff] %vm230_vm0, %v2809_v46  ;;  %v2731_v58 = vsel %vm2667_vm10, %v2635_v12, %v2699_v40  ;;  %v2636_v21 = vadd.f32 %v7881_v45, %v2599_v61  ;;  %v8106_v63 = vrot.slane %v8098_v56, 1 }
 0x2b2   : > { %2938 = vst.msk [vmem:[#allocation3 + $0xd0] sm:$0x3] %vm233_vm2, %v2905_v62  ;;  %v3500_v50 = vrot.slane %v8100_v27, 1  ;;  %v2810_v31 = vrot.slane %v2731_v58, 7  ;;  %v2476_v7 = vpop.f32.mrb[36].mxu0 }
 0x2b3   : > { %vm2668_vm11 = vcmp.gt.f32.partialorder %v2636_v21, 0.0  ;;  %v2700_v24 = vmul.f32 0.2, %v2636_v21  ;;  %v2600_v17 = vmul.f32 %v7876_v29, %v2476_v7  ;;  %v2478_v59 = vpop.f32.mrb[37].mxu0  ;;  %v8117_v34 = vsel %vm545_vm3, %v3497_v30, %v8106_v63 }
 0x2b4   : > { %v3501_v52 = vsel %vm545_vm3, %v8106_v63, %v3500_v50  ;;  %v2890_v18 = vsel %vm271_vm1, 0.0, %v2810_v31  ;;  %3571 = vrot.lane.b32.xlu0 %v8117_v34, %s6216_s23  ;;  %v8124_v2 = vld [vmem:[#allocation3 + $0xc0] sm:$0xff] }
 0x2b5   : > { %3573 = vrot.lane.b32.xlu1 %v3501_v52, %s6216_s23  ;;  %2939 = vst.msk [vmem:[#allocation3 + $0xd8] sm:$0xff] %vm230_vm0, %v2890_v18  ;;  %v2732_v39 = vsel %vm2668_vm11, %v2636_v21, %v2700_v24  ;;  %v2637_v6 = vadd.f32 %v7881_v45, %v2600_v17  ;;  %9871 = vst [vmem:[#allocation20_spill] sm:$0xff] %v8124_v2  ;;  %v3502_v62 = vrot.slane %v8124_v2, 1 }
 0x2b6   : > { %v2811_v26 = vrot.slane %v2732_v39, 7  ;;  %v2481_v53 = vpop.f32.mrb[38].mxu0 }
 0x2b7   : > { %vm2669_vm12 = vcmp.gt.f32.partialorder %v2637_v6, 0.0  ;;  %v2701_v38 = vmul.f32 0.2, %v2637_v6  ;;  %v2601_v60 = vmul.f32 %v7876_v29, %v2481_v53  ;;  %v2483_v43 = vpop.f32.mrb[39].mxu0 }
 0x2b8   : > { %v2812_v13 = vsel %vm271_vm1, %v2810_v31, %v2811_v26  ;;  %v2906_v10 = vsel %vm271_vm1, %v2811_v26, 0.0  ;;  %v8128_v55 = vld [vmem:[#allocation3 + $0xc8] sm:$0xff] }
 0x2b9   : > { %9872 = vst [vmem:[#allocation21_spill] sm:$0xff] %v8128_v55  ;;  %v8130_v12 = vld [vmem:[#allocation3 + $0xd0] sm:$0x3]  ;;  %2940 = vst.msk [vmem:[#allocation3 + $0xe0] sm:$0xff] %vm230_vm0, %v2812_v13  ;;  %v2733_v9 = vsel %vm2669_vm12, %v2637_v6, %v2701_v38  ;;  %v2638_v15 = vadd.f32 %v7881_v45, %v2601_v60  ;;  %v8136_v40 = vrot.slane %v8128_v55, 1 }
 0x2ba   : > { %9873 = vst [vmem:[#allocation22_spill] sm:$0xff] %v8130_v12  ;;  %2941 = vst.msk [vmem:[#allocation3 + $0xe8] sm:$0x3] %vm233_vm2, %v2906_v10  ;;  %v3505_v61 = vrot.slane %v8130_v12, 1  ;;  %v2813_v47 = vrot.slane %v2733_v9, 7  ;;  %v2486_v46 = vpop.f32.mrb[40].mxu0 }
 0x2bb   : > { %vm2670_vm13 = vcmp.gt.f32.partialorder %v2638_v15, 0.0  ;;  %v2702_v58 = vmul.f32 0.2, %v2638_v15  ;;  %v2602_v21 = vmul.f32 %v7876_v29, %v2486_v46  ;;  %v2488_v50 = vpop.f32.mrb[41].mxu0  ;;  %v8147_v30 = vsel %vm545_vm3, %v3502_v62, %v8136_v40 }
 0x2bc   : > { %v3506_v31 = vsel %vm545_vm3, %v8136_v40, %v3505_v61  ;;  %v2891_v7 = vsel %vm271_vm1, 0.0, %v2813_v47  ;;  %3575 = vrot.lane.b32.xlu0 %v8147_v30, %s6216_s23  ;;  %v8154_v26 = vld [vmem:[#allocation3 + $0xd8] sm:$0xff] }
 0x2bd   : > { %3577 = vrot.lane.b32.xlu1 %v3506_v31, %s6216_s23  ;;  %2942 = vst.msk [vmem:[#allocation3 + $0xf0] sm:$0xff] %vm230_vm0, %v2891_v7  ;;  %v2734_v24 = vsel %vm2670_vm13, %v2638_v15, %v2702_v58  ;;  %v2639_v17 = vadd.f32 %v7881_v45, %v2602_v21  ;;  %9874 = vst [vmem:[#allocation23_spill] sm:$0xff] %v8154_v26  ;;  %v3507_v46 = vrot.slane %v8154_v26, 1 }
 0x2be   : > { %v2814_v59 = vrot.slane %v2734_v24, 7  ;;  %v2491_v52 = vpop.f32.mrb[42].mxu0 }
 0x2bf   : > { %vm2671_vm14 = vcmp.gt.f32.partialorder %v2639_v17, 0.0  ;;  %v2703_v18 = vmul.f32 0.2, %v2639_v17  ;;  %v2603_v39 = vmul.f32 %v7876_v29, %v2491_v52  ;;  %v2493_v6 = vpop.f32.mrb[43].mxu0 }
 0x2c0   : > { %v2815_v53 = vsel %vm271_vm1, %v2813_v47, %v2814_v59  ;;  %v2907_v38 = vsel %vm271_vm1, %v2814_v59, 0.0  ;;  %v8158_v60 = vld [vmem:[#allocation3 + $0xe0] sm:$0xff] }
 0x2c1   : > { %9875 = vst [vmem:[#allocation24_spill] sm:$0xff] %v8158_v60  ;;  %v8160_v43 = vld [vmem:[#allocation3 + $0xe8] sm:$0x3]  ;;  %2943 = vst.msk [vmem:[#allocation3 + $0xf8] sm:$0xff] %vm230_vm0, %v2815_v53  ;;  %v2735_v13 = vsel %vm2671_vm14, %v2639_v17, %v2703_v18  ;;  %v2640_v10 = vadd.f32 %v7881_v45, %v2603_v39  ;;  %v8166_v9 = vrot.slane %v8158_v60, 1 }
 0x2c2   : > { %9876 = vst [vmem:[#allocation25_spill] sm:$0xff] %v8160_v43  ;;  %2944 = vst.msk [vmem:[#allocation3 + $0x100] sm:$0x3] %vm233_vm2, %v2907_v38  ;;  %v3510_v15 = vrot.slane %v8160_v43, 1  ;;  %v2816_v61 = vrot.slane %v2735_v13, 7  ;;  %v2496_v47 = vpop.f32.mrb[44].mxu0 }
 0x2c3   : > { %vm2672_vm15 = vcmp.gt.f32.partialorder %v2640_v10, 0.0  ;;  %v2704_v62 = vmul.f32 0.2, %v2640_v10  ;;  %v2604_v58 = vmul.f32 %v7876_v29, %v2496_v47  ;;  %v2498_v21 = vpop.f32.mrb[45].mxu0  ;;  %v8177_v7 = vsel %vm545_vm3, %v3507_v46, %v8166_v9 }
 0x2c4   : > { %v3511_v50 = vsel %vm545_vm3, %v8166_v9, %v3510_v15  ;;  %v2892_v31 = vsel %vm271_vm1, 0.0, %v2816_v61  ;;  %3579 = vrot.lane.b32.xlu0 %v8177_v7, %s6216_s23  ;;  %v8184_v53 = vld [vmem:[#allocation3 + $0xf0] sm:$0xff] }
 0x2c5   : > { %3581 = vrot.lane.b32.xlu1 %v3511_v50, %s6216_s23  ;;  %2945 = vst.msk [vmem:[#allocation3 + $0x108] sm:$0xff] %vm230_vm0, %v2892_v31  ;;  %v2736_v24 = vsel %vm2672_vm15, %v2640_v10, %v2704_v62  ;;  %v2641_v17 = vadd.f32 %v7881_v45, %v2604_v58  ;;  %9877 = vst [vmem:[#allocation26_spill] sm:$0xff] %v8184_v53  ;;  %v3512_v50 = vrot.slane %v8184_v53, 1 }
 0x2c6   : > { %v2817_v59 = vrot.slane %v2736_v24, 7  ;;  %v2501_v52 = vpop.f32.mrb[46].mxu0 }
 0x2c7   : > { %vm2673_vm5 = vcmp.gt.f32.partialorder %v2641_v17, 0.0  ;;  %v2705_v18 = vmul.f32 0.2, %v2641_v17  ;;  %v2605_v39 = vmul.f32 %v7876_v29, %v2501_v52  ;;  %v2503_v6 = vpop.f32.mrb[47].mxu0 }
 0x2c8   : > { %v2818_v38 = vsel %vm271_vm1, %v2816_v61, %v2817_v59  ;;  %v2908_v13 = vsel %vm271_vm1, %v2817_v59, 0.0  ;;  %v8188_v15 = vld [vmem:[#allocation3 + $0xf8] sm:$0xff] }
 0x2c9   : > { %v8190_v10 = vld [vmem:[#allocation3 + $0x100] sm:$0x3]  ;;  %2946 = vst.msk [vmem:[#allocation3 + $0x110] sm:$0xff] %vm230_vm0, %v2818_v38  ;;  %v2737_v47 = vsel %vm2673_vm5, %v2641_v17, %v2705_v18  ;;  %v2642_v46 = vadd.f32 %v7881_v45, %v2605_v39  ;;  %v8196_v62 = vrot.slane %v8188_v15, 1 }
 0x2ca   : > { %9878 = vst [vmem:[#allocation27_spill] sm:$0xff] %v8190_v10  ;;  %2947 = vst.msk [vmem:[#allocation3 + $0x118] sm:$0x3] %vm233_vm2, %v2908_v13  ;;  %v3515_v58 = vrot.slane %v8190_v10, 1  ;;  %v2819_v21 = vrot.slane %v2737_v47, 7  ;;  %v2506_v61 = vpop.f32.mrb[48].mxu0 }
 0x2cb   : > { %vm2674_vm6 = vcmp.gt.f32.partialorder %v2642_v46, 0.0  ;;  %v2706_v31 = vmul.f32 0.2, %v2642_v46  ;;  %v2606_v24 = vmul.f32 %v7876_v29, %v2506_v61  ;;  %v2508_v59 = vpop.f32.mrb[49].mxu0  ;;  %v8207_v18 = vsel %vm545_vm3, %v3512_v50, %v8196_v62 }
 0x2cc   : > { %v3516_v52 = vsel %vm545_vm3, %v8196_v62, %v3515_v58  ;;  %v2893_v17 = vsel %vm271_vm1, 0.0, %v2819_v21  ;;  %3583 = vrot.lane.b32.xlu0 %v8207_v18, %s6216_s23  ;;  %v8214_v59 = vld [vmem:[#allocation3 + $0x108] sm:$0xff] }
 0x2cd   : > { %3585 = vrot.lane.b32.xlu1 %v3516_v52, %s6216_s23  ;;  %2948 = vst.msk [vmem:[#allocation3 + $0x120] sm:$0xff] %vm230_vm0, %v2893_v17  ;;  %v2738_v39 = vsel %vm2674_vm6, %v2642_v46, %v2706_v31  ;;  %v2643_v6 = vadd.f32 %v7881_v45, %v2606_v24  ;;  %9879 = vst [vmem:[#allocation28_spill] sm:$0xff] %v8214_v59 }
 0x2ce   : > { %v2820_v38 = vrot.slane %v2738_v39, 7  ;;  %v2511_v13 = vpop.f32.mrb[50].mxu0 }
 0x2cf   : > { %vm2675_vm7 = vcmp.gt.f32.partialorder %v2643_v6, 0.0  ;;  %v2707_v47 = vmul.f32 0.2, %v2643_v6  ;;  %v2607_v58 = vmul.f32 %v7876_v29, %v2511_v13  ;;  %v2513_v61 = vpop.f32.mrb[51].mxu0 }
 0x2d0   : > { %v2821_v50 = vsel %vm271_vm1, %v2819_v21, %v2820_v38  ;;  %v2909_v52 = vsel %vm271_vm1, %v2820_v38, 0.0  ;;  %v8218_v17 = vld [vmem:[#allocation3 + $0x110] sm:$0xff]  ;;  %v3517_v38 = vrot.slane %v8214_v59, 1 }
 0x2d1   : > { %v8220_v46 = vld [vmem:[#allocation3 + $0x118] sm:$0x3]  ;;  %2949 = vst.msk [vmem:[#allocation3 + $0x128] sm:$0xff] %vm230_vm0, %v2821_v50  ;;  %v2739_v31 = vsel %vm2675_vm7, %v2643_v6, %v2707_v47  ;;  %v2644_v24 = vadd.f32 %v7881_v45, %v2607_v58  ;;  %v8226_v39 = vrot.slane %v8218_v17, 1 }
 0x2d2   : > { %9880 = vst [vmem:[#allocation29_spill] sm:$0xff] %v8220_v46  ;;  %2950 = vst.msk [vmem:[#allocation3 + $0x130] sm:$0x3] %vm233_vm2, %v2909_v52  ;;  %v3520_v13 = vrot.slane %v8220_v46, 1  ;;  %v2822_v61 = vrot.slane %v2739_v31, 7  ;;  %v2516_v21 = vpop.f32.mrb[52].mxu0 }
 0x2d3   : > { %9881 = vst [vmem:[#allocation30_spill] sm:$0xff] %v8226_v39  ;;  %vm2676_vm8 = vcmp.gt.f32.partialorder %v2644_v24, 0.0  ;;  %v2708_v10 = vmul.f32 0.2, %v2644_v24  ;;  %v2608_v53 = vmul.f32 %v7876_v29, %v2516_v21  ;;  %v2518_v43 = vpop.f32.mrb[53].mxu0  ;;  %v8237_v47 = vsel %vm545_vm3, %v3517_v38, %v8226_v39 }
 0x2d4   : > { %v3521_v50 = vsel %vm545_vm3, %v8226_v39, %v3520_v13  ;;  %v2894_v6 = vsel %vm271_vm1, 0.0, %v2822_v61  ;;  %9882 = vst [vmem:[#allocation31_spill] sm:$0xff] %v8237_v47  ;;  %3587 = vrot.lane.b32.xlu0 %v8237_v47, %s6216_s23  ;;  %v3649_v39 = vrot.slane %v7955_v16, 2 }
 0x2d5   : > { %3589 = vrot.lane.b32.xlu1 %v3521_v50, %s6216_s23  ;;  %2951 = vst.msk [vmem:[#allocation3 + $0x138] sm:$0xff] %vm230_vm0, %v2894_v6  ;;  %v2740_v58 = vsel %vm2676_vm8, %v2644_v24, %v2708_v10  ;;  %v2645_v52 = vadd.f32 %v7881_v45, %v2608_v53  ;;  %v8244_v50 = vld [vmem:[#allocation3 + $0x120] sm:$0xff] }
 0x2d6   : > { %v2823_v43 = vrot.slane %v2740_v58, 7  ;;  %v2521_v31 = vpop.f32.mrb[54].mxu0  ;;  %9883 = vst [vmem:[#allocation32_spill] sm:$0xff] %v8244_v50 }
 0x2d7   : > { %vm2677_vm9 = vcmp.gt.f32.partialorder %v2645_v52, 0.0  ;;  %v2709_v13 = vmul.f32 0.2, %v2645_v52  ;;  %v2609_v21 = vmul.f32 %v7876_v29, %v2521_v31  ;;  %v2523_v46 = vpop.f32.mrb[55].mxu0 }
 0x2d8   : > { %v2824_v38 = vsel %vm271_vm1, %v2822_v61, %v2823_v43  ;;  %v2910_v59 = vsel %vm271_vm1, %v2823_v43, 0.0  ;;  %v8248_v6 = vld [vmem:[#allocation3 + $0x128] sm:$0xff]  ;;  %v3522_v43 = vrot.slane %v8244_v50, 1 }
 0x2d9   : > { %v8250_v10 = vld [vmem:[#allocation3 + $0x130] sm:$0x3]  ;;  %2952 = vst.msk [vmem:[#allocation3 + $0x140] sm:$0xff] %vm230_vm0, %v2824_v38  ;;  %v2741_v53 = vsel %vm2677_vm9, %v2645_v52, %v2709_v13  ;;  %v2646_v24 = vadd.f32 %v7881_v45, %v2609_v21  ;;  %v8256_v58 = vrot.slane %v8248_v6, 1 }
 0x2da   : > { %9884 = vst [vmem:[#allocation33_spill] sm:$0xff] %v8250_v10  ;;  %2953 = vst.msk [vmem:[#allocation3 + $0x148] sm:$0x3] %vm233_vm2, %v2910_v59  ;;  %v3525_v46 = vrot.slane %v8250_v10, 1  ;;  %v2825_v31 = vrot.slane %v2741_v53, 7  ;;  %v2526_v61 = vpop.f32.mrb[56].mxu0 }
 0x2db   : > { %9885 = vst [vmem:[#allocation34_spill] sm:$0xff] %v8256_v58  ;;  %vm2678_vm10 = vcmp.gt.f32.partialorder %v2646_v24, 0.0  ;;  %v2710_v26 = vmul.f32 0.2, %v2646_v24  ;;  %v2610_v60 = vmul.f32 %v7876_v29, %v2526_v61  ;;  %v2528_v12 = vpop.f32.mrb[57].mxu0  ;;  %v8267_v13 = vsel %vm545_vm3, %v3522_v43, %v8256_v58 }
 0x2dc   : > { %v3526_v59 = vsel %vm545_vm3, %v8256_v58, %v3525_v46  ;;  %v2895_v52 = vsel %vm271_vm1, 0.0, %v2825_v31  ;;  %9886 = vst [vmem:[#allocation35_spill] sm:$0xff] %v8267_v13  ;;  %3591 = vrot.lane.b32.xlu0 %v8267_v13, %s6216_s23 }
 0x2dd   : > { %3593 = vrot.lane.b32.xlu1 %v3526_v59, %s6216_s23  ;;  %2954 = vst.msk [vmem:[#allocation3 + $0x150] sm:$0xff] %vm230_vm0, %v2895_v52  ;;  %v2742_v21 = vsel %vm2678_vm10, %v2646_v24, %v2710_v26  ;;  %v2647_v38 = vadd.f32 %v7881_v45, %v2610_v60  ;;  %v8274_v59 = vld [vmem:[#allocation3 + $0x138] sm:$0xff] }
 0x2de   : > { %v2826_v12 = vrot.slane %v2742_v21, 7  ;;  %v2531_v53 = vpop.f32.mrb[58].mxu0  ;;  %9887 = vst [vmem:[#allocation11_spill] sm:$0xff] %v8274_v59 }
 0x2df   : > { %vm2679_vm11 = vcmp.gt.f32.partialorder %v2647_v38, 0.0  ;;  %v2711_v46 = vmul.f32 0.2, %v2647_v38  ;;  %v2611_v61 = vmul.f32 %v7876_v29, %v2531_v53  ;;  %v2533_v10 = vpop.f32.mrb[59].mxu0 }
 0x2e0   : > { %v2827_v43 = vsel %vm271_vm1, %v2825_v31, %v2826_v12  ;;  %v2911_v50 = vsel %vm271_vm1, %v2826_v12, 0.0  ;;  %v8278_v52 = vld [vmem:[#allocation3 + $0x140] sm:$0xff]  ;;  %v3527_v12 = vrot.slane %v8274_v59, 1 }
 0x2e1   : > { %9888 = vst [vmem:[#allocation4_spill] sm:$0xff] %v8278_v52  ;;  %v8280_v26 = vld [vmem:[#allocation3 + $0x148] sm:$0x3]  ;;  %2955 = vst.msk [vmem:[#allocation3 + $0x158] sm:$0xff] %vm230_vm0, %v2827_v43  ;;  %v2743_v60 = vsel %vm2679_vm11, %v2647_v38, %v2711_v46  ;;  %v2648_v24 = vadd.f32 %v7881_v45, %v2611_v61  ;;  %v8286_v21 = vrot.slane %v8278_v52, 1 }
 0x2e2   : > { %9889 = vst [vmem:[#allocation5_spill] sm:$0xff] %v8280_v26  ;;  %2956 = vst.msk [vmem:[#allocation3 + $0x160] sm:$0x3] %vm233_vm2, %v2911_v50  ;;  %v3530_v10 = vrot.slane %v8280_v26, 1  ;;  %v2828_v53 = vrot.slane %v2743_v60, 7  ;;  %v2536_v31 = vpop.f32.mrb[60].mxu0 }
 0x2e3   : > { %9890 = vst [vmem:[#allocation6_spill] sm:$0xff] %v8286_v21  ;;  %vm2680_vm12 = vcmp.gt.f32.partialorder %v2648_v24, 0.0  ;;  %v2712_v13 = vmul.f32 0.2, %v2648_v24  ;;  %v2612_v58 = vmul.f32 %v7876_v29, %v2536_v31  ;;  %v2538_v47 = vpop.f32.mrb[61].mxu0  ;;  %v8297_v46 = vsel %vm545_vm3, %v3527_v12, %v8286_v21 }
 0x2e4   : > { %v3531_v50 = vsel %vm545_vm3, %v8286_v21, %v3530_v10  ;;  %v2896_v38 = vsel %vm271_vm1, 0.0, %v2828_v53  ;;  %9891 = vst [vmem:[#allocation7_spill] sm:$0xff] %v8297_v46  ;;  %3595 = vrot.lane.b32.xlu0 %v8297_v46, %s6216_s23  ;;  %v8303_v47 = vld [vmem:[#allocation3 + $0x150] sm:$0xff] }
 0x2e5   : > { %3597 = vrot.lane.b32.xlu1 %v3531_v50, %s6216_s23  ;;  %2957 = vst.msk [vmem:[#allocation3 + $0x168] sm:$0xff] %vm230_vm0, %v2896_v38  ;;  %v2744_v61 = vsel %vm2680_vm12, %v2648_v24, %v2712_v13  ;;  %v2649_v43 = vadd.f32 %v7881_v45, %v2612_v58  ;;  %9892 = vst [vmem:[#allocation8_spill] sm:$0xff] %v8303_v47  ;;  %v3532_v58 = vrot.slane %v8303_v47, 1 }
 0x2e6   : > { %v2829_v60 = vrot.slane %v2744_v61, 7  ;;  %v2541_v10 = vpop.f32.mrb[62].mxu0 }
 0x2e7   : > { %vm2681_vm13 = vcmp.gt.f32.partialorder %v2649_v43, 0.0  ;;  %v2713_v31 = vmul.f32 0.2, %v2649_v43  ;;  %v2613_v50 = vmul.f32 %v7876_v29, %v2541_v10  ;;  %v2543_v26 = vpop.f32.mrb[63].mxu0 }
 0x2e8   : > { %v2830_v12 = vsel %vm271_vm1, %v2828_v53, %v2829_v60  ;;  %v2912_v59 = vsel %vm271_vm1, %v2829_v60, 0.0  ;;  %v8308_v38 = vld [vmem:[#allocation3 + $0x158] sm:$0xff] }
 0x2e9   : > { %v8310_v13 = vld [vmem:[#allocation3 + $0x160] sm:$0x3]  ;;  %2958 = vst.msk [vmem:[#allocation3 + $0x170] sm:$0xff] %vm230_vm0, %v2830_v12  ;;  %v2745_v24 = vsel %vm2681_vm13, %v2649_v43, %v2713_v31  ;;  %v2650_v61 = vadd.f32 %v7881_v45, %v2613_v50  ;;  %v8317_v29 = vrot.slane %v8308_v38, 1 }
 0x2ea   : > { %9893 = vst [vmem:[#allocation9_spill] sm:$0xff] %v8310_v13  ;;  %2959 = vst.msk [vmem:[#allocation3 + $0x178] sm:$0x3] %vm233_vm2, %v2912_v59  ;;  %v3535_v26 = vrot.slane %v8310_v13, 1  ;;  %v2831_v53 = vrot.slane %v2745_v24, 7 }
 0x2eb   : > { %9894 = vst [vmem:[#allocation10_spill] sm:$0xff] %v8317_v29  ;;  %vm2682_vm14 = vcmp.gt.f32.partialorder %v2650_v61, 0.0  ;;  %v2714_v60 = vmul.f32 0.2, %v2650_v61  ;;  %v8324_v47 = vsel %vm545_vm3, %v3532_v58, %v8317_v29 }
 0x2ec   : > { %v3536_v10 = vsel %vm545_vm3, %v8317_v29, %v3535_v26  ;;  %9895 = vst [vmem:[#allocation12_spill] sm:$0xff] %v8324_v47  ;;  %v2897_v59 = vsel %vm271_vm1, 0.0, %v2831_v53  ;;  %3599 = vrot.lane.b32.xlu0 %v8324_v47, %s6216_s23  ;;  %v8331_v31 = vld [vmem:[#allocation3 + $0x168] sm:$0xff] }
 0x2ed   : > { %3601 = vrot.lane.b32.xlu1 %v3536_v10, %s6216_s23  ;;  %2960 = vst.msk [vmem:[#allocation3 + $0x180] sm:$0xff] %vm230_vm0, %v2897_v59  ;;  %v2746_v45 = vsel %vm2682_vm14, %v2650_v61, %v2714_v60  ;;  %9896 = vst [vmem:[#allocation13_spill] sm:$0xff] %v8331_v31  ;;  %v3537_v60 = vrot.slane %v8331_v31, 1  ;;  %v3347_v59 = vld [vmem:[%s9606_s2] sm:$0xff]  ;;  %v3349_v31 = vld [vmem:[%s9606_s2 + $0x10] sm:$0xff] }
 0x2ee   : > { %v2832_v43 = vrot.slane %v2746_v45, 7  ;;  %v3348_v45 = vld [vmem:[%s9606_s2 + $0x8] sm:$0xff] }
 0x2f0   : > { %v2833_v50 = vsel %vm271_vm1, %v2831_v53, %v2832_v43  ;;  %v2913_v12 = vsel %vm271_vm1, %v2832_v43, 0.0  ;;  %v8335_v24 = vld [vmem:[#allocation3 + $0x170] sm:$0xff]  ;;  %v8361_v43 = vld [vmem:[#allocation3 + $0x8] sm:$0xff] }
 0x2f1   : > { %9897 = vst [vmem:[#allocation14_spill] sm:$0xff] %v8335_v24  ;;  %v8337_v58 = vld [vmem:[#allocation3 + $0x178] sm:$0x3]  ;;  %2961 = vst.msk [vmem:[#allocation3 + $0x188] sm:$0xff] %vm230_vm0, %v2833_v50  ;;  %v8342_v26 = vrot.slane %v8335_v24, 1 }
 0x2f2   : > { %9898 = vst [vmem:[#allocation15_spill] sm:$0xff] %v8337_v58  ;;  %2962 = vst.msk [vmem:[#allocation3 + $0x190] sm:$0x3] %vm233_vm2, %v2913_v12  ;;  %v3540_v61 = vrot.slane %v8337_v58, 1  ;;  %v2965_v50 = vld [vmem:[#allocation3 + $0x10] sm:$0x3] }
 0x2f3   : > { %9899 = vst [vmem:[#allocation16_spill] sm:$0xff] %v8342_v26  ;;  %v8350_v10 = vsel %vm545_vm3, %v3537_v60, %v8342_v26  ;;  %9901 = vst [vmem:[#allocation18_spill] sm:$0xff] %v8361_v43  ;;  %v8363_v12 = vld [vmem:[#allocation3] sm:$0xff] }
 0x2f4   : > { %v3541_v53 = vsel %vm545_vm3, %v8342_v26, %v3540_v61  ;;  %9900 = vst [vmem:[#allocation17_spill] sm:$0xff] %v8350_v10  ;;  %3603 = vrot.lane.b32.xlu0 %v8350_v10, %s6216_s23  ;;  %9902 = vst [vmem:[#allocation19_spill] sm:$0xff] %v8363_v12  ;;  %v5732_v61 = vpack.c.bf16 %v3348_v45, %v3347_v59  ;;  %v8365_v60 = vld [vmem:[#allocation3 + $0x180] sm:$0xff]  ;;  %v3060_v59 = vrot.slane %v8361_v43, 1  ;;  %v3062_v45 = vrot.slane %v2965_v50, 1 }
 0x2f5   : > { %3605 = vrot.lane.b32.xlu1 %v3541_v53, %s6216_s23  ;;  %9903 = vst [vmem:[#allocation36_spill] sm:$0xff] %v8365_v60  ;;  %v3350_v53 = vld [vmem:[%s9606_s2 + $0x18] sm:$0xff]  ;;  %v3059_v47 = vrot.slane %v8363_v12, 1  ;;  %v3542_v2 = vrot.slane %v8365_v60, 1 }
 0x2f6   : > { %v2968_v12 = vld [vmem:[#allocation3 + $0x28] sm:$0x3] }
 0x2f7   : > { %v3548_v58 = vpop.permute.xlu0 %3547  ;;  %v3550_v29 = vpop.permute.xlu1 %3549  ;;  %v3067_v60 = vrot.slane %v2968_v12, 1 }
 0x2f8   : > { %v3723_v13 = vsel %vm230_vm0, %v7923_v28, %v3548_v58  ;;  %v8375_v10 = vld [vmem:[#allocation3 + $0x188] sm:$0xff]  ;;  %v5735_v28 = vpack.c.bf16 %v3350_v53, %v3349_v31  ;;  %v2967_v58 = vld [vmem:[#allocation3 + $0x20] sm:$0xff]  ;;  %v3651_v31 = vrot.slane %v7957_v23, 2 }
 0x2f9   : > { %9904 = vst [vmem:[#allocation37_spill] sm:$0xff] %v8375_v10  ;;  %v8377_v26 = vld [vmem:[#allocation3 + $0x190] sm:$0x3]  ;;  %3909 = vmatmul.mubr.f32.vlgmr.msra.gmra.mrb[0].mxu1 %v3723_v13  ;;  %v3543_v46 = vrot.slane %v8375_v10, 1  ;;  %v3648_v13 = vrot.slane %v7951_v41, 2  ;;  %v3065_v53 = vrot.slane %v2967_v58, 1 }
 0x2fa   : > { %9905 = vst [vmem:[#allocation38_spill] sm:$0xff] %v8377_v26  ;;  %v3545_v21 = vrot.slane %v8377_v26, 1  ;;  %5733 = vmatpush1.bf16.msra.mxu1 %v5732_v61  ;;  %5462 = vmatprep.mubr.msk.f32.mxu1 %vm230_vm0, %v7944_v3  ;;  %v3351_v26 = vld [vmem:[%s9606_s2 + $0x20] sm:$0xff]  ;;  %v3352_v61 = vld [vmem:[%s9606_s2 + $0x28] sm:$0xff]  ;;  %v3724_v3 = vsel %vm230_vm0, %v7928_v22, %v3550_v29  ;;  %v2971_v29 = vld [vmem:[#allocation3 + $0x40] sm:$0x3] }
 0x2fb   : > { %v3544_v43 = vsel %vm545_vm3, %v3542_v2, %v3543_v46  ;;  %5734 = vmatprep.subr.bf16.mxu1 %v9808_v48  ;;  %v3650_v2 = vsel %vm722_vm4, %v3648_v13, %v3649_v39  ;;  %v2969_v10 = vld [vmem:[#allocation3 + $0x30] sm:$0xff]  ;;  %v5738_v55 = vpack.c.bf16 %v3352_v61, %v3351_v26  ;;  %v3354_v23 = vld [vmem:[%s9606_s2 + $0x38] sm:$0xff]  ;;  %v2974_v26 = vld [vmem:[#allocation3 + $0x58] sm:$0x3]  ;;  %v3654_v58 = vrot.slane %v7978_v49, 2 }
 0x2fc   : > { %v3546_v50 = vsel %vm545_vm3, %v3543_v46, %v3545_v21  ;;  %3607 = vrot.lane.b32.xlu0 %v3544_v43, %s6216_s23  ;;  %v3063_v21 = vsel %vm545_vm3, %v3060_v59, %v3062_v45  ;;  %v3061_v46 = vsel %vm545_vm3, %v3059_v47, %v3060_v59  ;;  %v2970_v43 = vld [vmem:[#allocation3 + $0x38] sm:$0xff]  ;;  %v3353_v47 = vld [vmem:[%s9606_s2 + $0x30] sm:$0xff]  ;;  %v3652_v45 = vsel %vm722_vm4, %v3649_v39, %v3651_v31 }
 0x2fd   : > { %3609 = vrot.lane.b32.xlu1 %v3546_v50, %s6216_s23  ;;  %3914 = vmatmul.mubr.f32.gmra.mrb[2].mxu1 %v3724_v3  ;;  %v8406_v50 = vld [vmem:[#allocation3 + $0x18] sm:$0xff]  ;;  %v8422_v13 = vrot.slane %v2970_v43, 1  ;;  %v3068_v61 = vsel %vm545_vm3, %v3065_v53, %v3067_v60  ;;  %v3072_v3 = vrot.slane %v2971_v29, 1  ;;  %v3656_v39 = vrot.slane %v7980_v25, 2  ;;  %v3355_v43 = vld [vmem:[%s9606_s2 + $0x40] sm:$0xff]  ;;  %v3357_v25 = vld [vmem:[%s9606_s2 + $0x50] sm:$0xff] }
 0x2fe   : > { %5463 = vmatprep.mubr.msk.f32.mxu1 %vm230_vm0, %v3650_v2  ;;  %5736 = vmatpush1.bf16.msra.mxu1 %v5735_v28  ;;  %9906 = vst [vmem:[#allocation39_spill] sm:$0xff] %v8406_v50  ;;  %v3552_v22 = vpop.permute.xlu0 %3551  ;;  %v3064_v28 = vrot.slane %v8406_v50, 1  ;;  %v3069_v2 = vrot.slane %v2969_v10, 1  ;;  %v3077_v31 = vrot.slane %v2974_v26, 1  ;;  %v3356_v60 = vld [vmem:[%s9606_s2 + $0x48] sm:$0xff] }
 0x2ff   : > { %5737 = vmatprep.subr.bf16.mxu1 %v9808_v48  ;;  %v3725_v12 = vsel %vm230_vm0, %v7951_v41, %v3552_v22  ;;  %v3554_v59 = vpop.permute.xlu1 %3553  ;;  %v3658_v22 = vrot.slane %v8004_v5, 2  ;;  %v8449_v29 = vld [vmem:[#allocation3 + $0x100] sm:$0x3]  ;;  %v8459_v26 = vld [vmem:[#allocation3 + $0x130] sm:$0x3] }
 0x300   : > { %3139 = vrot.lane.b32.xlu0 %v3061_v46, %s6216_s23  ;;  %v3066_v41 = vsel %vm545_vm3, %v3064_v28, %v3065_v53  ;;  %v3653_v46 = vrot.slane %v7974_v35, 2  ;;  %v8446_v53 = vsel %vm545_vm3, %v3069_v2, %v8422_v13  ;;  %v8467_v28 = vrot.slane %v8218_v17, 2 }
 0x301   : > { %3141 = vrot.lane.b32.xlu1 %v3063_v21, %s6216_s23  ;;  %3919 = vmatmul.mubr.f32.gmra.mrb[4].mxu1 %v3725_v12  ;;  %v5741_v21 = vpack.c.bf16 %v3354_v23, %v3353_v47  ;;  %v8451_v47 = vld [vmem:[#allocation3 + $0x118] sm:$0x3]  ;;  %v3073_v23 = vsel %vm545_vm3, %v8422_v13, %v3072_v3  ;;  %v5744_v12 = vpack.c.bf16 %v3356_v60, %v3355_v43  ;;  %v8473_v3 = vld [vmem:[#allocation3 + $0x160] sm:$0x3]  ;;  %v8481_v43 = vrot.slane %v8278_v52, 2 }
 0x302   : > { %5464 = vmatprep.mubr.msk.f32.mxu1 %vm230_vm0, %v3652_v45  ;;  %5739 = vmatpush1.bf16.msra.mxu1 %v5738_v55  ;;  %v3726_v55 = vsel %vm230_vm0, %v7955_v16, %v3554_v59  ;;  %v3655_v10 = vsel %vm722_vm4, %v3653_v46, %v3654_v58  ;;  %v3358_v16 = vld [vmem:[%s9606_s2 + $0x58] sm:$0xff]  ;;  %v8464_v45 = vrot.slane %v8188_v15, 2  ;;  %v3657_v2 = vsel %vm722_vm4, %v3654_v58, %v3656_v39  ;;  %v2977_v58 = vld [vmem:[#allocation3 + $0x70] sm:$0x3] }
 0x303   : > { %5740 = vmatprep.subr.bf16.mxu1 %v9808_v48  ;;  %v8461_v59 = vld [vmem:[#allocation3 + $0x148] sm:$0x3]  ;;  %v8478_v46 = vrot.slane %v8248_v6, 2  ;;  %v8489_v39 = vrot.slane %v8308_v38, 2  ;;  %v5747_v50 = vpack.c.bf16 %v3358_v16, %v3357_v25  ;;  %v3298_v52 = vrot.slane %v8459_v26, 2  ;;  %v3359_v16 = vld [vmem:[%s9606_s2 + $0x60] sm:$0xff] }
 0x304   : > { %3143 = vrot.lane.b32.xlu0 %v3066_v41, %s6216_s23  ;;  %v3078_v41 = vsel %vm545_vm3, %v7986_v0, %v3077_v31  ;;  %v8492_v31 = vrot.slane %v8335_v24, 2  ;;  %v3308_v24 = vrot.slane %v8473_v3, 2  ;;  %v3082_v25 = vrot.slane %v2977_v58, 1 }
 0x305   : > { %3145 = vrot.lane.b32.xlu1 %v3068_v61, %s6216_s23  ;;  %3924 = vmatmul.mubr.f32.gmra.mrb[6].mxu1 %v3726_v55  ;;  %v3288_v55 = vrot.slane %v8449_v29, 2 }
 0x306   : > { %5465 = vmatprep.mubr.msk.f32.mxu1 %vm230_vm0, %v3655_v10  ;;  %5742 = vmatpush1.bf16.msra.mxu1 %v5741_v21  ;;  %v3556_v61 = vpop.permute.xlu0 %3555  ;;  %v8475_v21 = vld [vmem:[#allocation3 + $0x178] sm:$0x3]  ;;  %v3659_v10 = vrot.slane %v8008_v19, 2  ;;  %v8532_v58 = vsel %vm722_vm4, %v8489_v39, %v3308_v24  ;;  %v3361_v24 = vld [vmem:[%s9606_s2 + $0x70] sm:$0xff] }
 0x307   : > { %5743 = vmatprep.subr.bf16.mxu1 %v9808_v48  ;;  %v3558_v60 = vpop.permute.xlu1 %3557  ;;  %v3727_v0 = vsel %vm230_vm0, %v7974_v35, %v3556_v61  ;;  %v8501_v35 = vsel %vm722_vm4, %v8464_v45, %v3288_v55  ;;  %v3303_v61 = vrot.slane %v8461_v59, 2  ;;  %v8521_v55 = vsel %vm722_vm4, %v8478_v46, %v3298_v52 }
 0x308   : > { %3147 = vrot.lane.b32.xlu0 %v8446_v53, %s6216_s23  ;;  %v3728_v19 = vsel %vm230_vm0, %v7978_v49, %v3558_v60  ;;  %9907 = vst [vmem:[#allocation40_spill] sm:$0xff] %v8521_v55  ;;  %v2980_v49 = vld [vmem:[#allocation3 + $0x88] sm:$0x3]  ;;  %v3660_v52 = vsel %vm722_vm4, %v3658_v22, %v3659_v10 }
 0x309   : > { %3149 = vrot.lane.b32.xlu1 %v3073_v23, %s6216_s23  ;;  %3929 = vmatmul.mubr.f32.gmra.mrb[8].mxu1 %v3727_v0  ;;  %v3293_v23 = vrot.slane %v8451_v47, 2  ;;  %v3313_v0 = vrot.slane %v8475_v21, 2  ;;  %v8528_v60 = vsel %vm722_vm4, %v8481_v43, %v3303_v61  ;;  %v3083_v61 = vsel %vm545_vm3, %v8016_v54, %v3082_v25  ;;  %v3362_v22 = vld [vmem:[%s9606_s2 + $0x78] sm:$0xff]  ;;  %v2983_v54 = vld [vmem:[#allocation3 + $0xa0] sm:$0x3] }
 0x30a   : > { %5466 = vmatprep.mubr.msk.f32.mxu1 %vm230_vm0, %v3657_v2  ;;  %5745 = vmatpush1.bf16.msra.mxu1 %v5744_v12  ;;  %v3360_v12 = vld [vmem:[%s9606_s2 + $0x68] sm:$0xff]  ;;  %9908 = vst [vmem:[#allocation41_spill] sm:$0xff] %v8528_v60  ;;  %v3087_v60 = vrot.slane %v2980_v49, 1  ;;  %v5753_v25 = vpack.c.bf16 %v3362_v22, %v3361_v24  ;;  %v3366_v24 = vld [vmem:[%s9606_s2 + $0x98] sm:$0xff] }
 0x30b   : > { %5746 = vmatprep.subr.bf16.mxu1 %v9808_v48  ;;  %v8517_v2 = vsel %vm722_vm4, %v8467_v28, %v3293_v23  ;;  %v8536_v23 = vsel %vm722_vm4, %v8492_v31, %v3313_v0 }
 0x30c   : > { %3151 = vrot.lane.b32.xlu0 %v7997_v44, %s6216_s23  ;;  %v5750_v44 = vpack.c.bf16 %v3360_v12, %v3359_v16  ;;  %v3088_v16 = vsel %vm545_vm3, %v8046_v57, %v3087_v60  ;;  %v3663_v12 = vrot.slane %v8034_v32, 2  ;;  %v3666_v60 = vrot.slane %v8040_v14, 2 }
 0x30d   : > { %3153 = vrot.lane.b32.xlu1 %v3078_v41, %s6216_s23  ;;  %3934 = vmatmul.mubr.f32.gmra.mrb[10].mxu1 %v3728_v19  ;;  %v3661_v41 = vrot.slane %v8010_v42, 2  ;;  %v3664_v19 = vrot.slane %v8038_v8, 2  ;;  %v3364_v8 = vld [vmem:[%s9606_s2 + $0x88] sm:$0xff] }
 0x30e   : > { %5467 = vmatprep.mubr.msk.f32.mxu1 %vm230_vm0, %v3660_v52  ;;  %5748 = vmatpush1.bf16.msra.mxu1 %v5747_v50  ;;  %v3560_v55 = vpop.permute.xlu0 %3559 }
 0x30f   : > { %5749 = vmatprep.subr.bf16.mxu1 %v9808_v48  ;;  %v3729_v42 = vsel %vm230_vm0, %v8004_v5, %v3560_v55  ;;  %v3562_v50 = vpop.permute.xlu1 %3561  ;;  %v3662_v0 = vsel %vm722_vm4, %v3659_v10, %v3661_v41  ;;  %v3363_v5 = vld [vmem:[%s9606_s2 + $0x80] sm:$0xff]  ;;  %v8571_v10 = vld [vmem:[#allocation3 + $0x68] sm:$0xff]  ;;  %v2986_v55 = vld [vmem:[#allocation3 + $0xb8] sm:$0x3]  ;;  %v3665_v49 = vsel %vm722_vm4, %v3663_v12, %v3664_v19 }
 0x310   : > { %3155 = vrot.lane.b32.xlu0 %v8027_v20, %s6216_s23  ;;  %v3092_v20 = vrot.slane %v2983_v54, 1  ;;  %v3730_v57 = vsel %vm230_vm0, %v8571_v10, %v3562_v50  ;;  %v5756_v52 = vpack.c.bf16 %v3364_v8, %v3363_v5  ;;  %v3669_v54 = vrot.slane %v8068_v51, 2  ;;  %v3368_v51 = vld [vmem:[%s9606_s2 + $0xa8] sm:$0xff] }
 0x311   : > { %3157 = vrot.lane.b32.xlu1 %v3083_v61, %s6216_s23  ;;  %3939 = vmatmul.mubr.f32.gmra.mrb[12].mxu1 %v3729_v42  ;;  %v3365_v61 = vld [vmem:[%s9606_s2 + $0x90] sm:$0xff]  ;;  %v3667_v42 = vsel %vm722_vm4, %v3664_v19, %v3666_v60 }
 0x312   : > { %5468 = vmatprep.mubr.msk.f32.mxu1 %vm230_vm0, %v3662_v0  ;;  %5751 = vmatpush1.bf16.msra.mxu1 %v5750_v44  ;;  %v3093_v44 = vsel %vm545_vm3, %v8076_v11, %v3092_v20  ;;  %v8592_v11 = vld [vmem:[#allocation3 + $0xd0] sm:$0x3]  ;;  %v5759_v50 = vpack.c.bf16 %v3366_v24, %v3365_v61  ;;  %v3671_v20 = vrot.slane %v8070_v36, 2  ;;  %v3370_v36 = vld [vmem:[%s9606_s2 + $0xb8] sm:$0xff]  ;;  %v3676_v24 = vrot.slane %v8100_v27, 2 }
 0x313   : > { %5752 = vmatprep.subr.bf16.mxu1 %v9808_v48 }
 0x314   : > { %3159 = vrot.lane.b32.xlu0 %v8057_v33, %s6216_s23  ;;  %v3097_v33 = vrot.slane %v2986_v55, 1  ;;  %v3369_v55 = vld [vmem:[%s9606_s2 + $0xb0] sm:$0xff]  ;;  %v3672_v60 = vsel %vm722_vm4, %v3669_v54, %v3671_v20 }
 0x315   : > { %3161 = vrot.lane.b32.xlu1 %v3088_v16, %s6216_s23  ;;  %3944 = vmatmul.mubr.f32.gmra.mrb[14].mxu1 %v3730_v57  ;;  %v8615_v16 = vld [vmem:[#allocation3 + $0xe8] sm:$0x3] }
 0x316   : > { %5469 = vmatprep.mubr.msk.f32.mxu1 %vm230_vm0, %v3665_v49  ;;  %5754 = vmatpush1.bf16.msra.mxu1 %v5753_v25  ;;  %v3564_v41 = vpop.permute.xlu0 %3563  ;;  %v3098_v0 = vsel %vm545_vm3, %v8106_v63, %v3097_v33  ;;  %v3102_v25 = vrot.slane %v8592_v11, 1  ;;  %v8611_v63 = vld [vmem:[#allocation3 + $0x80] sm:$0xff]  ;;  %v3107_v57 = vrot.slane %v8615_v16, 1  ;;  %v3673_v33 = vrot.slane %v8094_v1, 2 }
 0x317   : > { %5755 = vmatprep.subr.bf16.mxu1 %v9808_v48  ;;  %v3731_v14 = vsel %vm230_vm0, %v8034_v32, %v3564_v41  ;;  %v3566_v22 = vpop.permute.xlu1 %3565  ;;  %v3367_v32 = vld [vmem:[%s9606_s2 + $0xa0] sm:$0xff]  ;;  %v5765_v41 = vpack.c.bf16 %v3370_v36, %v3369_v55 }
 0x318   : > { %3163 = vrot.lane.b32.xlu0 %v8087_v4, %s6216_s23  ;;  %v3668_v4 = vrot.slane %v8064_v37, 2  ;;  %v3732_v19 = vsel %vm230_vm0, %v8611_v63, %v3566_v22  ;;  %v5762_v5 = vpack.c.bf16 %v3368_v51, %v3367_v32  ;;  %v9913_v51 = vld [vmem:[#allocation22_spill] sm:$0xff]  ;;  %v9916_v55 = vld [vmem:[#allocation24_spill] sm:$0xff] }
 0x319   : > { %3165 = vrot.lane.b32.xlu1 %v3093_v44, %s6216_s23  ;;  %3949 = vmatmul.mubr.f32.gmra.mrb[16].mxu1 %v3731_v14  ;;  %v3108_v44 = vsel %vm545_vm3, %v8166_v9, %v3107_v57  ;;  %v3117_v14 = vrot.slane %v8451_v47, 1  ;;  %v8701_v36 = vrot.slane %v9916_v55, 2 }
 0x31a   : > { %5470 = vmatprep.mubr.msk.f32.mxu1 %vm230_vm0, %v3667_v42  ;;  %5757 = vmatpush1.bf16.msra.mxu1 %v5756_v52  ;;  %v3670_v12 = vsel %vm722_vm4, %v3668_v4, %v3669_v54  ;;  %v8637_v52 = vrot.slane %v8098_v56, 2  ;;  %v9909_v54 = vld [vmem:[#allocation21_spill] sm:$0xff] }
 0x31b   : > { %5758 = vmatprep.subr.bf16.mxu1 %v9808_v48 }
 0x31c   : > { %3167 = vrot.lane.b32.xlu0 %v8117_v34, %s6216_s23  ;;  %v3103_v34 = vsel %vm545_vm3, %v8136_v40, %v3102_v25  ;;  %v8654_v9 = vsel %vm722_vm4, %v3673_v33, %v8637_v52  ;;  %v3677_v42 = vsel %vm722_vm4, %v8637_v52, %v3676_v24 }
 0x31d   : > { %3169 = vrot.lane.b32.xlu1 %v3098_v0, %s6216_s23  ;;  %3954 = vmatmul.mubr.f32.gmra.mrb[18].mxu1 %v3732_v19  ;;  %v9911_v0 = vld [vmem:[#allocation20_spill] sm:$0xff]  ;;  %v3681_v19 = vrot.slane %v9913_v51, 2  ;;  %v9925_v51 = vld [vmem:[#allocation17_spill] sm:$0xff] }
 0x31e   : > { %5471 = vmatprep.mubr.msk.f32.mxu1 %vm230_vm0, %v3670_v12  ;;  %5760 = vmatpush1.bf16.msra.mxu1 %v5759_v50  ;;  %v3568_v8 = vpop.permute.xlu0 %3567  ;;  %v8671_v50 = vrot.slane %v9909_v54, 2  ;;  %v3678_v4 = vrot.slane %v9911_v0, 2 }
 0x31f   : > { %5761 = vmatprep.subr.bf16.mxu1 %v9808_v48  ;;  %v3733_v40 = vsel %vm230_vm0, %v8064_v37, %v3568_v8  ;;  %v3570_v49 = vpop.permute.xlu1 %3569  ;;  %v8648_v37 = vld [vmem:[#allocation3 + $0x98] sm:$0xff] }
 0x320   : > { %3171 = vrot.lane.b32.xlu0 %v8147_v30, %s6216_s23  ;;  %v3112_v30 = vrot.slane %v8449_v29, 1  ;;  %v3734_v61 = vsel %vm230_vm0, %v8648_v37, %v3570_v49  ;;  %v8685_v32 = vsel %vm722_vm4, %v3678_v4, %v8671_v50  ;;  %v3682_v57 = vsel %vm722_vm4, %v8671_v50, %v3681_v19  ;;  %v9918_v49 = vld [vmem:[#allocation23_spill] sm:$0xff] }
 0x321   : > { %3173 = vrot.lane.b32.xlu1 %v3103_v34, %s6216_s23  ;;  %3959 = vmatmul.mubr.f32.gmra.mrb[20].mxu1 %v3733_v40  ;;  %v9917_v40 = vld [vmem:[#allocation6_spill] sm:$0xff] }
 0x322   : > { %5472 = vmatprep.mubr.msk.f32.mxu1 %vm230_vm0, %v3672_v60  ;;  %5763 = vmatpush1.bf16.msra.mxu1 %v5762_v5  ;;  %v3127_v5 = vrot.slane %v8461_v59, 1  ;;  %v3683_v60 = vrot.slane %v9918_v49, 2 }
 0x323   : > { %5764 = vmatprep.subr.bf16.mxu1 %v9808_v48 }
 0x324   : > { %3175 = vrot.lane.b32.xlu0 %v8177_v7, %s6216_s23  ;;  %v3113_v7 = vsel %vm545_vm3, %v8196_v62, %v3112_v30  ;;  %v9910_v62 = vld [vmem:[#allocation30_spill] sm:$0xff]  ;;  %v3128_v59 = vsel %vm545_vm3, %v9917_v40, %v3127_v5  ;;  %v8715_v30 = vsel %vm722_vm4, %v3683_v60, %v8701_v36  ;;  %v8764_v40 = vld [vmem:[#allocation3 + $0x68] sm:$0xff] }
 0x325   : > { %3177 = vrot.lane.b32.xlu1 %v3108_v44, %s6216_s23  ;;  %3964 = vmatmul.mubr.f32.gmra.mrb[22].mxu1 %v3734_v61  ;;  %v3118_v47 = vsel %vm545_vm3, %v9910_v62, %v3117_v14  ;;  %v9919_v44 = vld [vmem:[#allocation7_spill] sm:$0xff]  ;;  %v9920_v61 = vld [vmem:[#allocation25_spill] sm:$0xff]  ;;  %v3137_v14 = vrot.slane %v8475_v21, 1 }
 0x326   : > { %5473 = vmatprep.mubr.msk.f32.mxu1 %vm230_vm0, %v8654_v9  ;;  %5766 = vmatpush1.bf16.msra.mxu1 %v5765_v41  ;;  %v3572_v29 = vpop.permute.xlu0 %3571  ;;  %v3132_v41 = vrot.slane %v8473_v3, 1  ;;  %v3686_v24 = vrot.slane %v9920_v61, 2  ;;  %v9921_v3 = vld [vmem:[#allocation10_spill] sm:$0xff] }
 0x327   : > { %5767 = vmatprep.subr.bf16.mxu1 %v9808_v48  ;;  %v3735_v27 = vsel %vm230_vm0, %v8094_v1, %v3572_v29  ;;  %v3574_v22 = vpop.permute.xlu1 %3573  ;;  %v9912_v1 = vld [vmem:[#allocation31_spill] sm:$0xff] }
 0x328   : > { %3179 = vrot.lane.b32.xlu0 %v8207_v18, %s6216_s23  ;;  %v3122_v18 = vrot.slane %v8459_v26, 1  ;;  %v3736_v25 = vsel %vm230_vm0, %v8098_v56, %v3574_v22  ;;  %v9914_v26 = vld [vmem:[#allocation34_spill] sm:$0xff]  ;;  %v9915_v56 = vld [vmem:[#allocation35_spill] sm:$0xff]  ;;  %v3687_v62 = vsel %vm722_vm4, %v8701_v36, %v3686_v24  ;;  %v4466_v24 = vrot.slane %v8764_v40, 1 }
 0x329   : > { %3181 = vrot.lane.b32.xlu1 %v3113_v7, %s6216_s23  ;;  %3969 = vmatmul.mubr.f32.gmra.mrb[24].mxu1 %v3735_v27  ;;  %v3133_v7 = vsel %vm545_vm3, %v9921_v3, %v3132_v41  ;;  %v9922_v27 = vld [vmem:[#allocation12_spill] sm:$0xff]  ;;  %v8783_v3 = vld [vmem:[#allocation3 + $0x80] sm:$0xff] }
 0x32a   : > { %5474 = vmatprep.mubr.msk.f32.mxu1 %vm230_vm0, %v3677_v42  ;;  %v3123_v20 = vsel %vm545_vm3, %v9914_v26, %v3122_v18  ;;  %v8728_v42 = vld [vmem:[#allocation3 + $0x40] sm:$0x3]  ;;  %v9926_v26 = vld [vmem:[#allocation27_spill] sm:$0xff] }
 0x32b   : > { %v4458_v18 = vrot.slane %v8728_v42, 1 }
 0x32c   : > { %3183 = vrot.lane.b32.xlu0 %v9912_v1, %s6216_s23  ;;  %v8737_v1 = vld [vmem:[#allocation3 + $0x50] sm:$0xff] }
 0x32d   : > { %3185 = vrot.lane.b32.xlu1 %v3118_v47, %s6216_s23  ;;  %3974 = vmatmul.mubr.f32.gmra.mrb[26].mxu1 %v3736_v25  ;;  %v9923_v47 = vld [vmem:[#allocation16_spill] sm:$0xff]  ;;  %v8739_v25 = vld [vmem:[#allocation3 + $0x58] sm:$0x3]  ;;  %v4461_v5 = vrot.slane %v8737_v1, 1 }
 0x32e   : > { %5475 = vmatprep.mubr.msk.f32.mxu1 %vm230_vm0, %v8685_v32  ;;  %v3576_v12 = vpop.permute.xlu0 %3575  ;;  %v3138_v21 = vsel %vm545_vm3, %v9923_v47, %v3137_v14 }
 0x32f   : > { %v3737_v8 = vsel %vm230_vm0, %v9911_v0, %v3576_v12  ;;  %v3578_v34 = vpop.permute.xlu1 %3577  ;;  %v9924_v0 = vld [vmem:[#allocation26_spill] sm:$0xff] }
 0x330   : > { %3187 = vrot.lane.b32.xlu0 %v9915_v56, %s6216_s23  ;;  %v3738_v33 = vsel %vm230_vm0, %v9909_v54, %v3578_v34  ;;  %v3688_v4 = vrot.slane %v9924_v0, 2  ;;  %v4463_v56 = vrot.slane %v8739_v25, 1 }
 0x331   : > { %3189 = vrot.lane.b32.xlu1 %v3123_v20, %s6216_s23  ;;  %3979 = vmatmul.mubr.f32.gmra.mrb[28].mxu1 %v3737_v8  ;;  %v3691_v20 = vrot.slane %v9926_v26, 2  ;;  %v8755_v8 = vld [vmem:[#allocation3 + $0x48] sm:$0xff] }
 0x332   : > { %5476 = vmatprep.mubr.msk.f32.mxu1 %vm230_vm0, %v3682_v57  ;;  %v8748_v12 = vsel %vm722_vm4, %v3688_v4, %v8464_v45  ;;  %v4459_v57 = vsel %vm545_vm3, %v8422_v13, %v4458_v18  ;;  %v4460_v41 = vrot.slane %v8755_v8, 1  ;;  %v4464_v13 = vsel %vm545_vm3, %v4461_v5, %v4463_v56  ;;  %v8801_v18 = vld [vmem:[#allocation3 + $0x98] sm:$0xff] }
 0x333   : > { %v3692_v60 = vsel %vm722_vm4, %v8464_v45, %v3691_v20  ;;  %v4476_v56 = vrot.slane %v8801_v18, 1 }
 0x334   : > { %3191 = vrot.lane.b32.xlu0 %v9919_v44, %s6216_s23  ;;  %v8773_v44 = vld [vmem:[#allocation3 + $0x60] sm:$0xff] }
 0x335   : > { %3193 = vrot.lane.b32.xlu1 %v3128_v59, %s6216_s23  ;;  %3984 = vmatmul.mubr.f32.gmra.mrb[30].mxu1 %v3738_v33  ;;  %v8766_v59 = vld [vmem:[#allocation3 + $0x70] sm:$0x3] }
 0x336   : > { %5477 = vmatprep.mubr.msk.f32.mxu1 %vm230_vm0, %v8715_v30  ;;  %v3580_v29 = vpop.permute.xlu0 %3579  ;;  %v9927_v33 = vld [vmem:[#allocation28_spill] sm:$0xff] }
 0x337   : > { %v3739_v22 = vsel %vm230_vm0, %v9918_v49, %v3580_v29  ;;  %v3582_v54 = vpop.permute.xlu1 %3581  ;;  %v3693_v61 = vrot.slane %v9927_v33, 2  ;;  %v4468_v29 = vrot.slane %v8766_v59, 1 }
 0x338   : > { %3195 = vrot.lane.b32.xlu0 %v9922_v27, %s6216_s23  ;;  %v3740_v19 = vsel %vm230_vm0, %v9916_v55, %v3582_v54  ;;  %v4465_v27 = vrot.slane %v8773_v44, 1 }
 0x339   : > { %3197 = vrot.lane.b32.xlu1 %v3133_v7, %s6216_s23  ;;  %3989 = vmatmul.mubr.f32.gmra.mrb[32].mxu1 %v3739_v22  ;;  %v8785_v7 = vld [vmem:[#allocation3 + $0x88] sm:$0x3]  ;;  %v8789_v14 = vsel %vm722_vm4, %v3693_v61, %v8467_v28  ;;  %v9928_v22 = vld [vmem:[#allocation29_spill] sm:$0xff] }
 0x33a   : > { %5478 = vmatprep.mubr.msk.f32.mxu1 %vm230_vm0, %v3687_v62  ;;  %v3696_v54 = vrot.slane %v9928_v22, 2  ;;  %v8795_v62 = vld [vmem:[#allocation3 + $0x78] sm:$0xff]  ;;  %v4473_v4 = vrot.slane %v8785_v7, 1  ;;  %v8838_v22 = vld [vmem:[#allocation3 + $0xa8] sm:$0xff] }
 0x33c   : > { %3199 = vrot.lane.b32.xlu0 %v9925_v51, %s6216_s23  ;;  %v3697_v20 = vsel %vm722_vm4, %v8467_v28, %v3696_v54 }
 0x33d   : > { %3201 = vrot.lane.b32.xlu1 %v3138_v21, %s6216_s23  ;;  %3994 = vmatmul.mubr.f32.gmra.mrb[34].mxu1 %v3740_v19  ;;  %v4467_v21 = vsel %vm545_vm3, %v4465_v27, %v4466_v24  ;;  %v8807_v19 = vld [vmem:[#allocation3 + $0xa0] sm:$0x3] }
 0x33e   : > { %5479 = vmatprep.mubr.msk.f32.mxu1 %vm230_vm0, %v8748_v12  ;;  %v3584_v34 = vpop.permute.xlu0 %3583 }
 0x33f   : > { %v3741_v55 = vsel %vm230_vm0, %v9924_v0, %v3584_v34  ;;  %v3586_v49 = vpop.permute.xlu1 %3585  ;;  %v4471_v0 = vrot.slane %v8783_v3, 1  ;;  %v8814_v34 = vld [vmem:[#allocation3 + $0x90] sm:$0xff] }
 0x340   : > { %4535 = vrot.lane.b32.xlu0 %v8446_v53, %s6216_s23  ;;  %v4462_v53 = vsel %vm545_vm3, %v4460_v41, %v4461_v5  ;;  %v3742_v45 = vsel %vm230_vm0, %v8188_v15, %v3586_v49  ;;  %v4469_v15 = vsel %vm545_vm3, %v4466_v24, %v4468_v29  ;;  %v4470_v5 = vrot.slane %v8795_v62, 1  ;;  %v9929_v49 = vld [vmem:[#allocation32_spill] sm:$0xff]  ;;  %v9930_v24 = vld [vmem:[#allocation33_spill] sm:$0xff] }
 0x341   : > { %4537 = vrot.lane.b32.xlu1 %v4459_v57, %s6216_s23  ;;  %3999 = vmatmul.mubr.f32.gmra.mrb[36].mxu1 %v3741_v55  ;;  %v4474_v57 = vsel %vm545_vm3, %v4471_v0, %v4473_v4  ;;  %v4478_v41 = vrot.slane %v8807_v19, 1  ;;  %v4475_v61 = vrot.slane %v8814_v34, 1  ;;  %v3701_v29 = vrot.slane %v9930_v24, 2 }
 0x342   : > { %5480 = vmatprep.mubr.msk.f32.mxu1 %vm230_vm0, %v3692_v60  ;;  %v4472_v55 = vsel %vm545_vm3, %v4470_v5, %v4471_v0  ;;  %v3698_v60 = vrot.slane %v9929_v49, 2  ;;  %v8848_v0 = vld [vmem:[#allocation3 + $0xd0] sm:$0x3]  ;;  %v8855_v5 = vld [vmem:[#allocation3 + $0xc0] sm:$0xff] }
 0x343   : > { %v4485_v24 = vrot.slane %v8855_v5, 1 }
 0x344   : > { %4539 = vrot.lane.b32.xlu0 %v4462_v53, %s6216_s23  ;;  %v8822_v53 = vld [vmem:[#allocation3 + $0xb8] sm:$0x3] }
 0x345   : > { %4541 = vrot.lane.b32.xlu1 %v4464_v13, %s6216_s23  ;;  %4004 = vmatmul.mubr.f32.gmra.mrb[38].mxu1 %v3742_v45  ;;  %v8820_v13 = vld [vmem:[#allocation3 + $0xb0] sm:$0xff]  ;;  %v4483_v27 = vrot.slane %v8822_v53, 1 }
 0x346   : > { %5481 = vmatprep.mubr.msk.f32.mxu1 %vm230_vm0, %v8789_v14  ;;  %v3588_v47 = vpop.permute.xlu0 %3587  ;;  %v4481_v45 = vrot.slane %v8820_v13, 1 }
 0x347   : > { %v3743_v51 = vsel %vm230_vm0, %v9927_v33, %v3588_v47  ;;  %v3590_v26 = vpop.permute.xlu1 %3589  ;;  %v8830_v33 = vsel %vm722_vm4, %v3698_v60, %v8478_v46  ;;  %v4477_v47 = vsel %vm545_vm3, %v4475_v61, %v4476_v56  ;;  %v4488_v60 = vrot.slane %v8848_v0, 1 }
 0x348   : > { %4543 = vrot.lane.b32.xlu0 %v4467_v21, %s6216_s23  ;;  %v3744_v28 = vsel %vm230_vm0, %v8218_v17, %v3590_v26  ;;  %v4479_v17 = vsel %vm545_vm3, %v4476_v56, %v4478_v41  ;;  %v8846_v21 = vld [vmem:[#allocation3 + $0xc8] sm:$0xff]  ;;  %v4480_v26 = vrot.slane %v8838_v22, 1  ;;  %v8865_v41 = vld [vmem:[#allocation3 + $0xe0] sm:$0xff] }
 0x349   : > { %4545 = vrot.lane.b32.xlu1 %v4469_v15, %s6216_s23  ;;  %4009 = vmatmul.mubr.f32.gmra.mrb[40].mxu1 %v3743_v51  ;;  %v3702_v51 = vsel %vm722_vm4, %v8478_v46, %v3701_v29  ;;  %v9932_v29 = vld [vmem:[#allocation5_spill] sm:$0xff] }
 0x34a   : > { %5482 = vmatprep.mubr.msk.f32.mxu1 %vm230_vm0, %v3697_v20  ;;  %v4484_v20 = vsel %vm545_vm3, %v4481_v45, %v4483_v27  ;;  %v4482_v56 = vsel %vm545_vm3, %v4480_v26, %v4481_v45  ;;  %v3706_v45 = vrot.slane %v9932_v29, 2  ;;  %v8877_v27 = vld [vmem:[#allocation3 + $0xd8] sm:$0xff]  ;;  %v8889_v26 = vld [vmem:[#allocation3 + $0x100] sm:$0x3] }
 0x34b   : > { %9934 = vst [vmem:[#allocation30_spill] sm:$0xff] %v8889_v26 }
 0x34c   : > { %4547 = vrot.lane.b32.xlu0 %v4472_v55, %s6216_s23 }
 0x34d   : > { %4549 = vrot.lane.b32.xlu1 %v4474_v57, %s6216_s23  ;;  %4014 = vmatmul.mubr.f32.gmra.mrb[42].mxu1 %v3744_v28  ;;  %v9931_v57 = vld [vmem:[#allocation11_spill] sm:$0xff] }
 0x34e   : > { %5483 = vmatprep.mubr.msk.f32.mxu1 %vm230_vm0, %v8830_v33  ;;  %v3592_v54 = vpop.permute.xlu0 %3591  ;;  %v3703_v55 = vrot.slane %v9931_v57, 2  ;;  %v8867_v28 = vld [vmem:[#allocation3 + $0xe8] sm:$0x3] }
 0x34f   : > { %v3745_v15 = vsel %vm230_vm0, %v9929_v49, %v3592_v54  ;;  %v3594_v4 = vpop.permute.xlu1 %3593  ;;  %v4486_v49 = vrot.slane %v8846_v21, 1 }
 0x350   : > { %4551 = vrot.lane.b32.xlu0 %v4477_v47, %s6216_s23  ;;  %v3746_v46 = vsel %vm230_vm0, %v8248_v6, %v3594_v4  ;;  %v8871_v61 = vsel %vm722_vm4, %v3703_v55, %v8481_v43  ;;  %v4491_v47 = vrot.slane %v8865_v41, 1  ;;  %v4490_v55 = vrot.slane %v8877_v27, 1 }
 0x351   : > { %4553 = vrot.lane.b32.xlu1 %v4479_v17, %s6216_s23  ;;  %4019 = vmatmul.mubr.f32.gmra.mrb[44].mxu1 %v3745_v15  ;;  %v4489_v6 = vsel %vm545_vm3, %v4486_v49, %v4488_v60  ;;  %v4487_v17 = vsel %vm545_vm3, %v4485_v24, %v4486_v49  ;;  %v4493_v15 = vrot.slane %v8867_v28, 1  ;;  %v9935_v49 = vld [vmem:[#allocation8_spill] sm:$0xff] }
 0x352   : > { %5484 = vmatprep.mubr.msk.f32.mxu1 %vm230_vm0, %v3702_v51  ;;  %v8887_v51 = vld [vmem:[#allocation3 + $0xf8] sm:$0xff]  ;;  %v3708_v60 = vrot.slane %v9935_v49, 2 }
 0x353   : > { %9933 = vst [vmem:[#allocation21_spill] sm:$0xff] %v8887_v51  ;;  %v4494_v24 = vsel %vm545_vm3, %v4491_v47, %v4493_v15  ;;  %v4496_v29 = vrot.slane %v8887_v51, 1  ;;  %v8985_v51 = vld [vmem:[#allocation3 + $0x170] sm:$0xff] }
 0x354   : > { %4555 = vrot.lane.b32.xlu0 %v4482_v56, %s6216_s23  ;;  %v3707_v56 = vsel %vm722_vm4, %v8481_v43, %v3706_v45  ;;  %v9939_v43 = vld [vmem:[#allocation4_spill] sm:$0xff]  ;;  %v8912_v15 = vsel %vm722_vm4, %v3708_v60, %v8489_v39  ;;  %9955 = vst [vmem:[#allocation26_spill] sm:$0xff] %v8985_v51 }
 0x355   : > { %4557 = vrot.lane.b32.xlu1 %v4484_v20, %s6216_s23  ;;  %4024 = vmatmul.mubr.f32.gmra.mrb[46].mxu1 %v3746_v46  ;;  %v8896_v46 = vld [vmem:[#allocation3 + $0xf0] sm:$0xff] }
 0x356   : > { %5485 = vmatprep.mubr.msk.f32.mxu1 %vm230_vm0, %v8871_v61  ;;  %v3596_v54 = vpop.permute.xlu0 %3595  ;;  %9936 = vst [vmem:[#allocation20_spill] sm:$0xff] %v8896_v46 }
 0x357   : > { %v3747_v4 = vsel %vm230_vm0, %v9931_v57, %v3596_v54  ;;  %v3598_v20 = vpop.permute.xlu1 %3597  ;;  %v4492_v57 = vsel %vm545_vm3, %v4490_v55, %v4491_v47  ;;  %v4498_v54 = vrot.slane %v8889_v26, 1  ;;  %v4495_v47 = vrot.slane %v8896_v46, 1  ;;  %v8920_v26 = vld [vmem:[#allocation3 + $0x108] sm:$0xff] }
 0x358   : > { %4559 = vrot.lane.b32.xlu0 %v4487_v17, %s6216_s23  ;;  %v8904_v17 = vld [vmem:[#allocation3 + $0x118] sm:$0x3]  ;;  %v3748_v45 = vsel %vm230_vm0, %v9939_v43, %v3598_v20  ;;  %9941 = vst [vmem:[#allocation34_spill] sm:$0xff] %v8920_v26 }
 0x359   : > { %4561 = vrot.lane.b32.xlu1 %v4489_v6, %s6216_s23  ;;  %4029 = vmatmul.mubr.f32.gmra.mrb[48].mxu1 %v3747_v4  ;;  %v8902_v6 = vld [vmem:[#allocation3 + $0x110] sm:$0xff]  ;;  %9938 = vst [vmem:[#allocation22_spill] sm:$0xff] %v8904_v17  ;;  %v9940_v4 = vld [vmem:[#allocation9_spill] sm:$0xff]  ;;  %v4499_v20 = vsel %vm545_vm3, %v4496_v29, %v4498_v54  ;;  %v4497_v43 = vsel %vm545_vm3, %v4495_v47, %v4496_v29  ;;  %v4500_v54 = vrot.slane %v8920_v26, 1 }
 0x35a   : > { %5486 = vmatprep.mubr.msk.f32.mxu1 %vm230_vm0, %v3707_v56  ;;  %9937 = vst [vmem:[#allocation31_spill] sm:$0xff] %v8902_v6  ;;  %v3711_v56 = vrot.slane %v9940_v4, 2  ;;  %v8930_v4 = vld [vmem:[#allocation3 + $0x130] sm:$0x3] }
 0x35b   : > { %9943 = vst [vmem:[#allocation24_spill] sm:$0xff] %v8930_v4  ;;  %v4508_v46 = vrot.slane %v8930_v4, 1  ;;  %v8960_v4 = vld [vmem:[#allocation3 + $0x138] sm:$0xff] }
 0x35c   : > { %4563 = vrot.lane.b32.xlu0 %v4492_v57, %s6216_s23  ;;  %v4503_v57 = vrot.slane %v8904_v17, 1  ;;  %v3712_v17 = vsel %vm722_vm4, %v8489_v39, %v3711_v56  ;;  %9949 = vst [vmem:[#allocation25_spill] sm:$0xff] %v8960_v4 }
 0x35d   : > { %4565 = vrot.lane.b32.xlu1 %v4494_v24, %s6216_s23  ;;  %4034 = vmatmul.mubr.f32.gmra.mrb[50].mxu1 %v3748_v45  ;;  %v4501_v24 = vrot.slane %v8902_v6, 1  ;;  %v8928_v45 = vld [vmem:[#allocation3 + $0x128] sm:$0xff] }
 0x35e   : > { %5487 = vmatprep.mubr.msk.f32.mxu1 %vm230_vm0, %v8912_v15  ;;  %v3600_v55 = vpop.permute.xlu0 %3599  ;;  %9942 = vst [vmem:[#allocation35_spill] sm:$0xff] %v8928_v45 }
 0x35f   : > { %v3749_v60 = vsel %vm230_vm0, %v9935_v49, %v3600_v55  ;;  %v3602_v6 = vpop.permute.xlu1 %3601  ;;  %v4504_v29 = vsel %vm545_vm3, %v4501_v24, %v4503_v57  ;;  %v8937_v49 = vld [vmem:[#allocation3 + $0x120] sm:$0xff]  ;;  %v4502_v47 = vsel %vm545_vm3, %v4500_v54, %v4501_v24  ;;  %v9945_v55 = vld [vmem:[#allocation13_spill] sm:$0xff]  ;;  %v9948_v57 = vld [vmem:[#allocation15_spill] sm:$0xff] }
 0x360   : > { %4567 = vrot.lane.b32.xlu0 %v4497_v43, %s6216_s23  ;;  %9944 = vst [vmem:[#allocation6_spill] sm:$0xff] %v8937_v49  ;;  %v4506_v43 = vrot.slane %v8928_v45, 1  ;;  %v3750_v39 = vsel %vm230_vm0, %v8308_v38, %v3602_v6  ;;  %v4505_v24 = vrot.slane %v8937_v49, 1  ;;  %v3716_v54 = vrot.slane %v9948_v57, 2  ;;  %v8967_v49 = vld [vmem:[#allocation3 + $0x158] sm:$0xff] }
 0x361   : > { %4569 = vrot.lane.b32.xlu1 %v4499_v20, %s6216_s23  ;;  %4039 = vmatmul.mubr.f32.gmra.mrb[52].mxu1 %v3749_v60  ;;  %v3713_v20 = vrot.slane %v9945_v55, 2  ;;  %v8943_v60 = vld [vmem:[#allocation3 + $0x140] sm:$0xff]  ;;  %9950 = vst [vmem:[#allocation10_spill] sm:$0xff] %v8967_v49 }
 0x362   : > { %5488 = vmatprep.mubr.msk.f32.mxu1 %vm230_vm0, %v3712_v17  ;;  %9946 = vst [vmem:[#allocation23_spill] sm:$0xff] %v8943_v60  ;;  %v8949_v17 = vld [vmem:[#allocation3 + $0x148] sm:$0x3]  ;;  %v4509_v38 = vsel %vm545_vm3, %v4506_v43, %v4508_v46  ;;  %v4507_v6 = vsel %vm545_vm3, %v4505_v24, %v4506_v43  ;;  %v8969_v57 = vld [vmem:[#allocation3 + $0x160] sm:$0x3]  ;;  %v3717_v46 = vsel %vm722_vm4, %v8492_v31, %v3716_v54  ;;  %v4510_v43 = vrot.slane %v8960_v4, 1 }
 0x363   : > { %9947 = vst [vmem:[#allocation7_spill] sm:$0xff] %v8949_v17  ;;  %v8953_v56 = vsel %vm722_vm4, %v3713_v20, %v8492_v31  ;;  %9951 = vst [vmem:[#allocation12_spill] sm:$0xff] %v8969_v57  ;;  %v9952_v24 = vld [vmem:[#allocation37_spill] sm:$0xff]  ;;  %v9957_v54 = vld [vmem:[#allocation14_spill] sm:$0xff] }
 0x364   : > { %4571 = vrot.lane.b32.xlu0 %v4502_v47, %s6216_s23  ;;  %v4511_v47 = vrot.slane %v8943_v60, 1  ;;  %v3719_v45 = vrot.slane %v9952_v24, 2  ;;  %v8987_v31 = vld [vmem:[#allocation3 + $0x178] sm:$0x3] }
 0x365   : > { %4573 = vrot.lane.b32.xlu1 %v4504_v29, %s6216_s23  ;;  %4044 = vmatmul.mubr.f32.gmra.mrb[54].mxu1 %v3750_v39  ;;  %v4513_v39 = vrot.slane %v8949_v17, 1  ;;  %v8980_v17 = vld [vmem:[#allocation3 + $0x150] sm:$0xff]  ;;  %9956 = vst [vmem:[#allocation17_spill] sm:$0xff] %v8987_v31 }
 0x366   : > { %5489 = vmatprep.mubr.msk.f32.mxu1 %vm230_vm0, %v8953_v56  ;;  %v3604_v29 = vpop.permute.xlu0 %3603  ;;  %9953 = vst [vmem:[#allocation16_spill] sm:$0xff] %v8980_v17 }
 0x367   : > { %v3751_v20 = vsel %vm230_vm0, %v9945_v55, %v3604_v29  ;;  %v3606_v60 = vpop.permute.xlu1 %3605  ;;  %v4516_v55 = vrot.slane %v8967_v49, 1  ;;  %v4518_v29 = vrot.slane %v8969_v57, 1  ;;  %v9958_v57 = vld [vmem:[#allocation38_spill] sm:$0xff] }
 0x368   : > { %4575 = vrot.lane.b32.xlu0 %v4507_v6, %s6216_s23  ;;  %v4512_v6 = vsel %vm545_vm3, %v4510_v43, %v4511_v47  ;;  %v8996_v43 = vld [vmem:[#allocation3 + $0x168] sm:$0xff] }
 0x369   : > { %4577 = vrot.lane.b32.xlu1 %v4509_v38, %s6216_s23  ;;  %4049 = vmatmul.mubr.f32.gmra.mrb[56].mxu1 %v3751_v20  ;;  %v4514_v38 = vsel %vm545_vm3, %v4511_v47, %v4513_v39  ;;  %v9954_v20 = vld [vmem:[#allocation36_spill] sm:$0xff]  ;;  %v4515_v39 = vrot.slane %v8980_v17, 1  ;;  %v3721_v47 = vrot.slane %v9958_v57, 2  ;;  %9959 = vst [vmem:[#allocation27_spill] sm:$0xff] %v8996_v43  ;;  %v4519_v4 = vsel %vm545_vm3, %v4516_v55, %v4518_v29  ;;  %v9961_v17 = vld [vmem:[#allocation18_spill] sm:$0xff]  ;;  %v9010_v29 = vld [vmem:[#allocation3 + $0x188] sm:$0xff] }
 0x36a   : > { %5490 = vmatprep.mubr.msk.f32.mxu1 %vm230_vm0, %v3717_v46  ;;  %v3718_v26 = vrot.slane %v9954_v20, 2  ;;  %v3752_v46 = vsel %vm230_vm0, %v9957_v54, %v3606_v60  ;;  %v9960_v54 = vld [vmem:[#allocation19_spill] sm:$0xff]  ;;  %v3236_v57 = vrot.slane %v9961_v17, 2  ;;  %9962 = vst [vmem:[#allocation28_spill] sm:$0xff] %v9010_v29 }
 0x36b   : > { %v4517_v60 = vsel %vm545_vm3, %v4515_v39, %v4516_v55  ;;  %v3722_v55 = vsel %vm722_vm4, %v3719_v45, %v3721_v47  ;;  %v4526_v39 = vrot.slane %v9010_v29, 1  ;;  %v6137_v47 = vld [vmem:[#allocation3 + $0x10] sm:$0x3] }
 0x36c   : > { %4579 = vrot.lane.b32.xlu0 %v4512_v6, %s6216_s23  ;;  %v3720_v24 = vsel %vm722_vm4, %v3718_v26, %v3719_v45  ;;  %v4523_v6 = vrot.slane %v8987_v31, 1  ;;  %v5526_v45 = vld [vmem:[%s9606_s2 + $0x188] sm:$0xff] }
 0x36d   : > { %4581 = vrot.lane.b32.xlu1 %v4514_v38, %s6216_s23  ;;  %4054 = vmatmul.mubr.f32.gmra.mrb[58].mxu1 %v3752_v46  ;;  %v4521_v38 = vrot.slane %v8985_v51, 1  ;;  %v3235_v46 = vrot.slane %v9960_v54, 2  ;;  %v9012_v51 = vld [vmem:[#allocation3 + $0x190] sm:$0x3] }
 0x36e   : > { %5491 = vmatprep.mubr.msk.f32.mxu1 %vm230_vm0, %v3720_v24  ;;  %v3608_v49 = vpop.permute.xlu0 %3607  ;;  %v4520_v24 = vrot.slane %v8996_v43, 1  ;;  %9963 = vst [vmem:[#allocation29_spill] sm:$0xff] %v9012_v51 }
 0x36f   : > { %v3753_v26 = vsel %vm230_vm0, %v9954_v20, %v3608_v49  ;;  %v3610_v31 = vpop.permute.xlu1 %3609  ;;  %v4524_v49 = vsel %vm545_vm3, %v4521_v38, %v4523_v6  ;;  %v9018_v20 = vld [vmem:[#allocation3 + $0x180] sm:$0xff]  ;;  %v3238_v6 = vrot.slane %v6137_v47, 2 }
 0x370   : > { %4583 = vrot.lane.b32.xlu0 %v4517_v60, %s6216_s23  ;;  %v4522_v17 = vsel %vm545_vm3, %v4520_v24, %v4521_v38  ;;  %9964 = vst [vmem:[#allocation32_spill] sm:$0xff] %v9018_v20  ;;  %v4528_v60 = vrot.slane %v9012_v51, 1  ;;  %v6138_v38 = vld [vmem:[#allocation3 + $0x188] sm:$0xff]  ;;  %v4525_v24 = vrot.slane %v9018_v20, 1 }
 0x371   : > { %4585 = vrot.lane.b32.xlu1 %v4519_v4, %s6216_s23  ;;  %4059 = vmatmul.mubr.f32.gmra.mrb[60].mxu1 %v3753_v26  ;;  %v3237_v4 = vsel %vm722_vm4, %v3235_v46, %v3236_v57  ;;  %v5525_v26 = vld [vmem:[%s9606_s2 + $0x180] sm:$0xff]  ;;  %v3754_v54 = vsel %vm230_vm0, %v6138_v38, %v3610_v31  ;;  %v5527_v31 = vld [vmem:[%s9606_s2 + $0x190] sm:$0xff] }
 0x372   : > { %5492 = vmatprep.mubr.msk.f32.mxu1 %vm230_vm0, %v3722_v55  ;;  %v3140_v46 = vpop.permute.xlu0 %3139  ;;  %v6139_v55 = vld [vmem:[#allocation3] sm:$0xff]  ;;  %v5768_v29 = vpack.c.bf16 %v5526_v45, %v5525_v26  ;;  %v4529_v43 = vsel %vm545_vm3, %v4526_v39, %v4528_v60  ;;  %v4527_v47 = vsel %vm545_vm3, %v4525_v24, %v4526_v39 }
 0x373   : > { %v3315_v51 = vsel %vm230_vm0, %v6139_v55, %v3140_v46  ;;  %v6140_v26 = vld [vmem:[#allocation3 + $0x20] sm:$0xff] }
 0x374   : > { %4587 = vrot.lane.b32.xlu0 %v4522_v17, %s6216_s23  ;;  %v5528_v17 = vld [vmem:[%s9606_s2 + $0x198] sm:$0xff]  ;;  %v3241_v60 = vrot.slane %v6140_v26, 2  ;;  %v9050_v38 = vld [vmem:[#allocation3 + $0x1a0] sm:$0xff] }
 0x375   : > { %4589 = vrot.lane.b32.xlu1 %v4524_v49, %s6216_s23  ;;  %4064 = vmatmul.mubr.f32.gmra.mrb[62].mxu1 %v3754_v54  ;;  %v3239_v49 = vsel %vm722_vm4, %v3236_v57, %v3238_v6  ;;  %v6141_v57 = vld [vmem:[#allocation3 + $0x8] sm:$0xff]  ;;  %v5771_v45 = vpack.c.bf16 %v5528_v17, %v5527_v31  ;;  %v9048_v6 = vld [vmem:[#allocation3 + $0x198] sm:$0xff]  ;;  %9966 = vst [vmem:[#allocation11_spill] sm:$0xff] %v9050_v38  ;;  %v4531_v24 = vrot.slane %v9050_v38, 1 }
 0x376   : > { %5493 = vmatprep.mubr.msk.f32.mxu1 %vm230_vm0, %v3237_v4  ;;  %v3142_v4 = vpop.permute.xlu1 %3141  ;;  %9965 = vst [vmem:[#allocation33_spill] sm:$0xff] %v9048_v6  ;;  %v9967_v54 = vld [vmem:[#allocation39_spill] sm:$0xff]  ;;  %v3144_v55 = vpop.permute.xlu0 %3143 }
 0x377   : > { %v3316_v39 = vsel %vm230_vm0, %v6141_v57, %v3142_v4  ;;  %v3240_v46 = vrot.slane %v9967_v54, 2  ;;  %v9065_v57 = vld [vmem:[#allocation3 + $0x1a8] sm:$0x3]  ;;  %v5531_v54 = vld [vmem:[%s9606_s2 + $0x1b0] sm:$0xff] }
 0x378   : > { %4591 = vrot.lane.b32.xlu0 %v4527_v47, %s6216_s23  ;;  %9968 = vst [vmem:[#allocation5_spill] sm:$0xff] %v9065_v57 }
 0x379   : > { %4593 = vrot.lane.b32.xlu1 %v4529_v43, %s6216_s23  ;;  %4198 = vmatmul.mubr.f32.vlgmr.msra.gmra.mrb[0].mxu1 %v3315_v51  ;;  %v5529_v51 = vld [vmem:[%s9606_s2 + $0x1a0] sm:$0xff]  ;;  %v5530_v43 = vld [vmem:[%s9606_s2 + $0x1a8] sm:$0xff]  ;;  %v3242_v47 = vsel %vm722_vm4, %v3240_v46, %v3241_v60  ;;  %v4533_v46 = vrot.slane %v9065_v57, 1 }
 0x37a   : > { %5769 = vmatpush1.bf16.msra.mxu1 %v5768_v29  ;;  %5494 = vmatprep.mubr.msk.f32.mxu1 %vm230_vm0, %v3239_v49  ;;  %v4530_v29 = vrot.slane %v9048_v6, 1  ;;  %v6142_v49 = vld [vmem:[#allocation3 + $0x28] sm:$0x3]  ;;  %v5774_v4 = vpack.c.bf16 %v5530_v43, %v5529_v51  ;;  %v3146_v51 = vpop.permute.xlu1 %3145  ;;  %v9085_v6 = vld [vmem:[#allocation3 + $0x30] sm:$0xff] }
 0x37b   : > { %5770 = vmatprep.subr.bf16.mxu1 %v9808_v48  ;;  %v3243_v31 = vrot.slane %v6142_v49, 2  ;;  %v4534_v38 = vsel %vm545_vm3, %v4531_v24, %v4533_v46  ;;  %v3245_v57 = vrot.slane %v9085_v6, 2 }
 0x37c   : > { %v4532_v17 = vsel %vm545_vm3, %v4530_v29, %v4531_v24  ;;  %v6143_v29 = vld [vmem:[#allocation3 + $0x18] sm:$0xff]  ;;  %v3318_v24 = vsel %vm230_vm0, %v6140_v26, %v3146_v51  ;;  %v5536_v26 = vld [vmem:[%s9606_s2 + $0x1d8] sm:$0xff]  ;;  %v6147_v51 = vld [vmem:[#allocation3 + $0x50] sm:$0xff] }
 0x37d   : > { %4203 = vmatmul.mubr.f32.gmra.mrb[2].mxu1 %v3316_v39  ;;  %v5532_v39 = vld [vmem:[%s9606_s2 + $0x1b8] sm:$0xff]  ;;  %4595 = vrot.lane.b32.xlu0 %v4532_v17, %s6216_s23  ;;  %v3244_v43 = vsel %vm722_vm4, %v3241_v60, %v3243_v31  ;;  %v5533_v60 = vld [vmem:[%s9606_s2 + $0x1c0] sm:$0xff]  ;;  %v3148_v31 = vpop.permute.xlu0 %3147 }
 0x37e   : > { %5495 = vmatprep.mubr.msk.f32.mxu1 %vm230_vm0, %v3242_v47  ;;  %5772 = vmatpush1.bf16.msra.mxu1 %v5771_v45  ;;  %v3317_v45 = vsel %vm230_vm0, %v6143_v29, %v3144_v55  ;;  %v9078_v47 = vld [vmem:[#allocation3 + $0x38] sm:$0xff]  ;;  %v5777_v17 = vpack.c.bf16 %v5532_v39, %v5531_v54  ;;  %v6146_v54 = vld [vmem:[#allocation3 + $0x40] sm:$0x3]  ;;  %v3150_v29 = vpop.permute.xlu1 %3149 }
 0x37f   : > { %5773 = vmatprep.subr.bf16.mxu1 %v9808_v48  ;;  %v9081_v49 = vrot.slane %v9078_v47, 2  ;;  %v5534_v55 = vld [vmem:[%s9606_s2 + $0x1c8] sm:$0xff]  ;;  %4597 = vrot.lane.b32.xlu1 %v4534_v38, %s6216_s23  ;;  %v3248_v39 = vrot.slane %v6146_v54, 2  ;;  %v5535_v38 = vld [vmem:[%s9606_s2 + $0x1d0] sm:$0xff]  ;;  %v3320_v54 = vsel %vm230_vm0, %v9078_v47, %v3150_v29  ;;  %v5540_v29 = vld [vmem:[%s9606_s2 + $0x1f8] sm:$0xff] }
 0x380   : > { %v5780_v46 = vpack.c.bf16 %v5534_v55, %v5533_v60  ;;  %v6148_v60 = vld [vmem:[#allocation3 + $0x48] sm:$0xff] }
 0x381   : > { %4208 = vmatmul.mubr.f32.gmra.mrb[4].mxu1 %v3317_v45  ;;  %v3249_v45 = vsel %vm722_vm4, %v9081_v49, %v3248_v39  ;;  %v3250_v55 = vrot.slane %v6148_v60, 2  ;;  %v3152_v39 = vpop.permute.xlu0 %3151 }
 0x382   : > { %5496 = vmatprep.mubr.msk.f32.mxu1 %vm230_vm0, %v3244_v43  ;;  %5775 = vmatpush1.bf16.msra.mxu1 %v5774_v4  ;;  %v9099_v4 = vsel %vm722_vm4, %v3245_v57, %v9081_v49  ;;  %v3319_v57 = vsel %vm230_vm0, %v9085_v6, %v3148_v31  ;;  %v3251_v43 = vrot.slane %v6147_v51, 2  ;;  %v5538_v31 = vld [vmem:[%s9606_s2 + $0x1e8] sm:$0xff]  ;;  %v3154_v20 = vpop.permute.xlu1 %3153 }
 0x383   : > { %5776 = vmatprep.subr.bf16.mxu1 %v9808_v48 }
 0x385   : > { %4213 = vmatmul.mubr.f32.gmra.mrb[6].mxu1 %v3318_v24  ;;  %v5537_v24 = vld [vmem:[%s9606_s2 + $0x1e0] sm:$0xff] }
 0x386   : > { %5497 = vmatprep.mubr.msk.f32.mxu1 %vm230_vm0, %v9099_v4  ;;  %5778 = vmatpush1.bf16.msra.mxu1 %v5777_v17  ;;  %v5783_v17 = vpack.c.bf16 %v5536_v26, %v5535_v38  ;;  %v6149_v38 = vld [vmem:[#allocation3 + $0x58] sm:$0x3] }
 0x387   : > { %5779 = vmatprep.subr.bf16.mxu1 %v9808_v48  ;;  %v3253_v26 = vrot.slane %v6149_v38, 2  ;;  %v5541_v38 = vld [vmem:[%s9606_s2 + $0x200] sm:$0xff] }
 0x389   : > { %4218 = vmatmul.mubr.f32.gmra.mrb[8].mxu1 %v3319_v57  ;;  %v5786_v57 = vpack.c.bf16 %v5538_v31, %v5537_v24  ;;  %v6150_v24 = vld [vmem:[#allocation3 + $0x60] sm:$0xff] }
 0x38a   : > { %5498 = vmatprep.mubr.msk.f32.mxu1 %vm230_vm0, %v3249_v45  ;;  %5781 = vmatpush1.bf16.msra.mxu1 %v5780_v46  ;;  %v3252_v46 = vsel %vm722_vm4, %v3250_v55, %v3251_v43  ;;  %v5539_v45 = vld [vmem:[%s9606_s2 + $0x1f0] sm:$0xff]  ;;  %v3254_v55 = vsel %vm722_vm4, %v3251_v43, %v3253_v26  ;;  %v3255_v31 = vrot.slane %v6150_v24, 2  ;;  %v3322_v43 = vsel %vm230_vm0, %v6147_v51, %v3154_v20  ;;  %v5544_v20 = vld [vmem:[%s9606_s2 + $0x218] sm:$0xff] }
 0x38b   : > { %5782 = vmatprep.subr.bf16.mxu1 %v9808_v48 }
 0x38d   : > { %4223 = vmatmul.mubr.f32.gmra.mrb[10].mxu1 %v3320_v54  ;;  %v3321_v54 = vsel %vm230_vm0, %v6148_v60, %v3152_v39  ;;  %v5542_v60 = vld [vmem:[%s9606_s2 + $0x208] sm:$0xff]  ;;  %v3156_v39 = vpop.permute.xlu0 %3155 }
 0x38e   : > { %5499 = vmatprep.mubr.msk.f32.mxu1 %vm230_vm0, %v3252_v46  ;;  %5784 = vmatpush1.bf16.msra.mxu1 %v5783_v17  ;;  %v3256_v46 = vrot.slane %v8571_v10, 2  ;;  %v5789_v17 = vpack.c.bf16 %v5540_v29, %v5539_v45  ;;  %v5792_v29 = vpack.c.bf16 %v5542_v60, %v5541_v38  ;;  %v3323_v51 = vsel %vm230_vm0, %v6150_v24, %v3156_v39  ;;  %v6152_v38 = vld [vmem:[#allocation3 + $0x78] sm:$0xff] }
 0x38f   : > { %5785 = vmatprep.subr.bf16.mxu1 %v9808_v48  ;;  %v3260_v60 = vrot.slane %v6152_v38, 2  ;;  %v5546_v24 = vld [vmem:[%s9606_s2 + $0x228] sm:$0xff] }
 0x390   : > { %v3257_v26 = vsel %vm722_vm4, %v3255_v31, %v3256_v46 }
 0x391   : > { %4228 = vmatmul.mubr.f32.gmra.mrb[12].mxu1 %v3321_v54  ;;  %v5543_v54 = vld [vmem:[%s9606_s2 + $0x210] sm:$0xff]  ;;  %v3160_v39 = vpop.permute.xlu0 %3159 }
 0x392   : > { %5500 = vmatprep.mubr.msk.f32.mxu1 %vm230_vm0, %v3254_v55  ;;  %5787 = vmatpush1.bf16.msra.mxu1 %v5786_v57  ;;  %v6151_v57 = vld [vmem:[#allocation3 + $0x70] sm:$0x3]  ;;  %v3158_v55 = vpop.permute.xlu1 %3157 }
 0x393   : > { %5788 = vmatprep.subr.bf16.mxu1 %v9808_v48  ;;  %v3258_v45 = vrot.slane %v6151_v57, 2 }
 0x395   : > { %4233 = vmatmul.mubr.f32.gmra.mrb[14].mxu1 %v3322_v43  ;;  %v3259_v31 = vsel %vm722_vm4, %v3256_v46, %v3258_v45  ;;  %v3261_v43 = vrot.slane %v8611_v63, 2  ;;  %v3324_v46 = vsel %vm230_vm0, %v8571_v10, %v3158_v55  ;;  %v6153_v45 = vld [vmem:[#allocation3 + $0x88] sm:$0x3] }
 0x396   : > { %5501 = vmatprep.mubr.msk.f32.mxu1 %vm230_vm0, %v3257_v26  ;;  %5790 = vmatpush1.bf16.msra.mxu1 %v5789_v17  ;;  %v5795_v17 = vpack.c.bf16 %v5544_v20, %v5543_v54  ;;  %v5545_v26 = vld [vmem:[%s9606_s2 + $0x220] sm:$0xff]  ;;  %v5547_v20 = vld [vmem:[%s9606_s2 + $0x230] sm:$0xff]  ;;  %v5548_v10 = vld [vmem:[%s9606_s2 + $0x238] sm:$0xff]  ;;  %v3162_v55 = vpop.permute.xlu1 %3161 }
 0x397   : > { %5791 = vmatprep.subr.bf16.mxu1 %v9808_v48  ;;  %v3262_v57 = vsel %vm722_vm4, %v3260_v60, %v3261_v43  ;;  %v5798_v54 = vpack.c.bf16 %v5546_v24, %v5545_v26  ;;  %v3266_v60 = vrot.slane %v8648_v37, 2  ;;  %v6154_v26 = vld [vmem:[#allocation3 + $0x90] sm:$0xff] }
 0x398   : > { %v3265_v24 = vrot.slane %v6154_v26, 2 }
 0x399   : > { %4238 = vmatmul.mubr.f32.gmra.mrb[16].mxu1 %v3323_v51  ;;  %v3325_v51 = vsel %vm230_vm0, %v6152_v38, %v3160_v39  ;;  %v6155_v39 = vld [vmem:[#allocation3 + $0xa0] sm:$0x3] }
 0x39a   : > { %5502 = vmatprep.mubr.msk.f32.mxu1 %vm230_vm0, %v3259_v31  ;;  %5793 = vmatpush1.bf16.msra.mxu1 %v5792_v29  ;;  %v3263_v29 = vrot.slane %v6153_v45, 2  ;;  %v3267_v38 = vsel %vm722_vm4, %v3265_v24, %v3266_v60  ;;  %v3268_v45 = vrot.slane %v6155_v39, 2  ;;  %v3278_v24 = vrot.slane %v8592_v11, 2 }
 0x39b   : > { %5794 = vmatprep.subr.bf16.mxu1 %v9808_v48  ;;  %v3283_v11 = vrot.slane %v8615_v16, 2  ;;  %v6163_v16 = vld [vmem:[#allocation3 + $0xf0] sm:$0xff] }
 0x39c   : > { %v3264_v31 = vsel %vm722_vm4, %v3261_v43, %v3263_v29  ;;  %v3166_v29 = vpop.permute.xlu1 %3165 }
 0x39d   : > { %4243 = vmatmul.mubr.f32.gmra.mrb[18].mxu1 %v3324_v46  ;;  %v3326_v46 = vsel %vm230_vm0, %v8611_v63, %v3162_v55 }
 0x39e   : > { %5503 = vmatprep.mubr.msk.f32.mxu1 %vm230_vm0, %v3262_v57  ;;  %5796 = vmatpush1.bf16.msra.mxu1 %v5795_v17  ;;  %v5801_v17 = vpack.c.bf16 %v5548_v10, %v5547_v20  ;;  %v3164_v57 = vpop.permute.xlu0 %3163  ;;  %v6156_v20 = vld [vmem:[#allocation3 + $0xb8] sm:$0x3] }
 0x39f   : > { %5797 = vmatprep.subr.bf16.mxu1 %v9808_v48  ;;  %v3327_v43 = vsel %vm230_vm0, %v6154_v26, %v3164_v57  ;;  %v3273_v10 = vrot.slane %v6156_v20, 2 }
 0x3a1   : > { %4248 = vmatmul.mubr.f32.gmra.mrb[20].mxu1 %v3325_v51  ;;  %v6157_v51 = vld [vmem:[#allocation3 + $0xa8] sm:$0xff] }
 0x3a2   : > { %5504 = vmatprep.mubr.msk.f32.mxu1 %vm230_vm0, %v3264_v31  ;;  %5799 = vmatpush1.bf16.msra.mxu1 %v5798_v54  ;;  %v3269_v54 = vsel %vm722_vm4, %v3266_v60, %v3268_v45  ;;  %v3168_v63 = vpop.permute.xlu0 %3167  ;;  %v3170_v31 = vpop.permute.xlu1 %3169  ;;  %v3274_v60 = vsel %vm722_vm4, %v8637_v52, %v3273_v10  ;;  %v3279_v52 = vsel %vm722_vm4, %v8671_v50, %v3278_v24  ;;  %v6164_v10 = vld [vmem:[#allocation3 + $0xf8] sm:$0xff]  ;;  %v9969_v24 = vld [vmem:[#allocation40_spill] sm:$0xff] }
 0x3a3   : > { %5800 = vmatprep.subr.bf16.mxu1 %v9808_v48  ;;  %v3328_v48 = vsel %vm230_vm0, %v8648_v37, %v3166_v29  ;;  %v3329_v55 = vsel %vm230_vm0, %v6157_v51, %v3168_v63  ;;  %v3284_v50 = vsel %vm722_vm4, %v8701_v36, %v3283_v11 }
 0x3a5   : > { %4253 = vmatmul.mubr.f32.gmra.mrb[22].mxu1 %v3326_v46 }
 0x3a6   : > { %5505 = vmatprep.mubr.msk.f32.mxu1 %vm230_vm0, %v3267_v38  ;;  %5802 = vmatpush1.bf16.msra.mxu1 %v5801_v17  ;;  %v6158_v17 = vld [vmem:[#allocation3 + $0xb0] sm:$0xff]  ;;  %v3172_v26 = vpop.permute.xlu0 %3171  ;;  %v3174_v57 = vpop.permute.xlu1 %3173  ;;  %v6160_v38 = vld [vmem:[#allocation3 + $0xc8] sm:$0xff] }
 0x3a7   : > { %v3330_v37 = vsel %vm230_vm0, %v6158_v17, %v3170_v31  ;;  %v3332_v39 = vsel %vm230_vm0, %v6160_v38, %v3174_v57  ;;  %v6169_v57 = vld [vmem:[#allocation3 + $0x138] sm:$0xff] }
 0x3a8   : > { %v9970_v38 = vld [vmem:[#allocation41_spill] sm:$0xff] }
 0x3a9   : > { %4258 = vmatmul.mubr.f32.gmra.mrb[24].mxu1 %v3327_v43 }
 0x3aa   : > { %5506 = vmatprep.mubr.msk.f32.mxu1 %vm230_vm0, %v3269_v54  ;;  %v3176_v45 = vpop.permute.xlu0 %3175  ;;  %v3178_v29 = vpop.permute.xlu1 %3177  ;;  %v6162_v54 = vld [vmem:[#allocation3 + $0xe0] sm:$0xff] }
 0x3ad   : > { %4263 = vmatmul.mubr.f32.gmra.mrb[26].mxu1 %v3328_v48  ;;  %v3334_v48 = vsel %vm230_vm0, %v6162_v54, %v3178_v29  ;;  %v6172_v29 = vld [vmem:[#allocation3 + $0x158] sm:$0xff] }
 0x3ae   : > { %5507 = vmatprep.mubr.msk.f32.mxu1 %vm230_vm0, %v8654_v9  ;;  %v6159_v9 = vld [vmem:[#allocation3 + $0xc0] sm:$0xff]  ;;  %v3180_v63 = vpop.permute.xlu0 %3179  ;;  %v3182_v20 = vpop.permute.xlu1 %3181 }
 0x3af   : > { %v3331_v46 = vsel %vm230_vm0, %v6159_v9, %v3172_v26  ;;  %v3336_v36 = vsel %vm230_vm0, %v6164_v10, %v3182_v20  ;;  %v6168_v9 = vld [vmem:[#allocation3 + $0x128] sm:$0xff]  ;;  %v4634_v20 = vrot.slane %v8728_v42, 2 }
 0x3b1   : > { %4268 = vmatmul.mubr.f32.gmra.mrb[28].mxu1 %v3329_v55  ;;  %v6165_v55 = vld [vmem:[#allocation3 + $0x108] sm:$0xff] }
 0x3b2   : > { %5508 = vmatprep.mubr.msk.f32.mxu1 %vm230_vm0, %v3274_v60  ;;  %v3184_v51 = vpop.permute.xlu0 %3183  ;;  %v6166_v60 = vld [vmem:[#allocation3 + $0x110] sm:$0xff] }
 0x3b3   : > { %v3337_v31 = vsel %vm230_vm0, %v6165_v55, %v3184_v51  ;;  %v4636_v51 = vrot.slane %v8755_v8, 2 }
 0x3b5   : > { %4273 = vmatmul.mubr.f32.gmra.mrb[30].mxu1 %v3330_v37  ;;  %v6167_v37 = vld [vmem:[#allocation3 + $0x120] sm:$0xff] }
 0x3b6   : > { %5509 = vmatprep.mubr.msk.f32.mxu1 %vm230_vm0, %v8685_v32  ;;  %v6161_v32 = vld [vmem:[#allocation3 + $0xd8] sm:$0xff] }
 0x3b7   : > { %v3333_v43 = vsel %vm230_vm0, %v6161_v32, %v3176_v45  ;;  %v6171_v32 = vld [vmem:[#allocation3 + $0x150] sm:$0xff] }
 0x3b9   : > { %4278 = vmatmul.mubr.f32.gmra.mrb[32].mxu1 %v3331_v46 }
 0x3ba   : > { %5510 = vmatprep.mubr.msk.f32.mxu1 %vm230_vm0, %v3279_v52 }
 0x3bd   : > { %4283 = vmatmul.mubr.f32.gmra.mrb[34].mxu1 %v3332_v39  ;;  %v6170_v39 = vld [vmem:[#allocation3 + $0x140] sm:$0xff] }
 0x3be   : > { %5511 = vmatprep.mubr.msk.f32.mxu1 %vm230_vm0, %v8715_v30  ;;  %v3335_v30 = vsel %vm230_vm0, %v6163_v16, %v3180_v63  ;;  %v6174_v16 = vld [vmem:[#allocation3 + $0x170] sm:$0xff] }
 0x3c1   : > { %4288 = vmatmul.mubr.f32.gmra.mrb[36].mxu1 %v3333_v43 }
 0x3c2   : > { %5512 = vmatprep.mubr.msk.f32.mxu1 %vm230_vm0, %v3284_v50 }
 0x3c5   : > { %4293 = vmatmul.mubr.f32.gmra.mrb[38].mxu1 %v3334_v48  ;;  %v6173_v48 = vld [vmem:[#allocation3 + $0x168] sm:$0xff] }
 0x3c6   : > { %5513 = vmatprep.mubr.msk.f32.mxu1 %vm230_vm0, %v8748_v12  ;;  %v3186_v12 = vpop.permute.xlu1 %3185 }
 0x3c7   : > { %v3338_v17 = vsel %vm230_vm0, %v6166_v60, %v3186_v12  ;;  %v4642_v60 = vrot.slane %v8764_v40, 2 }
 0x3c9   : > { %4298 = vmatmul.mubr.f32.gmra.mrb[40].mxu1 %v3335_v30 }
 0x3ca   : > { %5514 = vmatprep.mubr.msk.f32.mxu1 %vm230_vm0, %v8501_v35  ;;  %v3188_v35 = vpop.permute.xlu0 %3187 }
 0x3cb   : > { %v3339_v26 = vsel %vm230_vm0, %v6167_v37, %v3188_v35  ;;  %v4644_v37 = vrot.slane %v8766_v59, 2 }
 0x3cd   : > { %4303 = vmatmul.mubr.f32.gmra.mrb[42].mxu1 %v3336_v36  ;;  %v4635_v36 = vsel %vm722_vm4, %v9081_v49, %v4634_v20 }
 0x3ce   : > { %5515 = vmatprep.mubr.msk.f32.mxu1 %vm230_vm0, %v8789_v14  ;;  %v3190_v14 = vpop.permute.xlu1 %3189 }
 0x3cf   : > { %v3340_v46 = vsel %vm230_vm0, %v6168_v9, %v3190_v14  ;;  %v4645_v14 = vsel %vm722_vm4, %v4642_v60, %v4644_v37 }
 0x3d1   : > { %4308 = vmatmul.mubr.f32.gmra.mrb[44].mxu1 %v3337_v31 }
 0x3d2   : > { %5516 = vmatprep.mubr.msk.f32.mxu1 %vm230_vm0, %v8517_v2  ;;  %v3192_v2 = vpop.permute.xlu0 %3191 }
 0x3d3   : > { %v3341_v52 = vsel %vm230_vm0, %v6169_v57, %v3192_v2  ;;  %v4649_v2 = vrot.slane %v8785_v7, 2 }
 0x3d5   : > { %4313 = vmatmul.mubr.f32.gmra.mrb[46].mxu1 %v3338_v17 }
 0x3d6   : > { %5517 = vmatprep.mubr.msk.f32.mxu1 %vm230_vm0, %v8830_v33  ;;  %v3194_v33 = vpop.permute.xlu1 %3193  ;;  %v3196_v11 = vpop.permute.xlu0 %3195 }
 0x3d7   : > { %v3342_v45 = vsel %vm230_vm0, %v6170_v39, %v3194_v33  ;;  %v3343_v43 = vsel %vm230_vm0, %v6171_v32, %v3196_v11  ;;  %v4652_v33 = vrot.slane %v8801_v18, 2 }
 0x3d9   : > { %4318 = vmatmul.mubr.f32.gmra.mrb[48].mxu1 %v3339_v26 }
 0x3da   : > { %5518 = vmatprep.mubr.msk.f32.mxu1 %vm230_vm0, %v9969_v24  ;;  %v3200_v54 = vpop.permute.xlu0 %3199  ;;  %v4647_v24 = vrot.slane %v8783_v3, 2 }
 0x3db   : > { %v3345_v63 = vsel %vm230_vm0, %v6173_v48, %v3200_v54 }
 0x3dd   : > { %4323 = vmatmul.mubr.f32.gmra.mrb[50].mxu1 %v3340_v46 }
 0x3de   : > { %5519 = vmatprep.mubr.msk.f32.mxu1 %vm230_vm0, %v8871_v61  ;;  %v3198_v61 = vpop.permute.xlu1 %3197 }
 0x3df   : > { %v3344_v50 = vsel %vm230_vm0, %v6172_v29, %v3198_v61 }
 0x3e1   : > { %4328 = vmatmul.mubr.f32.gmra.mrb[52].mxu1 %v3341_v52  ;;  %v4650_v52 = vsel %vm722_vm4, %v4647_v24, %v4649_v2  ;;  %v9977_v2 = vld [vmem:[#allocation35_spill] sm:$0xff] }
 0x3e2   : > { %5520 = vmatprep.mubr.msk.f32.mxu1 %vm230_vm0, %v9970_v38 }
 0x3e5   : > { %4333 = vmatmul.mubr.f32.gmra.mrb[54].mxu1 %v3342_v45  ;;  %v4654_v45 = vrot.slane %v8807_v19, 2 }
 0x3e6   : > { %5521 = vmatprep.mubr.msk.f32.mxu1 %vm230_vm0, %v8912_v15  ;;  %v3202_v15 = vpop.permute.xlu1 %3201 }
 0x3e7   : > { %v3346_v30 = vsel %vm230_vm0, %v6174_v16, %v3202_v15  ;;  %v4655_v32 = vsel %vm722_vm4, %v4652_v33, %v4654_v45 }
 0x3e9   : > { %4338 = vmatmul.mubr.f32.gmra.mrb[56].mxu1 %v3343_v43  ;;  %v4657_v43 = vrot.slane %v8820_v13, 2 }
 0x3ea   : > { %5522 = vmatprep.mubr.msk.f32.mxu1 %vm230_vm0, %v8532_v58  ;;  %v4536_v58 = vpop.permute.xlu0 %4535  ;;  %v4538_v10 = vpop.permute.xlu1 %4537 }
 0x3eb   : > { %v4712_v42 = vsel %vm230_vm0, %v9078_v47, %v4538_v10  ;;  %v4641_v47 = vrot.slane %v8773_v44, 2 }
 0x3ed   : > { %4343 = vmatmul.mubr.f32.gmra.mrb[58].mxu1 %v3344_v50  ;;  %v4659_v50 = vrot.slane %v8822_v53, 2 }
 0x3ee   : > { %5523 = vmatprep.mubr.msk.f32.mxu1 %vm230_vm0, %v8953_v56  ;;  %v4711_v56 = vsel %vm230_vm0, %v9085_v6, %v4536_v58  ;;  %v4540_v55 = vpop.permute.xlu0 %4539  ;;  %v4639_v6 = vrot.slane %v8739_v25, 2  ;;  %v4542_v31 = vpop.permute.xlu1 %4541  ;;  %v4643_v25 = vsel %vm722_vm4, %v4641_v47, %v4642_v60 }
 0x3ef   : > { %v4713_v49 = vsel %vm230_vm0, %v8755_v8, %v4540_v55  ;;  %v4714_v17 = vsel %vm230_vm0, %v8737_v1, %v4542_v31  ;;  %v4660_v48 = vsel %vm722_vm4, %v4657_v43, %v4659_v50  ;;  %v9971_v55 = vld [vmem:[#allocation21_spill] sm:$0xff] }
 0x3f1   : > { %4348 = vmatmul.mubr.f32.gmra.mrb[60].mxu1 %v3345_v63  ;;  %v4662_v63 = vrot.slane %v8846_v21, 2 }
 0x3f2   : > { %5524 = vmatprep.mubr.msk.f32.mxu1 %vm230_vm0, %v8536_v23  ;;  %v4637_v23 = vrot.slane %v8737_v1, 2  ;;  %v4544_v35 = vpop.permute.xlu0 %4543  ;;  %v4546_v26 = vpop.permute.xlu1 %4545  ;;  %v4646_v1 = vrot.slane %v8795_v62, 2 }
 0x3f3   : > { %v4715_v8 = vsel %vm230_vm0, %v8773_v44, %v4544_v35  ;;  %v4716_v9 = vsel %vm230_vm0, %v8764_v40, %v4546_v26  ;;  %v4651_v40 = vrot.slane %v8814_v34, 2  ;;  %v9974_v35 = vld [vmem:[#allocation31_spill] sm:$0xff] }
 0x3f4   : > { %v4640_v12 = vsel %vm722_vm4, %v4637_v23, %v4639_v6  ;;  %v4648_v59 = vsel %vm722_vm4, %v4646_v1, %v4647_v24  ;;  %v9976_v24 = vld [vmem:[#allocation22_spill] sm:$0xff] }
 0x3f5   : > { %4353 = vmatmul.mubr.f32.gmra.mrb[62].mxu1 %v3346_v30  ;;  %v4653_v7 = vsel %vm722_vm4, %v4651_v40, %v4652_v33  ;;  %v4664_v30 = vrot.slane %v8848_v0, 2  ;;  %v4679_v1 = vrot.slane %v9976_v24, 2  ;;  %v9993_v24 = vld [vmem:[#allocation11_spill] sm:$0xff] }
 0x3f6   : > { %5549 = vmatprep.mubr.msk.f32.mxu1 %vm230_vm0, %v9099_v4  ;;  %v4638_v4 = vsel %vm722_vm4, %v4636_v51, %v4637_v23  ;;  %v4548_v46 = vpop.permute.xlu0 %4547  ;;  %v4550_v57 = vpop.permute.xlu1 %4549  ;;  %v4669_v23 = vrot.slane %v8867_v28, 2 }
 0x3f7   : > { %v4717_v44 = vsel %vm230_vm0, %v8795_v62, %v4548_v46  ;;  %v4718_v38 = vsel %vm230_vm0, %v8783_v3, %v4550_v57  ;;  %v4656_v3 = vrot.slane %v8838_v22, 2  ;;  %v4665_v20 = vsel %vm722_vm4, %v4662_v63, %v4664_v30  ;;  %v9978_v57 = vld [vmem:[#allocation6_spill] sm:$0xff] }
 0x3f9   : > { %4897 = vmatmul.mubr.f32.vlgmr.msra.gmra.mrb[0].mxu1 %v4711_v56  ;;  %v4658_v19 = vsel %vm722_vm4, %v4656_v3, %v4657_v43  ;;  %v4667_v56 = vrot.slane %v8865_v41, 2  ;;  %v9981_v3 = vld [vmem:[#allocation25_spill] sm:$0xff] }
 0x3fa   : > { %5550 = vmatprep.mubr.msk.f32.mxu1 %vm230_vm0, %v4635_v36  ;;  %v4552_v39 = vpop.permute.xlu0 %4551  ;;  %v4554_v11 = vpop.permute.xlu1 %4553 }
 0x3fb   : > { %v4719_v62 = vsel %vm230_vm0, %v8814_v34, %v4552_v39  ;;  %v4720_v61 = vsel %vm230_vm0, %v8801_v18, %v4554_v11  ;;  %v4661_v18 = vrot.slane %v8855_v5, 2  ;;  %v9979_v39 = vld [vmem:[#allocation24_spill] sm:$0xff] }
 0x3fd   : > { %4902 = vmatmul.mubr.f32.gmra.mrb[2].mxu1 %v4712_v42  ;;  %v4663_v53 = vsel %vm722_vm4, %v4661_v18, %v4662_v63  ;;  %v4670_v42 = vsel %vm722_vm4, %v4667_v56, %v4669_v23  ;;  %v9986_v23 = vld [vmem:[#allocation26_spill] sm:$0xff] }
 0x3fe   : > { %5551 = vmatprep.mubr.msk.f32.mxu1 %vm230_vm0, %v4638_v4  ;;  %v4556_v29 = vpop.permute.xlu0 %4555  ;;  %v4558_v54 = vpop.permute.xlu1 %4557  ;;  %v4672_v4 = vrot.slane %v9971_v55, 2 }
 0x3ff   : > { %v4721_v34 = vsel %vm230_vm0, %v8838_v22, %v4556_v29  ;;  %v4722_v15 = vsel %vm230_vm0, %v8820_v13, %v4558_v54  ;;  %v4666_v13 = vrot.slane %v8877_v27, 2 }
 0x401   : > { %4907 = vmatmul.mubr.f32.gmra.mrb[4].mxu1 %v4713_v49  ;;  %v4668_v0 = vsel %vm722_vm4, %v4666_v13, %v4667_v56  ;;  %v9985_v56 = vld [vmem:[#allocation12_spill] sm:$0xff] }
 0x402   : > { %5552 = vmatprep.mubr.msk.f32.mxu1 %vm230_vm0, %v4640_v12  ;;  %v4560_v16 = vpop.permute.xlu0 %4559  ;;  %v4562_v58 = vpop.permute.xlu1 %4561  ;;  %v9973_v12 = vld [vmem:[#allocation30_spill] sm:$0xff]  ;;  %v4694_v13 = vrot.slane %v9985_v56, 2 }
 0x403   : > { %v4723_v22 = vsel %vm230_vm0, %v8855_v5, %v4560_v16  ;;  %v4724_v10 = vsel %vm230_vm0, %v8846_v21, %v4562_v58  ;;  %v9972_v21 = vld [vmem:[#allocation20_spill] sm:$0xff]  ;;  %v4674_v60 = vrot.slane %v9973_v12, 2 }
 0x404   : > { %v4671_v6 = vrot.slane %v9972_v21, 2 }
 0x405   : > { %4912 = vmatmul.mubr.f32.gmra.mrb[6].mxu1 %v4714_v17  ;;  %v4675_v17 = vsel %vm722_vm4, %v4672_v4, %v4674_v60  ;;  %v9989_v60 = vld [vmem:[#allocation28_spill] sm:$0xff] }
 0x406   : > { %5553 = vmatprep.mubr.msk.f32.mxu1 %vm230_vm0, %v4643_v25  ;;  %v4564_v36 = vpop.permute.xlu0 %4563  ;;  %v4566_v51 = vpop.permute.xlu1 %4565  ;;  %v4673_v28 = vsel %vm722_vm4, %v4671_v6, %v4672_v4  ;;  %v4677_v25 = vrot.slane %v9974_v35, 2  ;;  %v9988_v6 = vld [vmem:[#allocation17_spill] sm:$0xff] }
 0x407   : > { %v4725_v5 = vsel %vm230_vm0, %v8877_v27, %v4564_v36  ;;  %v4726_v49 = vsel %vm230_vm0, %v8865_v41, %v4566_v51  ;;  %v9975_v41 = vld [vmem:[#allocation34_spill] sm:$0xff]  ;;  %v9987_v51 = vld [vmem:[#allocation27_spill] sm:$0xff] }
 0x408   : > { %v4676_v37 = vrot.slane %v9975_v41, 2 }
 0x409   : > { %4917 = vmatmul.mubr.f32.gmra.mrb[8].mxu1 %v4715_v8 }
 0x40a   : > { %5554 = vmatprep.mubr.msk.f32.mxu1 %vm230_vm0, %v4645_v14  ;;  %v4568_v31 = vpop.permute.xlu0 %4567  ;;  %v4570_v47 = vpop.permute.xlu1 %4569  ;;  %v4678_v14 = vsel %vm722_vm4, %v4676_v37, %v4677_v25  ;;  %v9991_v37 = vld [vmem:[#allocation29_spill] sm:$0xff] }
 0x40b   : > { %v4727_v27 = vsel %vm230_vm0, %v9972_v21, %v4568_v31  ;;  %v4728_v8 = vsel %vm230_vm0, %v9971_v55, %v4570_v47  ;;  %v9990_v47 = vld [vmem:[#allocation32_spill] sm:$0xff] }
 0x40d   : > { %4922 = vmatmul.mubr.f32.gmra.mrb[10].mxu1 %v4716_v9 }
 0x40e   : > { %5555 = vmatprep.mubr.msk.f32.mxu1 %vm230_vm0, %v4648_v59  ;;  %v4572_v26 = vpop.permute.xlu0 %4571  ;;  %v4574_v46 = vpop.permute.xlu1 %4573  ;;  %v4680_v59 = vsel %vm722_vm4, %v4677_v25, %v4679_v1  ;;  %v4707_v1 = vrot.slane %v9993_v24, 2 }
 0x40f   : > { %v4729_v9 = vsel %vm230_vm0, %v9975_v41, %v4572_v26  ;;  %v4730_v33 = vsel %vm230_vm0, %v9974_v35, %v4574_v46  ;;  %v9992_v26 = vld [vmem:[#allocation33_spill] sm:$0xff] }
 0x411   : > { %4927 = vmatmul.mubr.f32.gmra.mrb[12].mxu1 %v4717_v44  ;;  %v4682_v44 = vrot.slane %v9977_v2, 2 }
 0x412   : > { %5556 = vmatprep.mubr.msk.f32.mxu1 %vm230_vm0, %v4650_v52  ;;  %v4681_v52 = vrot.slane %v9978_v57, 2  ;;  %v4576_v40 = vpop.permute.xlu0 %4575 }
 0x413   : > { %v4731_v45 = vsel %vm230_vm0, %v9978_v57, %v4576_v40  ;;  %v9994_v57 = vld [vmem:[#allocation5_spill] sm:$0xff] }
 0x415   : > { %4932 = vmatmul.mubr.f32.gmra.mrb[14].mxu1 %v4718_v38  ;;  %v4683_v38 = vsel %vm722_vm4, %v4681_v52, %v4682_v44  ;;  %v4709_v52 = vrot.slane %v9994_v57, 2 }
 0x416   : > { %5557 = vmatprep.mubr.msk.f32.mxu1 %vm230_vm0, %v4653_v7  ;;  %v4684_v7 = vrot.slane %v9979_v39, 2 }
 0x417   : > { %v4710_v39 = vsel %vm722_vm4, %v4707_v1, %v4709_v52 }
 0x418   : > { %v4685_v11 = vsel %vm722_vm4, %v4682_v44, %v4684_v7 }
 0x419   : > { %4937 = vmatmul.mubr.f32.gmra.mrb[16].mxu1 %v4719_v62  ;;  %v4578_v62 = vpop.permute.xlu1 %4577 }
 0x41a   : > { %5558 = vmatprep.mubr.msk.f32.mxu1 %vm230_vm0, %v4655_v32  ;;  %v9980_v32 = vld [vmem:[#allocation23_spill] sm:$0xff]  ;;  %v4732_v29 = vsel %vm230_vm0, %v9977_v2, %v4578_v62 }
 0x41b   : > { %v4687_v43 = vrot.slane %v9980_v32, 2 }
 0x41d   : > { %4942 = vmatmul.mubr.f32.gmra.mrb[18].mxu1 %v4720_v61  ;;  %v4686_v61 = vrot.slane %v9981_v3, 2  ;;  %v4582_v63 = vpop.permute.xlu1 %4581 }
 0x41e   : > { %5559 = vmatprep.mubr.msk.f32.mxu1 %vm230_vm0, %v4658_v19  ;;  %v4580_v19 = vpop.permute.xlu0 %4579 }
 0x41f   : > { %v4688_v50 = vsel %vm722_vm4, %v4686_v61, %v4687_v43 }
 0x421   : > { %4947 = vmatmul.mubr.f32.gmra.mrb[20].mxu1 %v4721_v34  ;;  %v9982_v34 = vld [vmem:[#allocation7_spill] sm:$0xff]  ;;  %v4586_v36 = vpop.permute.xlu1 %4585 }
 0x422   : > { %5560 = vmatprep.mubr.msk.f32.mxu1 %vm230_vm0, %v4660_v48  ;;  %v4689_v54 = vrot.slane %v9982_v34, 2  ;;  %v4733_v48 = vsel %vm230_vm0, %v9981_v3, %v4580_v19  ;;  %v4584_v58 = vpop.permute.xlu0 %4583 }
 0x424   : > { %v4690_v18 = vsel %vm722_vm4, %v4687_v43, %v4689_v54 }
 0x425   : > { %4952 = vmatmul.mubr.f32.gmra.mrb[22].mxu1 %v4722_v15  ;;  %v9983_v15 = vld [vmem:[#allocation10_spill] sm:$0xff] }
 0x426   : > { %5561 = vmatprep.mubr.msk.f32.mxu1 %vm230_vm0, %v4663_v53  ;;  %v4692_v16 = vrot.slane %v9983_v15, 2  ;;  %v9984_v53 = vld [vmem:[#allocation16_spill] sm:$0xff]  ;;  %v4736_v55 = vsel %vm230_vm0, %v9983_v15, %v4586_v36  ;;  %v4588_v4 = vpop.permute.xlu0 %4587  ;;  %v6178_v36 = vld [vmem:[%s6279_s6 + $0x18] sm:$0xff] }
 0x427   : > { %v4691_v30 = vrot.slane %v9984_v53, 2  ;;  %v4737_v31 = vsel %vm230_vm0, %v9987_v51, %v4588_v4 }
 0x429   : > { %4957 = vmatmul.mubr.f32.gmra.mrb[24].mxu1 %v4723_v22  ;;  %v4734_v22 = vsel %vm230_vm0, %v9980_v32, %v4582_v63  ;;  %v6176_v63 = vld [vmem:[%s6279_s6 + $0x8] sm:$0xff] }
 0x42a   : > { %5562 = vmatprep.mubr.msk.f32.mxu1 %vm230_vm0, %v4665_v20  ;;  %v4693_v20 = vsel %vm722_vm4, %v4691_v30, %v4692_v16  ;;  %v4592_v25 = vpop.permute.xlu0 %4591 }
 0x42d   : > { %4962 = vmatmul.mubr.f32.gmra.mrb[26].mxu1 %v4724_v10  ;;  %v4735_v10 = vsel %vm230_vm0, %v9984_v53, %v4584_v58 }
 0x42e   : > { %5563 = vmatprep.mubr.msk.f32.mxu1 %vm230_vm0, %v4668_v0  ;;  %v4695_v0 = vsel %vm722_vm4, %v4692_v16, %v4694_v13  ;;  %v4596_v2 = vpop.permute.xlu0 %4595 }
 0x42f   : > { %v4741_v40 = vsel %vm230_vm0, %v9992_v26, %v4596_v2  ;;  %v6183_v2 = vld [vmem:[%s6279_s6 + $0x40] sm:$0xff] }
 0x431   : > { %4967 = vmatmul.mubr.f32.gmra.mrb[28].mxu1 %v4725_v5  ;;  %v4697_v5 = vrot.slane %v9986_v23, 2 }
 0x432   : > { %5564 = vmatprep.mubr.msk.f32.mxu1 %vm230_vm0, %v4670_v42  ;;  %v4696_v42 = vrot.slane %v9987_v51, 2 }
 0x434   : > { %v4698_v21 = vsel %vm722_vm4, %v4696_v42, %v4697_v5 }
 0x435   : > { %4972 = vmatmul.mubr.f32.gmra.mrb[30].mxu1 %v4726_v49  ;;  %v4699_v49 = vrot.slane %v9988_v6, 2 }
 0x436   : > { %5565 = vmatprep.mubr.msk.f32.mxu1 %vm230_vm0, %v4673_v28  ;;  %v4590_v28 = vpop.permute.xlu1 %4589 }
 0x437   : > { %v4700_v12 = vsel %vm722_vm4, %v4697_v5, %v4699_v49  ;;  %v4738_v35 = vsel %vm230_vm0, %v9986_v23, %v4590_v28  ;;  %v6180_v28 = vld [vmem:[%s6279_s6 + $0x28] sm:$0xff] }
 0x439   : > { %4977 = vmatmul.mubr.f32.gmra.mrb[32].mxu1 %v4727_v27  ;;  %v4702_v27 = vrot.slane %v9989_v60, 2 }
 0x43a   : > { %5566 = vmatprep.mubr.msk.f32.mxu1 %vm230_vm0, %v4675_v17  ;;  %v4701_v17 = vrot.slane %v9990_v47, 2  ;;  %v4594_v46 = vpop.permute.xlu1 %4593 }
 0x43c   : > { %v4703_v41 = vsel %vm722_vm4, %v4701_v17, %v4702_v27 }
 0x43d   : > { %4982 = vmatmul.mubr.f32.gmra.mrb[34].mxu1 %v4728_v8  ;;  %v4704_v8 = vrot.slane %v9991_v37, 2 }
 0x43e   : > { %5567 = vmatprep.mubr.msk.f32.mxu1 %vm230_vm0, %v4678_v14  ;;  %v4706_v14 = vrot.slane %v9992_v26, 2 }
 0x440   : > { %v4708_v44 = vsel %vm722_vm4, %v4706_v14, %v4707_v1  ;;  %v6182_v14 = vld [vmem:[%s6279_s6 + $0x38] sm:$0xff] }
 0x441   : > { %4987 = vmatmul.mubr.f32.gmra.mrb[36].mxu1 %v4729_v9  ;;  %v4739_v9 = vsel %vm230_vm0, %v9990_v47, %v4592_v25 }
 0x442   : > { %5568 = vmatprep.mubr.msk.f32.mxu1 %vm230_vm0, %v4680_v59  ;;  %v4705_v59 = vsel %vm722_vm4, %v4702_v27, %v4704_v8 }
 0x445   : > { %4992 = vmatmul.mubr.f32.gmra.mrb[38].mxu1 %v4730_v33  ;;  %v4740_v33 = vsel %vm230_vm0, %v9989_v60, %v4594_v46 }
 0x446   : > { %5569 = vmatprep.mubr.msk.f32.mxu1 %vm230_vm0, %v4683_v38  ;;  %v4598_v38 = vpop.permute.xlu1 %4597 }
 0x447   : > { %v4742_v7 = vsel %vm230_vm0, %v9993_v24, %v4598_v38  ;;  %v6184_v38 = vld [vmem:[%s6279_s6 + $0x48] sm:$0xff] }
 0x449   : > { %4997 = vmatmul.mubr.f32.gmra.mrb[40].mxu1 %v4731_v45  ;;  %v9427_v45 = vld [vmem:[%s9607_s3 + $0x2] ss:$0 sm:$0xff] }
 0x44a   : > { %5570 = vmatprep.mubr.msk.f32.mxu1 %vm230_vm0, %v4685_v11  ;;  %v9432_v11 = vld [vmem:[%s9607_s3 + $0x3] ss:$0 sm:$0xff] }
 0x44d   : > { %5002 = vmatmul.mubr.f32.gmra.mrb[42].mxu1 %v4732_v29  ;;  %v6175_v29 = vld [vmem:[%s6279_s6] sm:$0xff] }
 0x44e   : > { %5571 = vmatprep.mubr.msk.f32.mxu1 %vm230_vm0, %v4688_v50 }
 0x451   : > { %5007 = vmatmul.mubr.f32.gmra.mrb[44].mxu1 %v4733_v48 }
 0x452   : > { %5572 = vmatprep.mubr.msk.f32.mxu1 %vm230_vm0, %v4690_v18 }
 0x455   : > { %5012 = vmatmul.mubr.f32.gmra.mrb[46].mxu1 %v4734_v22  ;;  %v6177_v22 = vld [vmem:[%s6279_s6 + $0x10] sm:$0xff] }
 0x456   : > { %5573 = vmatprep.mubr.msk.f32.mxu1 %vm230_vm0, %v4693_v20 }
 0x459   : > { %5017 = vmatmul.mubr.f32.gmra.mrb[48].mxu1 %v4735_v10 }
 0x45a   : > { %5574 = vmatprep.mubr.msk.f32.mxu1 %vm230_vm0, %v4695_v0 }
 0x45d   : > { %5022 = vmatmul.mubr.f32.gmra.mrb[50].mxu1 %v4736_v55  ;;  %v6179_v55 = vld [vmem:[%s6279_s6 + $0x20] sm:$0xff] }
 0x45e   : > { %5575 = vmatprep.mubr.msk.f32.mxu1 %vm230_vm0, %v4698_v21 }
 0x461   : > { %5027 = vmatmul.mubr.f32.gmra.mrb[52].mxu1 %v4737_v31 }
 0x462   : > { %5576 = vmatprep.mubr.msk.f32.mxu1 %vm230_vm0, %v4700_v12 }
 0x465   : > { %5032 = vmatmul.mubr.f32.gmra.mrb[54].mxu1 %v4738_v35  ;;  %v6181_v35 = vld [vmem:[%s6279_s6 + $0x30] sm:$0xff] }
 0x466   : > { %5577 = vmatprep.mubr.msk.f32.mxu1 %vm230_vm0, %v4703_v41 }
 0x469   : > { %5037 = vmatmul.mubr.f32.gmra.mrb[56].mxu1 %v4739_v9 }
 0x46a   : > { %5578 = vmatprep.mubr.msk.f32.mxu1 %vm230_vm0, %v4705_v59 }
 0x46d   : > { %5042 = vmatmul.mubr.f32.gmra.mrb[58].mxu1 %v4740_v33 }
 0x46e   : > { %5579 = vmatprep.mubr.msk.f32.mxu1 %vm230_vm0, %v4708_v44 }
 0x471   : > { %5047 = vmatmul.mubr.f32.gmra.mrb[60].mxu1 %v4741_v40 }
 0x472   : > { %5580 = vmatprep.mubr.msk.f32.mxu1 %vm230_vm0, %v4710_v39 }
 0x475   : > { %5052 = vmatmul.mubr.f32.gmra.mrb[62].mxu1 %v4742_v7 }
 0x4cc   : > { %v4898_v62 = vpop.f32.mrb[0].mxu1 }
 0x4cd   : > { %v5094_v32 = vmul.f32 %v9427_v45, %v4898_v62  ;;  %v4900_v43 = vpop.f32.mrb[1].mxu1 }
 0x4cf   : > { %v5131_v3 = vadd.f32 %v9432_v11, %v5094_v32 }
 0x4d0   : > { %v4903_v61 = vpop.f32.mrb[2].mxu1 }
 0x4d1   : > { %v5163_v19 = vadd.f32 %v6175_v29, %v5131_v3  ;;  %v5095_v50 = vmul.f32 %v9427_v45, %v4903_v61  ;;  %v4905_v34 = vpop.f32.mrb[3].mxu1  ;;  %v6185_v3 = vld [vmem:[%s6279_s6 + $0x50] sm:$0xff] }
 0x4d3   : > { %5195 = vst.msk [vmem:[%s9441_s20] sm:$0xff] %vm230_vm0, %v5163_v19  ;;  %v5132_v54 = vadd.f32 %v9432_v11, %v5095_v50 }
 0x4d4   : > { %v4908_v48 = vpop.f32.mrb[4].mxu1 }
 0x4d5   : > { %v5164_v18 = vadd.f32 %v6176_v63, %v5132_v54  ;;  %v5096_v15 = vmul.f32 %v9427_v45, %v4908_v48  ;;  %v4910_v16 = vpop.f32.mrb[5].mxu1  ;;  %v6186_v54 = vld [vmem:[%s6279_s6 + $0x58] sm:$0xff] }
 0x4d7   : > { %5196 = vst.msk [vmem:[%s9441_s20 + $0x8] sm:$0xff] %vm230_vm0, %v5164_v18  ;;  %v5133_v53 = vadd.f32 %v9432_v11, %v5096_v15 }
 0x4d8   : > { %v4913_v30 = vpop.f32.mrb[6].mxu1 }
 0x4d9   : > { %v5165_v58 = vadd.f32 %v6177_v22, %v5133_v53  ;;  %v5097_v20 = vmul.f32 %v9427_v45, %v4913_v30  ;;  %v4915_v56 = vpop.f32.mrb[7].mxu1  ;;  %v6187_v53 = vld [vmem:[%s6279_s6 + $0x60] sm:$0xff] }
 0x4db   : > { %5197 = vst.msk [vmem:[%s9441_s20 + $0x10] sm:$0xff] %vm230_vm0, %v5165_v58  ;;  %v5134_v13 = vadd.f32 %v9432_v11, %v5097_v20 }
 0x4dc   : > { %v4918_v10 = vpop.f32.mrb[8].mxu1 }
 0x4dd   : > { %v5166_v0 = vadd.f32 %v6178_v36, %v5134_v13  ;;  %v5098_v23 = vmul.f32 %v9427_v45, %v4918_v10  ;;  %v4920_v5 = vpop.f32.mrb[9].mxu1  ;;  %v6188_v13 = vld [vmem:[%s6279_s6 + $0x68] sm:$0xff] }
 0x4df   : > { %5198 = vst.msk [vmem:[%s9441_s20 + $0x18] sm:$0xff] %vm230_vm0, %v5166_v0  ;;  %v5135_v51 = vadd.f32 %v9432_v11, %v5098_v23 }
 0x4e0   : > { %v4923_v42 = vpop.f32.mrb[10].mxu1 }
 0x4e1   : > { %v5167_v4 = vadd.f32 %v6179_v55, %v5135_v51  ;;  %v5099_v21 = vmul.f32 %v9427_v45, %v4923_v42  ;;  %v4925_v6 = vpop.f32.mrb[11].mxu1  ;;  %v6189_v51 = vld [vmem:[%s6279_s6 + $0x70] sm:$0xff] }
 0x4e3   : > { %5199 = vst.msk [vmem:[%s9441_s20 + $0x20] sm:$0xff] %vm230_vm0, %v5167_v4  ;;  %v5136_v49 = vadd.f32 %v9432_v11, %v5099_v21 }
 0x4e4   : > { %v4928_v31 = vpop.f32.mrb[12].mxu1 }
 0x4e5   : > { %v5168_v12 = vadd.f32 %v6180_v28, %v5136_v49  ;;  %v5100_v60 = vmul.f32 %v9427_v45, %v4928_v31  ;;  %v4930_v27 = vpop.f32.mrb[13].mxu1  ;;  %v6190_v49 = vld [vmem:[%s6279_s6 + $0x78] sm:$0xff] }
 0x4e7   : > { %5200 = vst.msk [vmem:[%s9441_s20 + $0x28] sm:$0xff] %vm230_vm0, %v5168_v12  ;;  %v5137_v47 = vadd.f32 %v9432_v11, %v5100_v60 }
 0x4e8   : > { %v4933_v17 = vpop.f32.mrb[14].mxu1 }
 0x4e9   : > { %v5169_v25 = vadd.f32 %v6181_v35, %v5137_v47  ;;  %v5101_v41 = vmul.f32 %v9427_v45, %v4933_v17  ;;  %v4935_v37 = vpop.f32.mrb[15].mxu1  ;;  %v6191_v47 = vld [vmem:[%s6279_s6 + $0x80] sm:$0xff] }
 0x4eb   : > { %5201 = vst.msk [vmem:[%s9441_s20 + $0x30] sm:$0xff] %vm230_vm0, %v5169_v25  ;;  %v5138_v8 = vadd.f32 %v9432_v11, %v5101_v41 }
 0x4ec   : > { %v4938_v26 = vpop.f32.mrb[16].mxu1 }
 0x4ed   : > { %v5170_v24 = vadd.f32 %v6182_v14, %v5138_v8  ;;  %v5102_v1 = vmul.f32 %v9427_v45, %v4938_v26  ;;  %v4940_v9 = vpop.f32.mrb[17].mxu1  ;;  %v6192_v8 = vld [vmem:[%s6279_s6 + $0x88] sm:$0xff] }
 0x4ef   : > { %5202 = vst.msk [vmem:[%s9441_s20 + $0x38] sm:$0xff] %vm230_vm0, %v5170_v24  ;;  %v5139_v46 = vadd.f32 %v9432_v11, %v5102_v1 }
 0x4f0   : > { %v4943_v59 = vpop.f32.mrb[18].mxu1 }
 0x4f1   : > { %v5171_v44 = vadd.f32 %v6183_v2, %v5139_v46  ;;  %v5103_v57 = vmul.f32 %v9427_v45, %v4943_v59  ;;  %v4945_v52 = vpop.f32.mrb[19].mxu1  ;;  %v6193_v46 = vld [vmem:[%s6279_s6 + $0x90] sm:$0xff] }
 0x4f3   : > { %5203 = vst.msk [vmem:[%s9441_s20 + $0x40] sm:$0xff] %vm230_vm0, %v5171_v44  ;;  %v5140_v33 = vadd.f32 %v9432_v11, %v5103_v57 }
 0x4f4   : > { %v4948_v40 = vpop.f32.mrb[20].mxu1 }
 0x4f5   : > { %v5172_v39 = vadd.f32 %v6184_v38, %v5140_v33  ;;  %v5104_v7 = vmul.f32 %v9427_v45, %v4948_v40  ;;  %v4950_v62 = vpop.f32.mrb[21].mxu1  ;;  %v6194_v33 = vld [vmem:[%s6279_s6 + $0x98] sm:$0xff] }
 0x4f7   : > { %5204 = vst.msk [vmem:[%s9441_s20 + $0x48] sm:$0xff] %vm230_vm0, %v5172_v39  ;;  %v5141_v32 = vadd.f32 %v9432_v11, %v5104_v7 }
 0x4f8   : > { %v4953_v43 = vpop.f32.mrb[22].mxu1 }
 0x4f9   : > { %v5173_v61 = vadd.f32 %v6185_v3, %v5141_v32  ;;  %v5105_v29 = vmul.f32 %v9427_v45, %v4953_v43  ;;  %v4955_v19 = vpop.f32.mrb[23].mxu1  ;;  %v6195_v32 = vld [vmem:[%s6279_s6 + $0xa0] sm:$0xff] }
 0x4fb   : > { %5205 = vst.msk [vmem:[%s9441_s20 + $0x50] sm:$0xff] %vm230_vm0, %v5173_v61  ;;  %v5142_v50 = vadd.f32 %v9432_v11, %v5105_v29 }
 0x4fc   : > { %v4958_v34 = vpop.f32.mrb[24].mxu1 }
 0x4fd   : > { %v5174_v48 = vadd.f32 %v6186_v54, %v5142_v50  ;;  %v5106_v63 = vmul.f32 %v9427_v45, %v4958_v34  ;;  %v4960_v18 = vpop.f32.mrb[25].mxu1  ;;  %v6196_v50 = vld [vmem:[%s6279_s6 + $0xa8] sm:$0xff] }
 0x4ff   : > { %5206 = vst.msk [vmem:[%s9441_s20 + $0x58] sm:$0xff] %vm230_vm0, %v5174_v48  ;;  %v5143_v15 = vadd.f32 %v9432_v11, %v5106_v63 }
 0x500   : > { %v4963_v16 = vpop.f32.mrb[26].mxu1 }
 0x501   : > { %v5175_v30 = vadd.f32 %v6187_v53, %v5143_v15  ;;  %v5107_v22 = vmul.f32 %v9427_v45, %v4963_v16  ;;  %v4965_v58 = vpop.f32.mrb[27].mxu1  ;;  %v6197_v15 = vld [vmem:[%s6279_s6 + $0xb0] sm:$0xff] }
 0x503   : > { %5207 = vst.msk [vmem:[%s9441_s20 + $0x60] sm:$0xff] %vm230_vm0, %v5175_v30  ;;  %v5144_v20 = vadd.f32 %v9432_v11, %v5107_v22 }
 0x504   : > { %v4968_v56 = vpop.f32.mrb[28].mxu1 }
 0x505   : > { %v5176_v10 = vadd.f32 %v6188_v13, %v5144_v20  ;;  %v5108_v36 = vmul.f32 %v9427_v45, %v4968_v56  ;;  %v4970_v0 = vpop.f32.mrb[29].mxu1  ;;  %v6198_v20 = vld [vmem:[%s6279_s6 + $0xb8] sm:$0xff] }
 0x507   : > { %5208 = vst.msk [vmem:[%s9441_s20 + $0x68] sm:$0xff] %vm230_vm0, %v5176_v10  ;;  %v5145_v23 = vadd.f32 %v9432_v11, %v5108_v36 }
 0x508   : > { %v4973_v5 = vpop.f32.mrb[30].mxu1 }
 0x509   : > { %v5177_v42 = vadd.f32 %v6189_v51, %v5145_v23  ;;  %v5109_v55 = vmul.f32 %v9427_v45, %v4973_v5  ;;  %v4975_v4 = vpop.f32.mrb[31].mxu1  ;;  %v6199_v23 = vld [vmem:[%s6279_s6 + $0xc0] sm:$0xff] }
 0x50b   : > { %5209 = vst.msk [vmem:[%s9441_s20 + $0x70] sm:$0xff] %vm230_vm0, %v5177_v42  ;;  %v5146_v21 = vadd.f32 %v9432_v11, %v5109_v55 }
 0x50c   : > { %v4978_v6 = vpop.f32.mrb[32].mxu1 }
 0x50d   : > { %v5178_v31 = vadd.f32 %v6190_v49, %v5146_v21  ;;  %v5110_v28 = vmul.f32 %v9427_v45, %v4978_v6  ;;  %v4980_v12 = vpop.f32.mrb[33].mxu1  ;;  %v6200_v21 = vld [vmem:[%s6279_s6 + $0xc8] sm:$0xff] }
 0x50f   : > { %5210 = vst.msk [vmem:[%s9441_s20 + $0x78] sm:$0xff] %vm230_vm0, %v5178_v31  ;;  %v5147_v60 = vadd.f32 %v9432_v11, %v5110_v28 }
 0x510   : > { %v4983_v27 = vpop.f32.mrb[34].mxu1 }
 0x511   : > { %v5179_v17 = vadd.f32 %v6191_v47, %v5147_v60  ;;  %v5111_v35 = vmul.f32 %v9427_v45, %v4983_v27  ;;  %v4985_v25 = vpop.f32.mrb[35].mxu1  ;;  %v6201_v60 = vld [vmem:[%s6279_s6 + $0xd0] sm:$0xff] }
 0x513   : > { %5211 = vst.msk [vmem:[%s9441_s20 + $0x80] sm:$0xff] %vm230_vm0, %v5179_v17  ;;  %v5148_v41 = vadd.f32 %v9432_v11, %v5111_v35 }
 0x514   : > { %v4988_v37 = vpop.f32.mrb[36].mxu1 }
 0x515   : > { %v5180_v26 = vadd.f32 %v6192_v8, %v5148_v41  ;;  %v5112_v14 = vmul.f32 %v9427_v45, %v4988_v37  ;;  %v4990_v24 = vpop.f32.mrb[37].mxu1  ;;  %v6202_v41 = vld [vmem:[%s6279_s6 + $0xd8] sm:$0xff] }
 0x517   : > { %5212 = vst.msk [vmem:[%s9441_s20 + $0x88] sm:$0xff] %vm230_vm0, %v5180_v26  ;;  %v5149_v1 = vadd.f32 %v9432_v11, %v5112_v14 }
 0x518   : > { %v4993_v9 = vpop.f32.mrb[38].mxu1 }
 0x519   : > { %v5181_v59 = vadd.f32 %v6193_v46, %v5149_v1  ;;  %v5113_v2 = vmul.f32 %v9427_v45, %v4993_v9  ;;  %v4995_v44 = vpop.f32.mrb[39].mxu1  ;;  %v6203_v1 = vld [vmem:[%s6279_s6 + $0xe0] sm:$0xff] }
 0x51b   : > { %5213 = vst.msk [vmem:[%s9441_s20 + $0x90] sm:$0xff] %vm230_vm0, %v5181_v59  ;;  %v5150_v57 = vadd.f32 %v9432_v11, %v5113_v2 }
 0x51c   : > { %v4998_v52 = vpop.f32.mrb[40].mxu1 }
 0x51d   : > { %v5182_v40 = vadd.f32 %v6194_v33, %v5150_v57  ;;  %v5114_v38 = vmul.f32 %v9427_v45, %v4998_v52  ;;  %v5000_v39 = vpop.f32.mrb[41].mxu1  ;;  %v6204_v57 = vld [vmem:[%s6279_s6 + $0xe8] sm:$0xff] }
 0x51f   : > { %5214 = vst.msk [vmem:[%s9441_s20 + $0x98] sm:$0xff] %vm230_vm0, %v5182_v40  ;;  %v5151_v7 = vadd.f32 %v9432_v11, %v5114_v38 }
 0x520   : > { %v5003_v62 = vpop.f32.mrb[42].mxu1 }
 0x521   : > { %v5183_v43 = vadd.f32 %v6195_v32, %v5151_v7  ;;  %v5115_v3 = vmul.f32 %v9427_v45, %v5003_v62  ;;  %v5005_v61 = vpop.f32.mrb[43].mxu1  ;;  %v6205_v7 = vld [vmem:[%s6279_s6 + $0xf0] sm:$0xff] }
 0x522   : > { %v6206_v61 = vld [vmem:[%s6279_s6 + $0xf8] sm:$0xff] }
 0x523   : > { %5215 = vst.msk [vmem:[%s9441_s20 + $0xa0] sm:$0xff] %vm230_vm0, %v5183_v43  ;;  %v5152_v29 = vadd.f32 %v9432_v11, %v5115_v3 }
 0x524   : > { %v5008_v19 = vpop.f32.mrb[44].mxu1 }
 0x525   : > { %v5184_v34 = vadd.f32 %v6196_v50, %v5152_v29  ;;  %v5116_v54 = vmul.f32 %v9427_v45, %v5008_v19  ;;  %v5010_v48 = vpop.f32.mrb[45].mxu1 }
 0x527   : > { %5216 = vst.msk [vmem:[%s9441_s20 + $0xa8] sm:$0xff] %vm230_vm0, %v5184_v34  ;;  %v5153_v63 = vadd.f32 %v9432_v11, %v5116_v54 }
 0x528   : > { %v5013_v18 = vpop.f32.mrb[46].mxu1 }
 0x529   : > { %v5185_v16 = vadd.f32 %v6197_v15, %v5153_v63  ;;  %v5117_v53 = vmul.f32 %v9427_v45, %v5013_v18  ;;  %v5015_v30 = vpop.f32.mrb[47].mxu1 }
 0x52b   : > { %5217 = vst.msk [vmem:[%s9441_s20 + $0xb0] sm:$0xff] %vm230_vm0, %v5185_v16  ;;  %v5154_v22 = vadd.f32 %v9432_v11, %v5117_v53 }
 0x52c   : > { %v5018_v58 = vpop.f32.mrb[48].mxu1 }
 0x52d   : > { %v5186_v56 = vadd.f32 %v6198_v20, %v5154_v22  ;;  %v5118_v13 = vmul.f32 %v9427_v45, %v5018_v58  ;;  %v5020_v10 = vpop.f32.mrb[49].mxu1 }
 0x52f   : > { %5218 = vst.msk [vmem:[%s9441_s20 + $0xb8] sm:$0xff] %vm230_vm0, %v5186_v56  ;;  %v5155_v36 = vadd.f32 %v9432_v11, %v5118_v13 }
 0x530   : > { %v5023_v0 = vpop.f32.mrb[50].mxu1 }
 0x531   : > { %v5187_v5 = vadd.f32 %v6199_v23, %v5155_v36  ;;  %v5119_v51 = vmul.f32 %v9427_v45, %v5023_v0  ;;  %v5025_v42 = vpop.f32.mrb[51].mxu1 }
 0x533   : > { %5219 = vst.msk [vmem:[%s9441_s20 + $0xc0] sm:$0xff] %vm230_vm0, %v5187_v5  ;;  %v5156_v55 = vadd.f32 %v9432_v11, %v5119_v51 }
 0x534   : > { %v5028_v4 = vpop.f32.mrb[52].mxu1 }
 0x535   : > { %v5188_v6 = vadd.f32 %v6200_v21, %v5156_v55  ;;  %v5120_v49 = vmul.f32 %v9427_v45, %v5028_v4  ;;  %v5030_v31 = vpop.f32.mrb[53].mxu1 }
 0x537   : > { %5220 = vst.msk [vmem:[%s9441_s20 + $0xc8] sm:$0xff] %vm230_vm0, %v5188_v6  ;;  %v5157_v28 = vadd.f32 %v9432_v11, %v5120_v49 }
 0x538   : > { %v5033_v12 = vpop.f32.mrb[54].mxu1 }
 0x539   : > { %v5189_v27 = vadd.f32 %v6201_v60, %v5157_v28  ;;  %v5121_v47 = vmul.f32 %v9427_v45, %v5033_v12  ;;  %v5035_v17 = vpop.f32.mrb[55].mxu1 }
 0x53b   : > { %5221 = vst.msk [vmem:[%s9441_s20 + $0xd0] sm:$0xff] %vm230_vm0, %v5189_v27  ;;  %v5158_v35 = vadd.f32 %v9432_v11, %v5121_v47 }
 0x53c   : > { %v5038_v25 = vpop.f32.mrb[56].mxu1 }
 0x53d   : > { %v5190_v37 = vadd.f32 %v6202_v41, %v5158_v35  ;;  %v5122_v8 = vmul.f32 %v9427_v45, %v5038_v25  ;;  %v5040_v26 = vpop.f32.mrb[57].mxu1 }
 0x53f   : > { %5222 = vst.msk [vmem:[%s9441_s20 + $0xd8] sm:$0xff] %vm230_vm0, %v5190_v37  ;;  %v5159_v14 = vadd.f32 %v9432_v11, %v5122_v8 }
 0x540   : > { %v5043_v24 = vpop.f32.mrb[58].mxu1 }
 0x541   : > { %v5191_v9 = vadd.f32 %v6203_v1, %v5159_v14  ;;  %v5123_v46 = vmul.f32 %v9427_v45, %v5043_v24  ;;  %v5045_v59 = vpop.f32.mrb[59].mxu1 }
 0x543   : > { %5223 = vst.msk [vmem:[%s9441_s20 + $0xe0] sm:$0xff] %vm230_vm0, %v5191_v9  ;;  %v5160_v2 = vadd.f32 %v9432_v11, %v5123_v46 }
 0x544   : > { %v5048_v44 = vpop.f32.mrb[60].mxu1 }
 0x545   : > { %v5192_v52 = vadd.f32 %v6204_v57, %v5160_v2  ;;  %v5124_v33 = vmul.f32 %v9427_v45, %v5048_v44  ;;  %v5050_v40 = vpop.f32.mrb[61].mxu1 }
 0x547   : > { %5224 = vst.msk [vmem:[%s9441_s20 + $0xe8] sm:$0xff] %vm230_vm0, %v5192_v52  ;;  %v5161_v38 = vadd.f32 %v9432_v11, %v5124_v33 }
 0x548   : > { %v5053_v39 = vpop.f32.mrb[62].mxu1 }
 0x549   : > { %v5193_v62 = vadd.f32 %v6205_v7, %v5161_v38  ;;  %v5125_v32 = vmul.f32 %v9427_v45, %v5053_v39  ;;  %v5055_v43 = vpop.f32.mrb[63].mxu1 }
 0x54b   : > { %5225 = vst.msk [vmem:[%s9441_s20 + $0xf0] sm:$0xff] %vm230_vm0, %v5193_v62  ;;  %v5162_v3 = vadd.f32 %v9432_v11, %v5125_v32 }
 0x54d   : > { %v5194_v29 = vadd.f32 %v6206_v61, %v5162_v3 }
 0x54f   : > { %5226 = vst.msk [vmem:[%s9441_s20 + $0xf8] sm:$0xff] %vm230_vm0, %v5194_v29 }
 0x550 PF: > { %s14_s15 = sadd.s32 1, %s6213_s15  }
 0x551   : > { %p11_p4 = scmp.ge.s32.totalorder %s14_s15, 4  }
 0x553   :  { %13 = sbr.rel (!%p11_p4) target bundleno = 1 (0x1), region = 76 }

</bundles_post_ra>
